<compile_context>
chip_gen: v7x
topology: tpu7x:2x2x1
jax: 0.10.0
libtpu: 0.0.40
codegen_flags: <defaults>
</compile_context>

<pallas_src>
import functools

import jax
import jax.numpy as jnp
from jax import lax
from jax.experimental import pallas as pl
from jax.experimental.pallas import tpu as pltpu


# ----------------------------- Pallas kernel -----------------------------
def _gru_bidir_kernel(x_ref, wihf_ref, wihb_ref, bihf_ref, bihb_ref,
                      whh_ref, bhnf_ref, bhnb_ref,
                      out_ref, hid_ref,
                      gxf_sc, gxb_sc, outb_sc,
                      *, T, Bp, Hp, unroll):
    """Bidirectional single-layer GRU with PyTorch semantics (hidden width padded to Hp).

    x_ref    : (T*Bp, E)    time-major flattened embeddings (batch padded to Bp)
    wih*_ref : (E, 3Hp)     gate-fused [r|z|n] input weights per direction (H-padded)
    bih*_ref : (1, 3Hp)     b_ih with b_hr/b_hz folded in, per direction
    whh_ref  : (2Hp, 6Hp)   block-diagonal [fwd | bwd] gate-fused recurrent weights
    bhn*_ref : (1, Hp)      b_hn per direction (multiplied by r inside the cell)
    out_ref  : (T*Bp, Hp)   fwd+bwd summed outputs (lane-dense)
    hid_ref  : (2, Bp, Hp)  final hidden states
    gx*_sc   : (T*Bp, 3Hp)  VMEM scratch: precomputed input-side gate pre-activations
    outb_sc  : (T*Bp, Hp)   VMEM scratch: backward-direction outputs
    """
    # Hoisted input projections: one big MXU GEMM per direction over ALL timesteps,
    # written to per-direction scratches so each step reads only the 3Hp lanes it needs.
    gxf_sc[...] = (jnp.dot(x_ref[...], wihf_ref[...],
                           preferred_element_type=jnp.float32) + bihf_ref[...])
    gxb_sc[...] = (jnp.dot(x_ref[...], wihb_ref[...],
                           preferred_element_type=jnp.float32) + bihb_ref[...])

    whh_blk = whh_ref[...]          # (2Hp, 6Hp) — loaded once, loop invariant
    bhn_f = bhnf_ref[...]           # (1, Hp)
    bhn_b = bhnb_ref[...]

    def cell(gx3, gh3, bhn, h):
        # gx3 already carries b_ih (+ folded b_hr/b_hz); gh3 = h @ W_hh (no bias).
        # One sigmoid over the contiguous r|z slab (lane-aligned at Hp multiples).
        rz = jax.nn.sigmoid(gx3[:, :2 * Hp] + gh3[:, :2 * Hp])
        r = rz[:, :Hp]
        z = rz[:, Hp:]
        n = jnp.tanh(gx3[:, 2 * Hp:] + r * (gh3[:, 2 * Hp:] + bhn))
        return (1.0 - z) * n + z * h

    def step(t, carry):
        hf, hb = carry
        off_f = pl.multiple_of(t * Bp, Bp)               # forward reads time t
        off_b = pl.multiple_of((T - 1 - t) * Bp, Bp)     # backward reads time T-1-t
        h_cat = jnp.concatenate([hf, hb], axis=1)        # (Bp, 2Hp)
        # Single fused recurrent matmul for BOTH directions (block-diagonal W_hh).
        gh = jnp.dot(h_cat, whh_blk, preferred_element_type=jnp.float32)  # (Bp, 6Hp)
        g_f = gxf_sc[pl.ds(off_f, Bp), :]                # (Bp, 3Hp) — exactly what's needed
        g_b = gxb_sc[pl.ds(off_b, Bp), :]
        hf_new = cell(g_f, gh[:, :3 * Hp], bhn_f, hf)
        hb_new = cell(g_b, gh[:, 3 * Hp:], bhn_b, hb)
        out_ref[pl.ds(off_f, Bp), :] = hf_new            # lane-dense unmasked store
        outb_sc[pl.ds(off_b, Bp), :] = hb_new
        return hf_new, hb_new

    h0 = jnp.zeros((Bp, Hp), jnp.float32)
    hf_fin, hb_fin = lax.fori_loop(0, T, step, (h0, h0), unroll=unroll)

    # Fused fwd + bwd sum: one full-buffer add, no extra kernel / HBM pass.
    out_ref[...] = out_ref[...] + outb_sc[...]
    # Final hidden states written once (not every step).
    hid_ref[0] = hf_fin
    hid_ref[1] = hb_fin


# ----------------------------- Wrapper -----------------------------
@functools.partial(jax.jit, static_argnames=("hidden_size",))
def encoder_rnn_forward(input_seqs, input_lengths, params, hidden_size):
    """Pallas implementation of EncoderRNN.forward (hidden=None path).

    input_lengths is accepted for signature parity but unused, matching the
    reference module (it never packs the sequence).
    """
    del input_lengths  # unused, exactly like the PyTorch module's forward
    H = hidden_size
    Hp = ((H + 127) // 128) * 128            # lane-dense hidden width inside the kernel
    T, B = input_seqs.shape
    E = params["embedding"].shape[1]
    Bp = max(8, ((B + 7) // 8) * 8)          # sublane-multiple batch

    # Pad batch on the token-id side (pad rows gather embedding row 0) so the embedding
    # lookup directly produces (T, Bp, E) — no extra zeros+scatter HBM sweep.
    ids = jnp.zeros((T, Bp), input_seqs.dtype).at[:, :B].set(input_seqs)
    x_flat = jnp.take(params["embedding"], ids, axis=0).astype(jnp.float32).reshape(T * Bp, E)

    def padh(a, axis):
        cfg = [(0, 0)] * a.ndim
        cfg[axis] = (0, Hp - H)
        return jnp.pad(a, cfg)

    # Pack gate-fused, H-padded weights; fold b_hr/b_hz into the input-side bias
    # (additive pre-activation), keep b_hn separate (multiplied by r inside the cell).
    def pack_dir(wih, whh, bih, bhh):
        w_ih = jnp.concatenate([padh(wih[g], 1) for g in range(3)], axis=1)          # (E, 3Hp)
        w_hh = jnp.concatenate([padh(padh(whh[g], 0), 1) for g in range(3)], axis=1)  # (Hp, 3Hp)
        b_in = jnp.concatenate([padh(bih[0] + bhh[0], 0),
                                padh(bih[1] + bhh[1], 0),
                                padh(bih[2], 0)])[None, :]                            # (1, 3Hp)
        b_hn = padh(bhh[2], 0)[None, :]                                               # (1, Hp)
        return w_ih, w_hh, b_in, b_hn

    wihf, whhf3, binf, bhnf = pack_dir(params["wih_f"], params["whh_f"],
                                       params["bih_f"], params["bhh_f"])
    wihb, whhb3, binb, bhnb = pack_dir(params["wih_b"], params["whh_b"],
                                       params["bih_b"], params["bhh_b"])
    # Block-diagonal recurrent weights: [hf | hb] @ whh_blk = [fwd gates | bwd gates].
    whh_blk = (jnp.zeros((2 * Hp, 6 * Hp), jnp.float32)
               .at[:Hp, :3 * Hp].set(whhf3)
               .at[Hp:, 3 * Hp:].set(whhb3))

    # VMEM budget (all resident, f32) — set the scoped limit explicitly (v5e default 16 MiB).
    f32 = 4
    resident_bytes = f32 * (T * Bp * E                   # x
                            + 2 * E * 3 * Hp + 2 * 3 * Hp  # W_ih / b_ih
                            + 2 * Hp * 6 * Hp + 2 * Hp     # W_hh block-diag / b_hn
                            + T * Bp * Hp                  # out
                            + 2 * Bp * Hp                  # hid
                            + 2 * T * Bp * 3 * Hp          # gx scratches
                            + T * Bp * Hp)                 # outb scratch
    vmem_limit = int(min(100 * 2**20, max(4 * 2**20, 2 * resident_bytes)))
    cost = pl.CostEstimate(
        flops=2 * T * Bp * (E * 6 * Hp + 2 * Hp * 6 * Hp) + 12 * T * Bp * Hp,
        transcendentals=6 * T * Bp * Hp,
        bytes_accessed=int(resident_bytes))

    vmem_spec = pl.BlockSpec(memory_space=pltpu.MemorySpace.VMEM)  # whole array in VMEM

    kernel = functools.partial(_gru_bidir_kernel, T=T, Bp=Bp, Hp=Hp,
                               unroll=(T if T <= 16 else 4))  # bounded unroll for long T
    out_flat, hid = pl.pallas_call(
        kernel,
        out_shape=(jax.ShapeDtypeStruct((T * Bp, Hp), jnp.float32),
                   jax.ShapeDtypeStruct((2, Bp, Hp), jnp.float32)),
        in_specs=[vmem_spec] * 8,
        out_specs=[vmem_spec, vmem_spec],
        scratch_shapes=[pltpu.VMEM((T * Bp, 3 * Hp), jnp.float32),   # gx forward
                        pltpu.VMEM((T * Bp, 3 * Hp), jnp.float32),   # gx backward
                        pltpu.VMEM((T * Bp, Hp), jnp.float32)],      # backward outputs
        compiler_params=pltpu.CompilerParams(vmem_limit_bytes=vmem_limit),
        cost_estimate=cost,
    )(x_flat, wihf, wihb, binf, binb, whh_blk, bhnf, bhnb)

    outputs = out_flat.reshape(T, Bp, Hp)[:, :B, :H]
    hidden = hid[:, :B, :H]
    return outputs, hidden


# ----------------------------- Pure-JAX reference for self-check -----------------------------
def _gru_dir_ref(x_seq, wih, whh, bih, bhh):
    B = x_seq.shape[1]
    H = whh.shape[2]

    def step(h, x):
        gx_r = x @ wih[0] + bih[0]
        gx_z = x @ wih[1] + bih[1]
        gx_n = x @ wih[2] + bih[2]
        gh_r = h @ whh[0] + bhh[0]
        gh_z = h @ whh[1] + bhh[1]
        gh_n = h @ whh[2] + bhh[2]
        r = jax.nn.sigmoid(gx_r + gh_r)
        z = jax.nn.sigmoid(gx_z + gh_z)
        n = jnp.tanh(gx_n + r * gh_n)
        h_new = (1.0 - z) * n + z * h
        return h_new, h_new

    h0 = jnp.zeros((B, H), jnp.float32)
    h_final, outs = lax.scan(step, h0, x_seq)
    return outs, h_final


def encoder_rnn_reference(input_seqs, params, H):
    emb = jnp.take(params["embedding"], input_seqs, axis=0)
    out_f, hf = _gru_dir_ref(emb, params["wih_f"], params["whh_f"],
                             params["bih_f"], params["bhh_f"])
    out_b_rev, hb = _gru_dir_ref(emb[::-1], params["wih_b"], params["whh_b"],
                                 params["bih_b"], params["bhh_b"])
    out_b = out_b_rev[::-1]
    return out_f + out_b, jnp.stack([hf, hb], axis=0)


# ----------------------------- Main -----------------------------
if __name__ == "__main__":
    VOCAB, EMB, HIDDEN = 20, 16, 32
    T, B = 8, 2

    key = jax.random.PRNGKey(0)
    keys = jax.random.split(key, 12)
    scale = 1.0 / jnp.sqrt(jnp.float32(HIDDEN))

    params = {
        # nn.Embedding(len(word_embeddings), len(word_embeddings[0])) weights (frozen copy)
        "embedding": jax.random.normal(keys[0], (VOCAB, EMB), jnp.float32),
        # forward direction GRU weights, gate-major [r,z,n], pre-transposed for x @ W
        "wih_f": jax.random.uniform(keys[1], (3, EMB, HIDDEN), jnp.float32, -scale, scale),
        "whh_f": jax.random.uniform(keys[2], (3, HIDDEN, HIDDEN), jnp.float32, -scale, scale),
        "bih_f": jax.random.uniform(keys[3], (3, HIDDEN), jnp.float32, -scale, scale),
        "bhh_f": jax.random.uniform(keys[4], (3, HIDDEN), jnp.float32, -scale, scale),
        # backward direction
        "wih_b": jax.random.uniform(keys[5], (3, EMB, HIDDEN), jnp.float32, -scale, scale),
        "whh_b": jax.random.uniform(keys[6], (3, HIDDEN, HIDDEN), jnp.float32, -scale, scale),
        "bih_b": jax.random.uniform(keys[7], (3, HIDDEN), jnp.float32, -scale, scale),
        "bhh_b": jax.random.uniform(keys[8], (3, HIDDEN), jnp.float32, -scale, scale),
    }

    input_seqs = jax.random.randint(keys[9], (T, B), 0, VOCAB, dtype=jnp.int32)
    input_lengths = jnp.full((B,), T, dtype=jnp.int32)   # accepted but unused (matches module)

    outputs, hidden = encoder_rnn_forward(input_seqs, input_lengths, params, HIDDEN)
    outputs = jax.block_until_ready(outputs)
    hidden = jax.block_until_ready(hidden)

    ref_out, ref_hid = encoder_rnn_reference(input_seqs, params, HIDDEN)
    assert outputs.shape == (T, B, HIDDEN) and hidden.shape == (2, B, HIDDEN)
    assert jnp.allclose(outputs, ref_out, atol=1e-5, rtol=1e-5)
    assert jnp.allclose(hidden, ref_hid, atol=1e-5, rtol=1e-5)

    # TODO(synk): dropout (self.dropout) is a no-op here — PyTorch GRU dropout only applies
    # between layers when n_layers > 1 and in training mode; n_layers=1 inference matches.
    print("KERNEL_OK")
</pallas_src>

<mosaic_0001>
module attributes {stable_mosaic.version = 11 : i64} {
  func.func @_gru_bidir_kernel(%arg0: memref<64x16xf32, #tpu.memory_space<vmem>>, %arg1: memref<16x384xf32, #tpu.memory_space<vmem>>, %arg2: memref<16x384xf32, #tpu.memory_space<vmem>>, %arg3: memref<1x384xf32, #tpu.memory_space<vmem>>, %arg4: memref<1x384xf32, #tpu.memory_space<vmem>>, %arg5: memref<256x768xf32, #tpu.memory_space<vmem>>, %arg6: memref<1x128xf32, #tpu.memory_space<vmem>>, %arg7: memref<1x128xf32, #tpu.memory_space<vmem>>, %arg8: memref<64x128xf32, #tpu.memory_space<vmem>>, %arg9: memref<2x8x128xf32, #tpu.memory_space<vmem>>, %arg10: memref<64x384xf32, #tpu.memory_space<vmem>>, %arg11: memref<64x384xf32, #tpu.memory_space<vmem>>, %arg12: memref<64x128xf32, #tpu.memory_space<vmem>>) attributes {dimension_semantics = [], scalar_prefetch = 0 : i64, scratch_operands = 3 : i64, tpu.core_type = #tpu.core_type<tc>} {
    %c0 = arith.constant 0 : index
    %c0_0 = arith.constant 0 : index
    %0 = vector.load %arg0[%c0, %c0_0] : memref<64x16xf32, #tpu.memory_space<vmem>>, vector<64x16xf32>
    %c0_1 = arith.constant 0 : index
    %c0_2 = arith.constant 0 : index
    %1 = vector.load %arg1[%c0_1, %c0_2] : memref<16x384xf32, #tpu.memory_space<vmem>>, vector<16x384xf32>
    %cst = arith.constant dense<0.000000e+00> : vector<64x384xf32>
    %2 = tpu.matmul %0, %1, %cst {dimension_numbers = #tpu.dot_dimension_numbers<[1], [0], [0], [1], [0, 0, 1, 1], [], []>} : vector<64x16xf32>, vector<16x384xf32>, vector<64x384xf32> -> vector<64x384xf32>
    %c0_3 = arith.constant 0 : index
    %c0_4 = arith.constant 0 : index
    %3 = vector.load %arg3[%c0_3, %c0_4] : memref<1x384xf32, #tpu.memory_space<vmem>>, vector<1x384xf32>
    %4 = vector.broadcast %3 : vector<1x384xf32> to vector<64x384xf32>
    %5 = arith.addf %2, %4 : vector<64x384xf32>
    %c0_5 = arith.constant 0 : index
    %c0_6 = arith.constant 0 : index
    %6 = vector.load %arg10[%c0_5, %c0_6] : memref<64x384xf32, #tpu.memory_space<vmem>>, vector<64x384xf32>
    tpu.vector_store %arg10[%c0_5, %c0_6], %5 {strides = array<i32>} : memref<64x384xf32, #tpu.memory_space<vmem>>, vector<64x384xf32>,
    %c0_7 = arith.constant 0 : index
    %c0_8 = arith.constant 0 : index
    %7 = vector.load %arg0[%c0_7, %c0_8] : memref<64x16xf32, #tpu.memory_space<vmem>>, vector<64x16xf32>
    %c0_9 = arith.constant 0 : index
    %c0_10 = arith.constant 0 : index
    %8 = vector.load %arg2[%c0_9, %c0_10] : memref<16x384xf32, #tpu.memory_space<vmem>>, vector<16x384xf32>
    %cst_11 = arith.constant dense<0.000000e+00> : vector<64x384xf32>
    %9 = tpu.matmul %7, %8, %cst_11 {dimension_numbers = #tpu.dot_dimension_numbers<[1], [0], [0], [1], [0, 0, 1, 1], [], []>} : vector<64x16xf32>, vector<16x384xf32>, vector<64x384xf32> -> vector<64x384xf32>
    %c0_12 = arith.constant 0 : index
    %c0_13 = arith.constant 0 : index
    %10 = vector.load %arg4[%c0_12, %c0_13] : memref<1x384xf32, #tpu.memory_space<vmem>>, vector<1x384xf32>
    %11 = vector.broadcast %10 : vector<1x384xf32> to vector<64x384xf32>
    %12 = arith.addf %9, %11 : vector<64x384xf32>
    %c0_14 = arith.constant 0 : index
    %c0_15 = arith.constant 0 : index
    %13 = vector.load %arg11[%c0_14, %c0_15] : memref<64x384xf32, #tpu.memory_space<vmem>>, vector<64x384xf32>
    tpu.vector_store %arg11[%c0_14, %c0_15], %12 {strides = array<i32>} : memref<64x384xf32, #tpu.memory_space<vmem>>, vector<64x384xf32>,
    %c0_16 = arith.constant 0 : index
    %c0_17 = arith.constant 0 : index
    %14 = vector.load %arg5[%c0_16, %c0_17] : memref<256x768xf32, #tpu.memory_space<vmem>>, vector<256x768xf32>
    %c0_18 = arith.constant 0 : index
    %c0_19 = arith.constant 0 : index
    %15 = vector.load %arg6[%c0_18, %c0_19] : memref<1x128xf32, #tpu.memory_space<vmem>>, vector<1x128xf32>
    %c0_20 = arith.constant 0 : index
    %c0_21 = arith.constant 0 : index
    %16 = vector.load %arg7[%c0_20, %c0_21] : memref<1x128xf32, #tpu.memory_space<vmem>>, vector<1x128xf32>
    %cst_22 = arith.constant 0.000000e+00 : f32
    %17 = vector.broadcast %cst_22 : f32 to vector<8x128xf32>
    %c0_i32 = arith.constant 0 : i32
    %c8_i32 = arith.constant 8 : i32
    %18 = arith.muli %c0_i32, %c8_i32 : i32
    %19 = tpu.assume_multiple %18, 8 : i32
    %c7_i32 = arith.constant 7 : i32
    %20 = arith.subi %c7_i32, %c0_i32 : i32
    %c8_i32_23 = arith.constant 8 : i32
    %21 = arith.muli %20, %c8_i32_23 : i32
    %22 = tpu.assume_multiple %21, 8 : i32
    %23 = tpu.concatenate %17, %17 in 1 : vector<8x128xf32>, vector<8x128xf32> -> vector<8x256xf32>
    %cst_24 = arith.constant dense<0.000000e+00> : vector<8x768xf32>
    %24 = tpu.matmul %23, %14, %cst_24 {dimension_numbers = #tpu.dot_dimension_numbers<[1], [0], [0], [1], [0, 0, 1, 1], [], []>} : vector<8x256xf32>, vector<256x768xf32>, vector<8x768xf32> -> vector<8x768xf32>
    %25 = arith.index_cast %19 : i32 to index
    %c0_25 = arith.constant 0 : index
    %26 = vector.load %arg10[%25, %c0_25] : memref<64x384xf32, #tpu.memory_space<vmem>>, vector<8x384xf32>
    %27 = arith.index_cast %22 : i32 to index
    %c0_26 = arith.constant 0 : index
    %28 = vector.load %arg11[%27, %c0_26] : memref<64x384xf32, #tpu.memory_space<vmem>>, vector<8x384xf32>
    %29 = vector.extract_strided_slice %24 {offsets = [0, 0], sizes = [8, 384], strides = [1, 1]} : vector<8x768xf32> to vector<8x384xf32>
    %30 = vector.extract_strided_slice %26 {offsets = [0, 0], sizes = [8, 256], strides = [1, 1]} : vector<8x384xf32> to vector<8x256xf32>
    %31 = vector.extract_strided_slice %29 {offsets = [0, 0], sizes = [8, 256], strides = [1, 1]} : vector<8x384xf32> to vector<8x256xf32>
    %32 = arith.addf %30, %31 : vector<8x256xf32>
    %33 = arith.negf %32 : vector<8x256xf32>
    %34 = math.exp %33 : vector<8x256xf32>
    %cst_27 = arith.constant 1.000000e+00 : f32
    %35 = vector.broadcast %cst_27 : f32 to vector<8x256xf32>
    %36 = arith.addf %35, %34 : vector<8x256xf32>
    %37 = arith.divf %35, %36 : vector<8x256xf32>
    %38 = vector.extract_strided_slice %37 {offsets = [0, 0], sizes = [8, 128], strides = [1, 1]} : vector<8x256xf32> to vector<8x128xf32>
    %39 = vector.extract_strided_slice %37 {offsets = [0, 128], sizes = [8, 128], strides = [1, 1]} : vector<8x256xf32> to vector<8x128xf32>
    %40 = vector.extract_strided_slice %26 {offsets = [0, 256], sizes = [8, 128], strides = [1, 1]} : vector<8x384xf32> to vector<8x128xf32>
    %41 = vector.extract_strided_slice %29 {offsets = [0, 256], sizes = [8, 128], strides = [1, 1]} : vector<8x384xf32> to vector<8x128xf32>
    %42 = vector.broadcast %15 : vector<1x128xf32> to vector<8x128xf32>
    %43 = arith.addf %41, %42 : vector<8x128xf32>
    %44 = arith.mulf %38, %43 : vector<8x128xf32>
    %45 = arith.addf %40, %44 : vector<8x128xf32>
    %46 = math.tanh %45 : vector<8x128xf32>
    %cst_28 = arith.constant 1.000000e+00 : f32
    %47 = vector.broadcast %cst_28 : f32 to vector<8x128xf32>
    %48 = arith.subf %47, %39 : vector<8x128xf32>
    %49 = arith.mulf %48, %46 : vector<8x128xf32>
    %50 = arith.mulf %39, %17 : vector<8x128xf32>
    %51 = arith.addf %49, %50 : vector<8x128xf32>
    %52 = vector.extract_strided_slice %24 {offsets = [0, 384], sizes = [8, 384], strides = [1, 1]} : vector<8x768xf32> to vector<8x384xf32>
    %53 = vector.extract_strided_slice %28 {offsets = [0, 0], sizes = [8, 256], strides = [1, 1]} : vector<8x384xf32> to vector<8x256xf32>
    %54 = vector.extract_strided_slice %52 {offsets = [0, 0], sizes = [8, 256], strides = [1, 1]} : vector<8x384xf32> to vector<8x256xf32>
    %55 = arith.addf %53, %54 : vector<8x256xf32>
    %56 = arith.negf %55 : vector<8x256xf32>
    %57 = math.exp %56 : vector<8x256xf32>
    %cst_29 = arith.constant 1.000000e+00 : f32
    %58 = vector.broadcast %cst_29 : f32 to vector<8x256xf32>
    %59 = arith.addf %58, %57 : vector<8x256xf32>
    %60 = arith.divf %58, %59 : vector<8x256xf32>
    %61 = vector.extract_strided_slice %60 {offsets = [0, 0], sizes = [8, 128], strides = [1, 1]} : vector<8x256xf32> to vector<8x128xf32>
    %62 = vector.extract_strided_slice %60 {offsets = [0, 128], sizes = [8, 128], strides = [1, 1]} : vector<8x256xf32> to vector<8x128xf32>
    %63 = vector.extract_strided_slice %28 {offsets = [0, 256], sizes = [8, 128], strides = [1, 1]} : vector<8x384xf32> to vector<8x128xf32>
    %64 = vector.extract_strided_slice %52 {offsets = [0, 256], sizes = [8, 128], strides = [1, 1]} : vector<8x384xf32> to vector<8x128xf32>
    %65 = vector.broadcast %16 : vector<1x128xf32> to vector<8x128xf32>
    %66 = arith.addf %64, %65 : vector<8x128xf32>
    %67 = arith.mulf %61, %66 : vector<8x128xf32>
    %68 = arith.addf %63, %67 : vector<8x128xf32>
    %69 = math.tanh %68 : vector<8x128xf32>
    %cst_30 = arith.constant 1.000000e+00 : f32
    %70 = vector.broadcast %cst_30 : f32 to vector<8x128xf32>
    %71 = arith.subf %70, %62 : vector<8x128xf32>
    %72 = arith.mulf %71, %69 : vector<8x128xf32>
    %73 = arith.mulf %62, %17 : vector<8x128xf32>
    %74 = arith.addf %72, %73 : vector<8x128xf32>
    %75 = arith.index_cast %19 : i32 to index
    %c0_31 = arith.constant 0 : index
    %76 = vector.load %arg8[%75, %c0_31] : memref<64x128xf32, #tpu.memory_space<vmem>>, vector<8x128xf32>
    tpu.vector_store %arg8[%75, %c0_31], %51 {strides = array<i32>} : memref<64x128xf32, #tpu.memory_space<vmem>>, vector<8x128xf32>,
    %77 = arith.index_cast %22 : i32 to index
    %c0_32 = arith.constant 0 : index
    %78 = vector.load %arg12[%77, %c0_32] : memref<64x128xf32, #tpu.memory_space<vmem>>, vector<8x128xf32>
    tpu.vector_store %arg12[%77, %c0_32], %74 {strides = array<i32>} : memref<64x128xf32, #tpu.memory_space<vmem>>, vector<8x128xf32>,
    %c1_i32 = arith.constant 1 : i32
    %c8_i32_33 = arith.constant 8 : i32
    %79 = arith.muli %c1_i32, %c8_i32_33 : i32
    %80 = tpu.assume_multiple %79, 8 : i32
    %c7_i32_34 = arith.constant 7 : i32
    %81 = arith.subi %c7_i32_34, %c1_i32 : i32
    %c8_i32_35 = arith.constant 8 : i32
    %82 = arith.muli %81, %c8_i32_35 : i32
    %83 = tpu.assume_multiple %82, 8 : i32
    %84 = tpu.concatenate %51, %74 in 1 : vector<8x128xf32>, vector<8x128xf32> -> vector<8x256xf32>
    %cst_36 = arith.constant dense<0.000000e+00> : vector<8x768xf32>
    %85 = tpu.matmul %84, %14, %cst_36 {dimension_numbers = #tpu.dot_dimension_numbers<[1], [0], [0], [1], [0, 0, 1, 1], [], []>} : vector<8x256xf32>, vector<256x768xf32>, vector<8x768xf32> -> vector<8x768xf32>
    %86 = arith.index_cast %80 : i32 to index
    %c0_37 = arith.constant 0 : index
    %87 = vector.load %arg10[%86, %c0_37] : memref<64x384xf32, #tpu.memory_space<vmem>>, vector<8x384xf32>
    %88 = arith.index_cast %83 : i32 to index
    %c0_38 = arith.constant 0 : index
    %89 = vector.load %arg11[%88, %c0_38] : memref<64x384xf32, #tpu.memory_space<vmem>>, vector<8x384xf32>
    %90 = vector.extract_strided_slice %85 {offsets = [0, 0], sizes = [8, 384], strides = [1, 1]} : vector<8x768xf32> to vector<8x384xf32>
    %91 = vector.extract_strided_slice %87 {offsets = [0, 0], sizes = [8, 256], strides = [1, 1]} : vector<8x384xf32> to vector<8x256xf32>
    %92 = vector.extract_strided_slice %90 {offsets = [0, 0], sizes = [8, 256], strides = [1, 1]} : vector<8x384xf32> to vector<8x256xf32>
    %93 = arith.addf %91, %92 : vector<8x256xf32>
    %94 = arith.negf %93 : vector<8x256xf32>
    %95 = math.exp %94 : vector<8x256xf32>
    %cst_39 = arith.constant 1.000000e+00 : f32
    %96 = vector.broadcast %cst_39 : f32 to vector<8x256xf32>
    %97 = arith.addf %96, %95 : vector<8x256xf32>
    %98 = arith.divf %96, %97 : vector<8x256xf32>
    %99 = vector.extract_strided_slice %98 {offsets = [0, 0], sizes = [8, 128], strides = [1, 1]} : vector<8x256xf32> to vector<8x128xf32>
    %100 = vector.extract_strided_slice %98 {offsets = [0, 128], sizes = [8, 128], strides = [1, 1]} : vector<8x256xf32> to vector<8x128xf32>
    %101 = vector.extract_strided_slice %87 {offsets = [0, 256], sizes = [8, 128], strides = [1, 1]} : vector<8x384xf32> to vector<8x128xf32>
    %102 = vector.extract_strided_slice %90 {offsets = [0, 256], sizes = [8, 128], strides = [1, 1]} : vector<8x384xf32> to vector<8x128xf32>
    %103 = vector.broadcast %15 : vector<1x128xf32> to vector<8x128xf32>
    %104 = arith.addf %102, %103 : vector<8x128xf32>
    %105 = arith.mulf %99, %104 : vector<8x128xf32>
    %106 = arith.addf %101, %105 : vector<8x128xf32>
    %107 = math.tanh %106 : vector<8x128xf32>
    %cst_40 = arith.constant 1.000000e+00 : f32
    %108 = vector.broadcast %cst_40 : f32 to vector<8x128xf32>
    %109 = arith.subf %108, %100 : vector<8x128xf32>
    %110 = arith.mulf %109, %107 : vector<8x128xf32>
    %111 = arith.mulf %100, %51 : vector<8x128xf32>
    %112 = arith.addf %110, %111 : vector<8x128xf32>
    %113 = vector.extract_strided_slice %85 {offsets = [0, 384], sizes = [8, 384], strides = [1, 1]} : vector<8x768xf32> to vector<8x384xf32>
    %114 = vector.extract_strided_slice %89 {offsets = [0, 0], sizes = [8, 256], strides = [1, 1]} : vector<8x384xf32> to vector<8x256xf32>
    %115 = vector.extract_strided_slice %113 {offsets = [0, 0], sizes = [8, 256], strides = [1, 1]} : vector<8x384xf32> to vector<8x256xf32>
    %116 = arith.addf %114, %115 : vector<8x256xf32>
    %117 = arith.negf %116 : vector<8x256xf32>
    %118 = math.exp %117 : vector<8x256xf32>
    %cst_41 = arith.constant 1.000000e+00 : f32
    %119 = vector.broadcast %cst_41 : f32 to vector<8x256xf32>
    %120 = arith.addf %119, %118 : vector<8x256xf32>
    %121 = arith.divf %119, %120 : vector<8x256xf32>
    %122 = vector.extract_strided_slice %121 {offsets = [0, 0], sizes = [8, 128], strides = [1, 1]} : vector<8x256xf32> to vector<8x128xf32>
    %123 = vector.extract_strided_slice %121 {offsets = [0, 128], sizes = [8, 128], strides = [1, 1]} : vector<8x256xf32> to vector<8x128xf32>
    %124 = vector.extract_strided_slice %89 {offsets = [0, 256], sizes = [8, 128], strides = [1, 1]} : vector<8x384xf32> to vector<8x128xf32>
    %125 = vector.extract_strided_slice %113 {offsets = [0, 256], sizes = [8, 128], strides = [1, 1]} : vector<8x384xf32> to vector<8x128xf32>
    %126 = vector.broadcast %16 : vector<1x128xf32> to vector<8x128xf32>
    %127 = arith.addf %125, %126 : vector<8x128xf32>
    %128 = arith.mulf %122, %127 : vector<8x128xf32>
    %129 = arith.addf %124, %128 : vector<8x128xf32>
    %130 = math.tanh %129 : vector<8x128xf32>
    %cst_42 = arith.constant 1.000000e+00 : f32
    %131 = vector.broadcast %cst_42 : f32 to vector<8x128xf32>
    %132 = arith.subf %131, %123 : vector<8x128xf32>
    %133 = arith.mulf %132, %130 : vector<8x128xf32>
    %134 = arith.mulf %123, %74 : vector<8x128xf32>
    %135 = arith.addf %133, %134 : vector<8x128xf32>
    %136 = arith.index_cast %80 : i32 to index
    %c0_43 = arith.constant 0 : index
    %137 = vector.load %arg8[%136, %c0_43] : memref<64x128xf32, #tpu.memory_space<vmem>>, vector<8x128xf32>
    tpu.vector_store %arg8[%136, %c0_43], %112 {strides = array<i32>} : memref<64x128xf32, #tpu.memory_space<vmem>>, vector<8x128xf32>,
    %138 = arith.index_cast %83 : i32 to index
    %c0_44 = arith.constant 0 : index
    %139 = vector.load %arg12[%138, %c0_44] : memref<64x128xf32, #tpu.memory_space<vmem>>, vector<8x128xf32>
    tpu.vector_store %arg12[%138, %c0_44], %135 {strides = array<i32>} : memref<64x128xf32, #tpu.memory_space<vmem>>, vector<8x128xf32>,
    %c2_i32 = arith.constant 2 : i32
    %c8_i32_45 = arith.constant 8 : i32
    %140 = arith.muli %c2_i32, %c8_i32_45 : i32
    %141 = tpu.assume_multiple %140, 8 : i32
    %c7_i32_46 = arith.constant 7 : i32
    %142 = arith.subi %c7_i32_46, %c2_i32 : i32
    %c8_i32_47 = arith.constant 8 : i32
    %143 = arith.muli %142, %c8_i32_47 : i32
    %144 = tpu.assume_multiple %143, 8 : i32
    %145 = tpu.concatenate %112, %135 in 1 : vector<8x128xf32>, vector<8x128xf32> -> vector<8x256xf32>
    %cst_48 = arith.constant dense<0.000000e+00> : vector<8x768xf32>
    %146 = tpu.matmul %145, %14, %cst_48 {dimension_numbers = #tpu.dot_dimension_numbers<[1], [0], [0], [1], [0, 0, 1, 1], [], []>} : vector<8x256xf32>, vector<256x768xf32>, vector<8x768xf32> -> vector<8x768xf32>
    %147 = arith.index_cast %141 : i32 to index
    %c0_49 = arith.constant 0 : index
    %148 = vector.load %arg10[%147, %c0_49] : memref<64x384xf32, #tpu.memory_space<vmem>>, vector<8x384xf32>
    %149 = arith.index_cast %144 : i32 to index
    %c0_50 = arith.constant 0 : index
    %150 = vector.load %arg11[%149, %c0_50] : memref<64x384xf32, #tpu.memory_space<vmem>>, vector<8x384xf32>
    %151 = vector.extract_strided_slice %146 {offsets = [0, 0], sizes = [8, 384], strides = [1, 1]} : vector<8x768xf32> to vector<8x384xf32>
    %152 = vector.extract_strided_slice %148 {offsets = [0, 0], sizes = [8, 256], strides = [1, 1]} : vector<8x384xf32> to vector<8x256xf32>
    %153 = vector.extract_strided_slice %151 {offsets = [0, 0], sizes = [8, 256], strides = [1, 1]} : vector<8x384xf32> to vector<8x256xf32>
    %154 = arith.addf %152, %153 : vector<8x256xf32>
    %155 = arith.negf %154 : vector<8x256xf32>
    %156 = math.exp %155 : vector<8x256xf32>
    %cst_51 = arith.constant 1.000000e+00 : f32
    %157 = vector.broadcast %cst_51 : f32 to vector<8x256xf32>
    %158 = arith.addf %157, %156 : vector<8x256xf32>
    %159 = arith.divf %157, %158 : vector<8x256xf32>
    %160 = vector.extract_strided_slice %159 {offsets = [0, 0], sizes = [8, 128], strides = [1, 1]} : vector<8x256xf32> to vector<8x128xf32>
    %161 = vector.extract_strided_slice %159 {offsets = [0, 128], sizes = [8, 128], strides = [1, 1]} : vector<8x256xf32> to vector<8x128xf32>
    %162 = vector.extract_strided_slice %148 {offsets = [0, 256], sizes = [8, 128], strides = [1, 1]} : vector<8x384xf32> to vector<8x128xf32>
    %163 = vector.extract_strided_slice %151 {offsets = [0, 256], sizes = [8, 128], strides = [1, 1]} : vector<8x384xf32> to vector<8x128xf32>
    %164 = vector.broadcast %15 : vector<1x128xf32> to vector<8x128xf32>
    %165 = arith.addf %163, %164 : vector<8x128xf32>
    %166 = arith.mulf %160, %165 : vector<8x128xf32>
    %167 = arith.addf %162, %166 : vector<8x128xf32>
    %168 = math.tanh %167 : vector<8x128xf32>
    %cst_52 = arith.constant 1.000000e+00 : f32
    %169 = vector.broadcast %cst_52 : f32 to vector<8x128xf32>
    %170 = arith.subf %169, %161 : vector<8x128xf32>
    %171 = arith.mulf %170, %168 : vector<8x128xf32>
    %172 = arith.mulf %161, %112 : vector<8x128xf32>
    %173 = arith.addf %171, %172 : vector<8x128xf32>
    %174 = vector.extract_strided_slice %146 {offsets = [0, 384], sizes = [8, 384], strides = [1, 1]} : vector<8x768xf32> to vector<8x384xf32>
    %175 = vector.extract_strided_slice %150 {offsets = [0, 0], sizes = [8, 256], strides = [1, 1]} : vector<8x384xf32> to vector<8x256xf32>
    %176 = vector.extract_strided_slice %174 {offsets = [0, 0], sizes = [8, 256], strides = [1, 1]} : vector<8x384xf32> to vector<8x256xf32>
    %177 = arith.addf %175, %176 : vector<8x256xf32>
    %178 = arith.negf %177 : vector<8x256xf32>
    %179 = math.exp %178 : vector<8x256xf32>
    %cst_53 = arith.constant 1.000000e+00 : f32
    %180 = vector.broadcast %cst_53 : f32 to vector<8x256xf32>
    %181 = arith.addf %180, %179 : vector<8x256xf32>
    %182 = arith.divf %180, %181 : vector<8x256xf32>
    %183 = vector.extract_strided_slice %182 {offsets = [0, 0], sizes = [8, 128], strides = [1, 1]} : vector<8x256xf32> to vector<8x128xf32>
    %184 = vector.extract_strided_slice %182 {offsets = [0, 128], sizes = [8, 128], strides = [1, 1]} : vector<8x256xf32> to vector<8x128xf32>
    %185 = vector.extract_strided_slice %150 {offsets = [0, 256], sizes = [8, 128], strides = [1, 1]} : vector<8x384xf32> to vector<8x128xf32>
    %186 = vector.extract_strided_slice %174 {offsets = [0, 256], sizes = [8, 128], strides = [1, 1]} : vector<8x384xf32> to vector<8x128xf32>
    %187 = vector.broadcast %16 : vector<1x128xf32> to vector<8x128xf32>
    %188 = arith.addf %186, %187 : vector<8x128xf32>
    %189 = arith.mulf %183, %188 : vector<8x128xf32>
    %190 = arith.addf %185, %189 : vector<8x128xf32>
    %191 = math.tanh %190 : vector<8x128xf32>
    %cst_54 = arith.constant 1.000000e+00 : f32
    %192 = vector.broadcast %cst_54 : f32 to vector<8x128xf32>
    %193 = arith.subf %192, %184 : vector<8x128xf32>
    %194 = arith.mulf %193, %191 : vector<8x128xf32>
    %195 = arith.mulf %184, %135 : vector<8x128xf32>
    %196 = arith.addf %194, %195 : vector<8x128xf32>
    %197 = arith.index_cast %141 : i32 to index
    %c0_55 = arith.constant 0 : index
    %198 = vector.load %arg8[%197, %c0_55] : memref<64x128xf32, #tpu.memory_space<vmem>>, vector<8x128xf32>
    tpu.vector_store %arg8[%197, %c0_55], %173 {strides = array<i32>} : memref<64x128xf32, #tpu.memory_space<vmem>>, vector<8x128xf32>,
    %199 = arith.index_cast %144 : i32 to index
    %c0_56 = arith.constant 0 : index
    %200 = vector.load %arg12[%199, %c0_56] : memref<64x128xf32, #tpu.memory_space<vmem>>, vector<8x128xf32>
    tpu.vector_store %arg12[%199, %c0_56], %196 {strides = array<i32>} : memref<64x128xf32, #tpu.memory_space<vmem>>, vector<8x128xf32>,
    %c3_i32 = arith.constant 3 : i32
    %c8_i32_57 = arith.constant 8 : i32
    %201 = arith.muli %c3_i32, %c8_i32_57 : i32
    %202 = tpu.assume_multiple %201, 8 : i32
    %c7_i32_58 = arith.constant 7 : i32
    %203 = arith.subi %c7_i32_58, %c3_i32 : i32
    %c8_i32_59 = arith.constant 8 : i32
    %204 = arith.muli %203, %c8_i32_59 : i32
    %205 = tpu.assume_multiple %204, 8 : i32
    %206 = tpu.concatenate %173, %196 in 1 : vector<8x128xf32>, vector<8x128xf32> -> vector<8x256xf32>
    %cst_60 = arith.constant dense<0.000000e+00> : vector<8x768xf32>
    %207 = tpu.matmul %206, %14, %cst_60 {dimension_numbers = #tpu.dot_dimension_numbers<[1], [0], [0], [1], [0, 0, 1, 1], [], []>} : vector<8x256xf32>, vector<256x768xf32>, vector<8x768xf32> -> vector<8x768xf32>
    %208 = arith.index_cast %202 : i32 to index
    %c0_61 = arith.constant 0 : index
    %209 = vector.load %arg10[%208, %c0_61] : memref<64x384xf32, #tpu.memory_space<vmem>>, vector<8x384xf32>
    %210 = arith.index_cast %205 : i32 to index
    %c0_62 = arith.constant 0 : index
    %211 = vector.load %arg11[%210, %c0_62] : memref<64x384xf32, #tpu.memory_space<vmem>>, vector<8x384xf32>
    %212 = vector.extract_strided_slice %207 {offsets = [0, 0], sizes = [8, 384], strides = [1, 1]} : vector<8x768xf32> to vector<8x384xf32>
    %213 = vector.extract_strided_slice %209 {offsets = [0, 0], sizes = [8, 256], strides = [1, 1]} : vector<8x384xf32> to vector<8x256xf32>
    %214 = vector.extract_strided_slice %212 {offsets = [0, 0], sizes = [8, 256], strides = [1, 1]} : vector<8x384xf32> to vector<8x256xf32>
    %215 = arith.addf %213, %214 : vector<8x256xf32>
    %216 = arith.negf %215 : vector<8x256xf32>
    %217 = math.exp %216 : vector<8x256xf32>
    %cst_63 = arith.constant 1.000000e+00 : f32
    %218 = vector.broadcast %cst_63 : f32 to vector<8x256xf32>
    %219 = arith.addf %218, %217 : vector<8x256xf32>
    %220 = arith.divf %218, %219 : vector<8x256xf32>
    %221 = vector.extract_strided_slice %220 {offsets = [0, 0], sizes = [8, 128], strides = [1, 1]} : vector<8x256xf32> to vector<8x128xf32>
    %222 = vector.extract_strided_slice %220 {offsets = [0, 128], sizes = [8, 128], strides = [1, 1]} : vector<8x256xf32> to vector<8x128xf32>
    %223 = vector.extract_strided_slice %209 {offsets = [0, 256], sizes = [8, 128], strides = [1, 1]} : vector<8x384xf32> to vector<8x128xf32>
    %224 = vector.extract_strided_slice %212 {offsets = [0, 256], sizes = [8, 128], strides = [1, 1]} : vector<8x384xf32> to vector<8x128xf32>
    %225 = vector.broadcast %15 : vector<1x128xf32> to vector<8x128xf32>
    %226 = arith.addf %224, %225 : vector<8x128xf32>
    %227 = arith.mulf %221, %226 : vector<8x128xf32>
    %228 = arith.addf %223, %227 : vector<8x128xf32>
    %229 = math.tanh %228 : vector<8x128xf32>
    %cst_64 = arith.constant 1.000000e+00 : f32
    %230 = vector.broadcast %cst_64 : f32 to vector<8x128xf32>
    %231 = arith.subf %230, %222 : vector<8x128xf32>
    %232 = arith.mulf %231, %229 : vector<8x128xf32>
    %233 = arith.mulf %222, %173 : vector<8x128xf32>
    %234 = arith.addf %232, %233 : vector<8x128xf32>
    %235 = vector.extract_strided_slice %207 {offsets = [0, 384], sizes = [8, 384], strides = [1, 1]} : vector<8x768xf32> to vector<8x384xf32>
    %236 = vector.extract_strided_slice %211 {offsets = [0, 0], sizes = [8, 256], strides = [1, 1]} : vector<8x384xf32> to vector<8x256xf32>
    %237 = vector.extract_strided_slice %235 {offsets = [0, 0], sizes = [8, 256], strides = [1, 1]} : vector<8x384xf32> to vector<8x256xf32>
    %238 = arith.addf %236, %237 : vector<8x256xf32>
    %239 = arith.negf %238 : vector<8x256xf32>
    %240 = math.exp %239 : vector<8x256xf32>
    %cst_65 = arith.constant 1.000000e+00 : f32
    %241 = vector.broadcast %cst_65 : f32 to vector<8x256xf32>
    %242 = arith.addf %241, %240 : vector<8x256xf32>
    %243 = arith.divf %241, %242 : vector<8x256xf32>
    %244 = vector.extract_strided_slice %243 {offsets = [0, 0], sizes = [8, 128], strides = [1, 1]} : vector<8x256xf32> to vector<8x128xf32>
    %245 = vector.extract_strided_slice %243 {offsets = [0, 128], sizes = [8, 128], strides = [1, 1]} : vector<8x256xf32> to vector<8x128xf32>
    %246 = vector.extract_strided_slice %211 {offsets = [0, 256], sizes = [8, 128], strides = [1, 1]} : vector<8x384xf32> to vector<8x128xf32>
    %247 = vector.extract_strided_slice %235 {offsets = [0, 256], sizes = [8, 128], strides = [1, 1]} : vector<8x384xf32> to vector<8x128xf32>
    %248 = vector.broadcast %16 : vector<1x128xf32> to vector<8x128xf32>
    %249 = arith.addf %247, %248 : vector<8x128xf32>
    %250 = arith.mulf %244, %249 : vector<8x128xf32>
    %251 = arith.addf %246, %250 : vector<8x128xf32>
    %252 = math.tanh %251 : vector<8x128xf32>
    %cst_66 = arith.constant 1.000000e+00 : f32
    %253 = vector.broadcast %cst_66 : f32 to vector<8x128xf32>
    %254 = arith.subf %253, %245 : vector<8x128xf32>
    %255 = arith.mulf %254, %252 : vector<8x128xf32>
    %256 = arith.mulf %245, %196 : vector<8x128xf32>
    %257 = arith.addf %255, %256 : vector<8x128xf32>
    %258 = arith.index_cast %202 : i32 to index
    %c0_67 = arith.constant 0 : index
    %259 = vector.load %arg8[%258, %c0_67] : memref<64x128xf32, #tpu.memory_space<vmem>>, vector<8x128xf32>
    tpu.vector_store %arg8[%258, %c0_67], %234 {strides = array<i32>} : memref<64x128xf32, #tpu.memory_space<vmem>>, vector<8x128xf32>,
    %260 = arith.index_cast %205 : i32 to index
    %c0_68 = arith.constant 0 : index
    %261 = vector.load %arg12[%260, %c0_68] : memref<64x128xf32, #tpu.memory_space<vmem>>, vector<8x128xf32>
    tpu.vector_store %arg12[%260, %c0_68], %257 {strides = array<i32>} : memref<64x128xf32, #tpu.memory_space<vmem>>, vector<8x128xf32>,
    %c4_i32 = arith.constant 4 : i32
    %c8_i32_69 = arith.constant 8 : i32
    %262 = arith.muli %c4_i32, %c8_i32_69 : i32
    %263 = tpu.assume_multiple %262, 8 : i32
    %c7_i32_70 = arith.constant 7 : i32
    %264 = arith.subi %c7_i32_70, %c4_i32 : i32
    %c8_i32_71 = arith.constant 8 : i32
    %265 = arith.muli %264, %c8_i32_71 : i32
    %266 = tpu.assume_multiple %265, 8 : i32
    %267 = tpu.concatenate %234, %257 in 1 : vector<8x128xf32>, vector<8x128xf32> -> vector<8x256xf32>
    %cst_72 = arith.constant dense<0.000000e+00> : vector<8x768xf32>
    %268 = tpu.matmul %267, %14, %cst_72 {dimension_numbers = #tpu.dot_dimension_numbers<[1], [0], [0], [1], [0, 0, 1, 1], [], []>} : vector<8x256xf32>, vector<256x768xf32>, vector<8x768xf32> -> vector<8x768xf32>
    %269 = arith.index_cast %263 : i32 to index
    %c0_73 = arith.constant 0 : index
    %270 = vector.load %arg10[%269, %c0_73] : memref<64x384xf32, #tpu.memory_space<vmem>>, vector<8x384xf32>
    %271 = arith.index_cast %266 : i32 to index
    %c0_74 = arith.constant 0 : index
    %272 = vector.load %arg11[%271, %c0_74] : memref<64x384xf32, #tpu.memory_space<vmem>>, vector<8x384xf32>
    %273 = vector.extract_strided_slice %268 {offsets = [0, 0], sizes = [8, 384], strides = [1, 1]} : vector<8x768xf32> to vector<8x384xf32>
    %274 = vector.extract_strided_slice %270 {offsets = [0, 0], sizes = [8, 256], strides = [1, 1]} : vector<8x384xf32> to vector<8x256xf32>
    %275 = vector.extract_strided_slice %273 {offsets = [0, 0], sizes = [8, 256], strides = [1, 1]} : vector<8x384xf32> to vector<8x256xf32>
    %276 = arith.addf %274, %275 : vector<8x256xf32>
    %277 = arith.negf %276 : vector<8x256xf32>
    %278 = math.exp %277 : vector<8x256xf32>
    %cst_75 = arith.constant 1.000000e+00 : f32
    %279 = vector.broadcast %cst_75 : f32 to vector<8x256xf32>
    %280 = arith.addf %279, %278 : vector<8x256xf32>
    %281 = arith.divf %279, %280 : vector<8x256xf32>
    %282 = vector.extract_strided_slice %281 {offsets = [0, 0], sizes = [8, 128], strides = [1, 1]} : vector<8x256xf32> to vector<8x128xf32>
    %283 = vector.extract_strided_slice %281 {offsets = [0, 128], sizes = [8, 128], strides = [1, 1]} : vector<8x256xf32> to vector<8x128xf32>
    %284 = vector.extract_strided_slice %270 {offsets = [0, 256], sizes = [8, 128], strides = [1, 1]} : vector<8x384xf32> to vector<8x128xf32>
    %285 = vector.extract_strided_slice %273 {offsets = [0, 256], sizes = [8, 128], strides = [1, 1]} : vector<8x384xf32> to vector<8x128xf32>
    %286 = vector.broadcast %15 : vector<1x128xf32> to vector<8x128xf32>
    %287 = arith.addf %285, %286 : vector<8x128xf32>
    %288 = arith.mulf %282, %287 : vector<8x128xf32>
    %289 = arith.addf %284, %288 : vector<8x128xf32>
    %290 = math.tanh %289 : vector<8x128xf32>
    %cst_76 = arith.constant 1.000000e+00 : f32
    %291 = vector.broadcast %cst_76 : f32 to vector<8x128xf32>
    %292 = arith.subf %291, %283 : vector<8x128xf32>
    %293 = arith.mulf %292, %290 : vector<8x128xf32>
    %294 = arith.mulf %283, %234 : vector<8x128xf32>
    %295 = arith.addf %293, %294 : vector<8x128xf32>
    %296 = vector.extract_strided_slice %268 {offsets = [0, 384], sizes = [8, 384], strides = [1, 1]} : vector<8x768xf32> to vector<8x384xf32>
    %297 = vector.extract_strided_slice %272 {offsets = [0, 0], sizes = [8, 256], strides = [1, 1]} : vector<8x384xf32> to vector<8x256xf32>
    %298 = vector.extract_strided_slice %296 {offsets = [0, 0], sizes = [8, 256], strides = [1, 1]} : vector<8x384xf32> to vector<8x256xf32>
    %299 = arith.addf %297, %298 : vector<8x256xf32>
    %300 = arith.negf %299 : vector<8x256xf32>
    %301 = math.exp %300 : vector<8x256xf32>
    %cst_77 = arith.constant 1.000000e+00 : f32
    %302 = vector.broadcast %cst_77 : f32 to vector<8x256xf32>
    %303 = arith.addf %302, %301 : vector<8x256xf32>
    %304 = arith.divf %302, %303 : vector<8x256xf32>
    %305 = vector.extract_strided_slice %304 {offsets = [0, 0], sizes = [8, 128], strides = [1, 1]} : vector<8x256xf32> to vector<8x128xf32>
    %306 = vector.extract_strided_slice %304 {offsets = [0, 128], sizes = [8, 128], strides = [1, 1]} : vector<8x256xf32> to vector<8x128xf32>
    %307 = vector.extract_strided_slice %272 {offsets = [0, 256], sizes = [8, 128], strides = [1, 1]} : vector<8x384xf32> to vector<8x128xf32>
    %308 = vector.extract_strided_slice %296 {offsets = [0, 256], sizes = [8, 128], strides = [1, 1]} : vector<8x384xf32> to vector<8x128xf32>
    %309 = vector.broadcast %16 : vector<1x128xf32> to vector<8x128xf32>
    %310 = arith.addf %308, %309 : vector<8x128xf32>
    %311 = arith.mulf %305, %310 : vector<8x128xf32>
    %312 = arith.addf %307, %311 : vector<8x128xf32>
    %313 = math.tanh %312 : vector<8x128xf32>
    %cst_78 = arith.constant 1.000000e+00 : f32
    %314 = vector.broadcast %cst_78 : f32 to vector<8x128xf32>
    %315 = arith.subf %314, %306 : vector<8x128xf32>
    %316 = arith.mulf %315, %313 : vector<8x128xf32>
    %317 = arith.mulf %306, %257 : vector<8x128xf32>
    %318 = arith.addf %316, %317 : vector<8x128xf32>
    %319 = arith.index_cast %263 : i32 to index
    %c0_79 = arith.constant 0 : index
    %320 = vector.load %arg8[%319, %c0_79] : memref<64x128xf32, #tpu.memory_space<vmem>>, vector<8x128xf32>
    tpu.vector_store %arg8[%319, %c0_79], %295 {strides = array<i32>} : memref<64x128xf32, #tpu.memory_space<vmem>>, vector<8x128xf32>,
    %321 = arith.index_cast %266 : i32 to index
    %c0_80 = arith.constant 0 : index
    %322 = vector.load %arg12[%321, %c0_80] : memref<64x128xf32, #tpu.memory_space<vmem>>, vector<8x128xf32>
    tpu.vector_store %arg12[%321, %c0_80], %318 {strides = array<i32>} : memref<64x128xf32, #tpu.memory_space<vmem>>, vector<8x128xf32>,
    %c5_i32 = arith.constant 5 : i32
    %c8_i32_81 = arith.constant 8 : i32
    %323 = arith.muli %c5_i32, %c8_i32_81 : i32
    %324 = tpu.assume_multiple %323, 8 : i32
    %c7_i32_82 = arith.constant 7 : i32
    %325 = arith.subi %c7_i32_82, %c5_i32 : i32
    %c8_i32_83 = arith.constant 8 : i32
    %326 = arith.muli %325, %c8_i32_83 : i32
    %327 = tpu.assume_multiple %326, 8 : i32
    %328 = tpu.concatenate %295, %318 in 1 : vector<8x128xf32>, vector<8x128xf32> -> vector<8x256xf32>
    %cst_84 = arith.constant dense<0.000000e+00> : vector<8x768xf32>
    %329 = tpu.matmul %328, %14, %cst_84 {dimension_numbers = #tpu.dot_dimension_numbers<[1], [0], [0], [1], [0, 0, 1, 1], [], []>} : vector<8x256xf32>, vector<256x768xf32>, vector<8x768xf32> -> vector<8x768xf32>
    %330 = arith.index_cast %324 : i32 to index
    %c0_85 = arith.constant 0 : index
    %331 = vector.load %arg10[%330, %c0_85] : memref<64x384xf32, #tpu.memory_space<vmem>>, vector<8x384xf32>
    %332 = arith.index_cast %327 : i32 to index
    %c0_86 = arith.constant 0 : index
    %333 = vector.load %arg11[%332, %c0_86] : memref<64x384xf32, #tpu.memory_space<vmem>>, vector<8x384xf32>
    %334 = vector.extract_strided_slice %329 {offsets = [0, 0], sizes = [8, 384], strides = [1, 1]} : vector<8x768xf32> to vector<8x384xf32>
    %335 = vector.extract_strided_slice %331 {offsets = [0, 0], sizes = [8, 256], strides = [1, 1]} : vector<8x384xf32> to vector<8x256xf32>
    %336 = vector.extract_strided_slice %334 {offsets = [0, 0], sizes = [8, 256], strides = [1, 1]} : vector<8x384xf32> to vector<8x256xf32>
    %337 = arith.addf %335, %336 : vector<8x256xf32>
    %338 = arith.negf %337 : vector<8x256xf32>
    %339 = math.exp %338 : vector<8x256xf32>
    %cst_87 = arith.constant 1.000000e+00 : f32
    %340 = vector.broadcast %cst_87 : f32 to vector<8x256xf32>
    %341 = arith.addf %340, %339 : vector<8x256xf32>
    %342 = arith.divf %340, %341 : vector<8x256xf32>
    %343 = vector.extract_strided_slice %342 {offsets = [0, 0], sizes = [8, 128], strides = [1, 1]} : vector<8x256xf32> to vector<8x128xf32>
    %344 = vector.extract_strided_slice %342 {offsets = [0, 128], sizes = [8, 128], strides = [1, 1]} : vector<8x256xf32> to vector<8x128xf32>
    %345 = vector.extract_strided_slice %331 {offsets = [0, 256], sizes = [8, 128], strides = [1, 1]} : vector<8x384xf32> to vector<8x128xf32>
    %346 = vector.extract_strided_slice %334 {offsets = [0, 256], sizes = [8, 128], strides = [1, 1]} : vector<8x384xf32> to vector<8x128xf32>
    %347 = vector.broadcast %15 : vector<1x128xf32> to vector<8x128xf32>
    %348 = arith.addf %346, %347 : vector<8x128xf32>
    %349 = arith.mulf %343, %348 : vector<8x128xf32>
    %350 = arith.addf %345, %349 : vector<8x128xf32>
    %351 = math.tanh %350 : vector<8x128xf32>
    %cst_88 = arith.constant 1.000000e+00 : f32
    %352 = vector.broadcast %cst_88 : f32 to vector<8x128xf32>
    %353 = arith.subf %352, %344 : vector<8x128xf32>
    %354 = arith.mulf %353, %351 : vector<8x128xf32>
    %355 = arith.mulf %344, %295 : vector<8x128xf32>
    %356 = arith.addf %354, %355 : vector<8x128xf32>
    %357 = vector.extract_strided_slice %329 {offsets = [0, 384], sizes = [8, 384], strides = [1, 1]} : vector<8x768xf32> to vector<8x384xf32>
    %358 = vector.extract_strided_slice %333 {offsets = [0, 0], sizes = [8, 256], strides = [1, 1]} : vector<8x384xf32> to vector<8x256xf32>
    %359 = vector.extract_strided_slice %357 {offsets = [0, 0], sizes = [8, 256], strides = [1, 1]} : vector<8x384xf32> to vector<8x256xf32>
    %360 = arith.addf %358, %359 : vector<8x256xf32>
    %361 = arith.negf %360 : vector<8x256xf32>
    %362 = math.exp %361 : vector<8x256xf32>
    %cst_89 = arith.constant 1.000000e+00 : f32
    %363 = vector.broadcast %cst_89 : f32 to vector<8x256xf32>
    %364 = arith.addf %363, %362 : vector<8x256xf32>
    %365 = arith.divf %363, %364 : vector<8x256xf32>
    %366 = vector.extract_strided_slice %365 {offsets = [0, 0], sizes = [8, 128], strides = [1, 1]} : vector<8x256xf32> to vector<8x128xf32>
    %367 = vector.extract_strided_slice %365 {offsets = [0, 128], sizes = [8, 128], strides = [1, 1]} : vector<8x256xf32> to vector<8x128xf32>
    %368 = vector.extract_strided_slice %333 {offsets = [0, 256], sizes = [8, 128], strides = [1, 1]} : vector<8x384xf32> to vector<8x128xf32>
    %369 = vector.extract_strided_slice %357 {offsets = [0, 256], sizes = [8, 128], strides = [1, 1]} : vector<8x384xf32> to vector<8x128xf32>
    %370 = vector.broadcast %16 : vector<1x128xf32> to vector<8x128xf32>
    %371 = arith.addf %369, %370 : vector<8x128xf32>
    %372 = arith.mulf %366, %371 : vector<8x128xf32>
    %373 = arith.addf %368, %372 : vector<8x128xf32>
    %374 = math.tanh %373 : vector<8x128xf32>
    %cst_90 = arith.constant 1.000000e+00 : f32
    %375 = vector.broadcast %cst_90 : f32 to vector<8x128xf32>
    %376 = arith.subf %375, %367 : vector<8x128xf32>
    %377 = arith.mulf %376, %374 : vector<8x128xf32>
    %378 = arith.mulf %367, %318 : vector<8x128xf32>
    %379 = arith.addf %377, %378 : vector<8x128xf32>
    %380 = arith.index_cast %324 : i32 to index
    %c0_91 = arith.constant 0 : index
    %381 = vector.load %arg8[%380, %c0_91] : memref<64x128xf32, #tpu.memory_space<vmem>>, vector<8x128xf32>
    tpu.vector_store %arg8[%380, %c0_91], %356 {strides = array<i32>} : memref<64x128xf32, #tpu.memory_space<vmem>>, vector<8x128xf32>,
    %382 = arith.index_cast %327 : i32 to index
    %c0_92 = arith.constant 0 : index
    %383 = vector.load %arg12[%382, %c0_92] : memref<64x128xf32, #tpu.memory_space<vmem>>, vector<8x128xf32>
    tpu.vector_store %arg12[%382, %c0_92], %379 {strides = array<i32>} : memref<64x128xf32, #tpu.memory_space<vmem>>, vector<8x128xf32>,
    %c6_i32 = arith.constant 6 : i32
    %c8_i32_93 = arith.constant 8 : i32
    %384 = arith.muli %c6_i32, %c8_i32_93 : i32
    %385 = tpu.assume_multiple %384, 8 : i32
    %c7_i32_94 = arith.constant 7 : i32
    %386 = arith.subi %c7_i32_94, %c6_i32 : i32
    %c8_i32_95 = arith.constant 8 : i32
    %387 = arith.muli %386, %c8_i32_95 : i32
    %388 = tpu.assume_multiple %387, 8 : i32
    %389 = tpu.concatenate %356, %379 in 1 : vector<8x128xf32>, vector<8x128xf32> -> vector<8x256xf32>
    %cst_96 = arith.constant dense<0.000000e+00> : vector<8x768xf32>
    %390 = tpu.matmul %389, %14, %cst_96 {dimension_numbers = #tpu.dot_dimension_numbers<[1], [0], [0], [1], [0, 0, 1, 1], [], []>} : vector<8x256xf32>, vector<256x768xf32>, vector<8x768xf32> -> vector<8x768xf32>
    %391 = arith.index_cast %385 : i32 to index
    %c0_97 = arith.constant 0 : index
    %392 = vector.load %arg10[%391, %c0_97] : memref<64x384xf32, #tpu.memory_space<vmem>>, vector<8x384xf32>
    %393 = arith.index_cast %388 : i32 to index
    %c0_98 = arith.constant 0 : index
    %394 = vector.load %arg11[%393, %c0_98] : memref<64x384xf32, #tpu.memory_space<vmem>>, vector<8x384xf32>
    %395 = vector.extract_strided_slice %390 {offsets = [0, 0], sizes = [8, 384], strides = [1, 1]} : vector<8x768xf32> to vector<8x384xf32>
    %396 = vector.extract_strided_slice %392 {offsets = [0, 0], sizes = [8, 256], strides = [1, 1]} : vector<8x384xf32> to vector<8x256xf32>
    %397 = vector.extract_strided_slice %395 {offsets = [0, 0], sizes = [8, 256], strides = [1, 1]} : vector<8x384xf32> to vector<8x256xf32>
    %398 = arith.addf %396, %397 : vector<8x256xf32>
    %399 = arith.negf %398 : vector<8x256xf32>
    %400 = math.exp %399 : vector<8x256xf32>
    %cst_99 = arith.constant 1.000000e+00 : f32
    %401 = vector.broadcast %cst_99 : f32 to vector<8x256xf32>
    %402 = arith.addf %401, %400 : vector<8x256xf32>
    %403 = arith.divf %401, %402 : vector<8x256xf32>
    %404 = vector.extract_strided_slice %403 {offsets = [0, 0], sizes = [8, 128], strides = [1, 1]} : vector<8x256xf32> to vector<8x128xf32>
    %405 = vector.extract_strided_slice %403 {offsets = [0, 128], sizes = [8, 128], strides = [1, 1]} : vector<8x256xf32> to vector<8x128xf32>
    %406 = vector.extract_strided_slice %392 {offsets = [0, 256], sizes = [8, 128], strides = [1, 1]} : vector<8x384xf32> to vector<8x128xf32>
    %407 = vector.extract_strided_slice %395 {offsets = [0, 256], sizes = [8, 128], strides = [1, 1]} : vector<8x384xf32> to vector<8x128xf32>
    %408 = vector.broadcast %15 : vector<1x128xf32> to vector<8x128xf32>
    %409 = arith.addf %407, %408 : vector<8x128xf32>
    %410 = arith.mulf %404, %409 : vector<8x128xf32>
    %411 = arith.addf %406, %410 : vector<8x128xf32>
    %412 = math.tanh %411 : vector<8x128xf32>
    %cst_100 = arith.constant 1.000000e+00 : f32
    %413 = vector.broadcast %cst_100 : f32 to vector<8x128xf32>
    %414 = arith.subf %413, %405 : vector<8x128xf32>
    %415 = arith.mulf %414, %412 : vector<8x128xf32>
    %416 = arith.mulf %405, %356 : vector<8x128xf32>
    %417 = arith.addf %415, %416 : vector<8x128xf32>
    %418 = vector.extract_strided_slice %390 {offsets = [0, 384], sizes = [8, 384], strides = [1, 1]} : vector<8x768xf32> to vector<8x384xf32>
    %419 = vector.extract_strided_slice %394 {offsets = [0, 0], sizes = [8, 256], strides = [1, 1]} : vector<8x384xf32> to vector<8x256xf32>
    %420 = vector.extract_strided_slice %418 {offsets = [0, 0], sizes = [8, 256], strides = [1, 1]} : vector<8x384xf32> to vector<8x256xf32>
    %421 = arith.addf %419, %420 : vector<8x256xf32>
    %422 = arith.negf %421 : vector<8x256xf32>
    %423 = math.exp %422 : vector<8x256xf32>
    %cst_101 = arith.constant 1.000000e+00 : f32
    %424 = vector.broadcast %cst_101 : f32 to vector<8x256xf32>
    %425 = arith.addf %424, %423 : vector<8x256xf32>
    %426 = arith.divf %424, %425 : vector<8x256xf32>
    %427 = vector.extract_strided_slice %426 {offsets = [0, 0], sizes = [8, 128], strides = [1, 1]} : vector<8x256xf32> to vector<8x128xf32>
    %428 = vector.extract_strided_slice %426 {offsets = [0, 128], sizes = [8, 128], strides = [1, 1]} : vector<8x256xf32> to vector<8x128xf32>
    %429 = vector.extract_strided_slice %394 {offsets = [0, 256], sizes = [8, 128], strides = [1, 1]} : vector<8x384xf32> to vector<8x128xf32>
    %430 = vector.extract_strided_slice %418 {offsets = [0, 256], sizes = [8, 128], strides = [1, 1]} : vector<8x384xf32> to vector<8x128xf32>
    %431 = vector.broadcast %16 : vector<1x128xf32> to vector<8x128xf32>
    %432 = arith.addf %430, %431 : vector<8x128xf32>
    %433 = arith.mulf %427, %432 : vector<8x128xf32>
    %434 = arith.addf %429, %433 : vector<8x128xf32>
    %435 = math.tanh %434 : vector<8x128xf32>
    %cst_102 = arith.constant 1.000000e+00 : f32
    %436 = vector.broadcast %cst_102 : f32 to vector<8x128xf32>
    %437 = arith.subf %436, %428 : vector<8x128xf32>
    %438 = arith.mulf %437, %435 : vector<8x128xf32>
    %439 = arith.mulf %428, %379 : vector<8x128xf32>
    %440 = arith.addf %438, %439 : vector<8x128xf32>
    %441 = arith.index_cast %385 : i32 to index
    %c0_103 = arith.constant 0 : index
    %442 = vector.load %arg8[%441, %c0_103] : memref<64x128xf32, #tpu.memory_space<vmem>>, vector<8x128xf32>
    tpu.vector_store %arg8[%441, %c0_103], %417 {strides = array<i32>} : memref<64x128xf32, #tpu.memory_space<vmem>>, vector<8x128xf32>,
    %443 = arith.index_cast %388 : i32 to index
    %c0_104 = arith.constant 0 : index
    %444 = vector.load %arg12[%443, %c0_104] : memref<64x128xf32, #tpu.memory_space<vmem>>, vector<8x128xf32>
    tpu.vector_store %arg12[%443, %c0_104], %440 {strides = array<i32>} : memref<64x128xf32, #tpu.memory_space<vmem>>, vector<8x128xf32>,
    %c7_i32_105 = arith.constant 7 : i32
    %c8_i32_106 = arith.constant 8 : i32
    %445 = arith.muli %c7_i32_105, %c8_i32_106 : i32
    %446 = tpu.assume_multiple %445, 8 : i32
    %c7_i32_107 = arith.constant 7 : i32
    %447 = arith.subi %c7_i32_107, %c7_i32_105 : i32
    %c8_i32_108 = arith.constant 8 : i32
    %448 = arith.muli %447, %c8_i32_108 : i32
    %449 = tpu.assume_multiple %448, 8 : i32
    %450 = tpu.concatenate %417, %440 in 1 : vector<8x128xf32>, vector<8x128xf32> -> vector<8x256xf32>
    %cst_109 = arith.constant dense<0.000000e+00> : vector<8x768xf32>
    %451 = tpu.matmul %450, %14, %cst_109 {dimension_numbers = #tpu.dot_dimension_numbers<[1], [0], [0], [1], [0, 0, 1, 1], [], []>} : vector<8x256xf32>, vector<256x768xf32>, vector<8x768xf32> -> vector<8x768xf32>
    %452 = arith.index_cast %446 : i32 to index
    %c0_110 = arith.constant 0 : index
    %453 = vector.load %arg10[%452, %c0_110] : memref<64x384xf32, #tpu.memory_space<vmem>>, vector<8x384xf32>
    %454 = arith.index_cast %449 : i32 to index
    %c0_111 = arith.constant 0 : index
    %455 = vector.load %arg11[%454, %c0_111] : memref<64x384xf32, #tpu.memory_space<vmem>>, vector<8x384xf32>
    %456 = vector.extract_strided_slice %451 {offsets = [0, 0], sizes = [8, 384], strides = [1, 1]} : vector<8x768xf32> to vector<8x384xf32>
    %457 = vector.extract_strided_slice %453 {offsets = [0, 0], sizes = [8, 256], strides = [1, 1]} : vector<8x384xf32> to vector<8x256xf32>
    %458 = vector.extract_strided_slice %456 {offsets = [0, 0], sizes = [8, 256], strides = [1, 1]} : vector<8x384xf32> to vector<8x256xf32>
    %459 = arith.addf %457, %458 : vector<8x256xf32>
    %460 = arith.negf %459 : vector<8x256xf32>
    %461 = math.exp %460 : vector<8x256xf32>
    %cst_112 = arith.constant 1.000000e+00 : f32
    %462 = vector.broadcast %cst_112 : f32 to vector<8x256xf32>
    %463 = arith.addf %462, %461 : vector<8x256xf32>
    %464 = arith.divf %462, %463 : vector<8x256xf32>
    %465 = vector.extract_strided_slice %464 {offsets = [0, 0], sizes = [8, 128], strides = [1, 1]} : vector<8x256xf32> to vector<8x128xf32>
    %466 = vector.extract_strided_slice %464 {offsets = [0, 128], sizes = [8, 128], strides = [1, 1]} : vector<8x256xf32> to vector<8x128xf32>
    %467 = vector.extract_strided_slice %453 {offsets = [0, 256], sizes = [8, 128], strides = [1, 1]} : vector<8x384xf32> to vector<8x128xf32>
    %468 = vector.extract_strided_slice %456 {offsets = [0, 256], sizes = [8, 128], strides = [1, 1]} : vector<8x384xf32> to vector<8x128xf32>
    %469 = vector.broadcast %15 : vector<1x128xf32> to vector<8x128xf32>
    %470 = arith.addf %468, %469 : vector<8x128xf32>
    %471 = arith.mulf %465, %470 : vector<8x128xf32>
    %472 = arith.addf %467, %471 : vector<8x128xf32>
    %473 = math.tanh %472 : vector<8x128xf32>
    %cst_113 = arith.constant 1.000000e+00 : f32
    %474 = vector.broadcast %cst_113 : f32 to vector<8x128xf32>
    %475 = arith.subf %474, %466 : vector<8x128xf32>
    %476 = arith.mulf %475, %473 : vector<8x128xf32>
    %477 = arith.mulf %466, %417 : vector<8x128xf32>
    %478 = arith.addf %476, %477 : vector<8x128xf32>
    %479 = vector.extract_strided_slice %451 {offsets = [0, 384], sizes = [8, 384], strides = [1, 1]} : vector<8x768xf32> to vector<8x384xf32>
    %480 = vector.extract_strided_slice %455 {offsets = [0, 0], sizes = [8, 256], strides = [1, 1]} : vector<8x384xf32> to vector<8x256xf32>
    %481 = vector.extract_strided_slice %479 {offsets = [0, 0], sizes = [8, 256], strides = [1, 1]} : vector<8x384xf32> to vector<8x256xf32>
    %482 = arith.addf %480, %481 : vector<8x256xf32>
    %483 = arith.negf %482 : vector<8x256xf32>
    %484 = math.exp %483 : vector<8x256xf32>
    %cst_114 = arith.constant 1.000000e+00 : f32
    %485 = vector.broadcast %cst_114 : f32 to vector<8x256xf32>
    %486 = arith.addf %485, %484 : vector<8x256xf32>
    %487 = arith.divf %485, %486 : vector<8x256xf32>
    %488 = vector.extract_strided_slice %487 {offsets = [0, 0], sizes = [8, 128], strides = [1, 1]} : vector<8x256xf32> to vector<8x128xf32>
    %489 = vector.extract_strided_slice %487 {offsets = [0, 128], sizes = [8, 128], strides = [1, 1]} : vector<8x256xf32> to vector<8x128xf32>
    %490 = vector.extract_strided_slice %455 {offsets = [0, 256], sizes = [8, 128], strides = [1, 1]} : vector<8x384xf32> to vector<8x128xf32>
    %491 = vector.extract_strided_slice %479 {offsets = [0, 256], sizes = [8, 128], strides = [1, 1]} : vector<8x384xf32> to vector<8x128xf32>
    %492 = vector.broadcast %16 : vector<1x128xf32> to vector<8x128xf32>
    %493 = arith.addf %491, %492 : vector<8x128xf32>
    %494 = arith.mulf %488, %493 : vector<8x128xf32>
    %495 = arith.addf %490, %494 : vector<8x128xf32>
    %496 = math.tanh %495 : vector<8x128xf32>
    %cst_115 = arith.constant 1.000000e+00 : f32
    %497 = vector.broadcast %cst_115 : f32 to vector<8x128xf32>
    %498 = arith.subf %497, %489 : vector<8x128xf32>
    %499 = arith.mulf %498, %496 : vector<8x128xf32>
    %500 = arith.mulf %489, %440 : vector<8x128xf32>
    %501 = arith.addf %499, %500 : vector<8x128xf32>
    %502 = arith.index_cast %446 : i32 to index
    %c0_116 = arith.constant 0 : index
    %503 = vector.load %arg8[%502, %c0_116] : memref<64x128xf32, #tpu.memory_space<vmem>>, vector<8x128xf32>
    tpu.vector_store %arg8[%502, %c0_116], %478 {strides = array<i32>} : memref<64x128xf32, #tpu.memory_space<vmem>>, vector<8x128xf32>,
    %504 = arith.index_cast %449 : i32 to index
    %c0_117 = arith.constant 0 : index
    %505 = vector.load %arg12[%504, %c0_117] : memref<64x128xf32, #tpu.memory_space<vmem>>, vector<8x128xf32>
    tpu.vector_store %arg12[%504, %c0_117], %501 {strides = array<i32>} : memref<64x128xf32, #tpu.memory_space<vmem>>, vector<8x128xf32>,
    %c8_i32_118 = arith.constant 8 : i32
    %c0_119 = arith.constant 0 : index
    %c0_120 = arith.constant 0 : index
    %506 = vector.load %arg8[%c0_119, %c0_120] : memref<64x128xf32, #tpu.memory_space<vmem>>, vector<64x128xf32>
    %c0_121 = arith.constant 0 : index
    %c0_122 = arith.constant 0 : index
    %507 = vector.load %arg12[%c0_121, %c0_122] : memref<64x128xf32, #tpu.memory_space<vmem>>, vector<64x128xf32>
    %508 = arith.addf %506, %507 : vector<64x128xf32>
    %c0_123 = arith.constant 0 : index
    %c0_124 = arith.constant 0 : index
    %509 = vector.load %arg8[%c0_123, %c0_124] : memref<64x128xf32, #tpu.memory_space<vmem>>, vector<64x128xf32>
    tpu.vector_store %arg8[%c0_123, %c0_124], %508 {strides = array<i32>} : memref<64x128xf32, #tpu.memory_space<vmem>>, vector<64x128xf32>,
    %c0_125 = arith.constant 0 : index
    %c0_126 = arith.constant 0 : index
    %c0_127 = arith.constant 0 : index
    %510 = vector.load %arg9[%c0_125, %c0_126, %c0_127] : memref<2x8x128xf32, #tpu.memory_space<vmem>>, vector<1x8x128xf32>
    %511 = vector.shape_cast %510 : vector<1x8x128xf32> to vector<8x128xf32>
    %512 = vector.shape_cast %478 : vector<8x128xf32> to vector<1x8x128xf32>
    tpu.vector_store %arg9[%c0_125, %c0_126, %c0_127], %512 {strides = array<i32>} : memref<2x8x128xf32, #tpu.memory_space<vmem>>, vector<1x8x128xf32>,
    %c1 = arith.constant 1 : index
    %c0_128 = arith.constant 0 : index
    %c0_129 = arith.constant 0 : index
    %513 = vector.load %arg9[%c1, %c0_128, %c0_129] : memref<2x8x128xf32, #tpu.memory_space<vmem>>, vector<1x8x128xf32>
    %514 = vector.shape_cast %513 : vector<1x8x128xf32> to vector<8x128xf32>
    %515 = vector.shape_cast %501 : vector<8x128xf32> to vector<1x8x128xf32>
    tpu.vector_store %arg9[%c1, %c0_128, %c0_129], %515 {strides = array<i32>} : memref<2x8x128xf32, #tpu.memory_space<vmem>>, vector<1x8x128xf32>,
    return
  }
}

</mosaic_0001>

<bundles_post_ra>
// kernel: encoder_rnn_forward.1
= control target key start
LH: loop header
LB: loop body
LE: loop exit
PB: predicated region body
PF: predicated region fallthrough
CT: control target
= control target key end

     0   :  { %v7041_v3 = vmov 0.0   ;;  %vm62_vm0 = vcmask 130048   ;;  %s7031_s1 = inlined_call_operand.vmem [shape: f32[16,384], index: 1, kind: input, shape index: {}]   ;;  %s7032_s2 = inlined_call_operand.vmem [shape: f32[16,384], index: 2, kind: input, shape index: {}]   ;;  %s7033_s0 = inlined_call_operand.vmem [shape: f32[64,16], index: 0, kind: input, shape index: {}]   ;;  %s7034_s5 = inlined_call_operand.vmem [shape: f32[256,768], index: 5, kind: input, shape index: {}]   ;;  %s7035_s3 = inlined_call_operand.vmem [shape: f32[1,384], index: 3, kind: input, shape index: {}]   ;;  %s7036_s4 = inlined_call_operand.vmem [shape: f32[1,384], index: 4, kind: input, shape index: {}]   ;;  %s7037_s6 = inlined_call_operand.vmem [shape: f32[1,128], index: 6, kind: input, shape index: {}]   ;;  %s7038_s8 = inlined_call_operand.vmem [shape: f32[64,128], index: 8, kind: output, shape index: {0}]   ;;  %s7039_s7 = inlined_call_operand.vmem [shape: f32[1,128], index: 7, kind: input, shape index: {}]   ;;  %s7040_s9 = inlined_call_operand.vmem [shape: f32[2,8,128], index: 9, kind: output, shape index: {1}]  }
   0x1   :  { %v40_v0 = vld [vmem:[%s7031_s1 + $0x8] sm:$0xff]  ;;  %v43_v1 = vld [vmem:[%s7031_s1 + $0x20] sm:$0xff]  ;;  %151 = vmatprep.mubr.f32.mxu0 %v7041_v3  ;;  %187 = vmatprep.mubr.f32.mxu1 %v7041_v3  ;;  %v42_v5 = vld [vmem:[%s7031_s1 + $0x18] sm:$0xff] }
   0x2   :  { %v39_v2 = vld [vmem:[%s7031_s1] sm:$0xff]  ;;  %v3189_v4 = vpack.c.bf16 %v43_v1, %v40_v0  ;;  %v41_v7 = vld [vmem:[%s7031_s1 + $0x10] sm:$0xff]  ;;  %v44_v8 = vld [vmem:[%s7031_s1 + $0x28] sm:$0xff] }
   0x3   :  { %v3191_v6 = vpack.c.bf16 %v42_v5, %v39_v2  ;;  %v3193_v9 = vpack.c.bf16 %v44_v8, %v41_v7  ;;  %v338_v10 = vld [vmem:[%s7032_s2 + $0x8] sm:$0xff]  ;;  %v5015_v11 = vld [vmem:[%s7033_s0] sm:$0xff]  ;;  %v5020_v12 = vld [vmem:[%s7033_s0 + $0x30] sm:$0xff] }
   0x4   :  { %3190 = vmatprep.subr.bf16.mxu0 %v3189_v4  ;;  %4741 = vmatprep.subr.bf16.mxu1 %v3189_v4  ;;  %v341_v13 = vld [vmem:[%s7032_s2 + $0x20] sm:$0xff]  ;;  %v339_v15 = vld [vmem:[%s7032_s2 + $0x10] sm:$0xff]  ;;  %v342_v16 = vld [vmem:[%s7032_s2 + $0x28] sm:$0xff] }
   0x5   :  { %3192 = vmatpush1.bf16.msra.mxu0 %v3191_v6  ;;  %4742 = vmatpush1.bf16.msra.mxu1 %v3191_v6  ;;  %v3197_v14 = vpack.c.bf16 %v341_v13, %v338_v10  ;;  %v3201_v17 = vpack.c.bf16 %v342_v16, %v339_v15  ;;  %v627_v18 = vld [vmem:[%s7034_s5 + $0x8] sm:$0xff]  ;;  %v633_v19 = vld [vmem:[%s7034_s5 + $0x38] sm:$0xff]  ;;  %v337_v22 = vld [vmem:[%s7032_s2] sm:$0xff] }
   0x6   :  { %3194 = vmatprep.subr.bf16.mxu1 %v3193_v9  ;;  %v5045_v20 = vld [vmem:[%s7033_s0 + $0x8] sm:$0xff]  ;;  %v5050_v21 = vld [vmem:[%s7033_s0 + $0x38] sm:$0xff]  ;;  %v5059_v24 = vpack.c.bf16 %v633_v19, %v627_v18  ;;  %v5077_v27 = vld [vmem:[%s7033_s0 + $0x10] sm:$0xff] }
   0x7   :  { %v340_v23 = vld [vmem:[%s7032_s2 + $0x18] sm:$0xff]  ;;  %3202 = vmatprep.subr.bf16.mxu0 %v3201_v17  ;;  %v635_v26 = vld [vmem:[%s7034_s5 + $0x48] sm:$0xff]  ;;  %v5097_v31 = vld [vmem:[%s7033_s0 + $0x20] sm:$0xff] }
   0x8   :  { %3063 = vmatmul.mubr.msk.f32.vlgmr.msra.gmra.mrb[0].mxu0 %vm62_vm0, %v5015_v11  ;;  %3069 = vmatmul.mubr.msk.f32.vlgmr.msra.gmra.mrb[0].mxu1 %vm62_vm0, %v5020_v12  ;;  %7294 = vst [vmem:[#allocation5_spill] sm:$0xff] %v5059_v24  ;;  %v629_v25 = vld [vmem:[%s7034_s5 + $0x18] sm:$0xff]  ;;  %v3199_v28 = vpack.c.bf16 %v340_v23, %v337_v22  ;;  %v5110_v32 = vld [vmem:[%s7033_s0 + $0x28] sm:$0xff]  ;;  %v626_v33 = vld [vmem:[%s7034_s5] sm:$0xff] }
   0x9   :  { %3196 = vmatpush3.bf16.msra.mxu1 %v3193_v9  ;;  %157 = vmatprep.mubr.f32.mxu0 %v7041_v3  ;;  %v5079_v29 = vpack.c.bf16 %v635_v26, %v629_v25  ;;  %v5090_v30 = vld [vmem:[%s7033_s0 + $0x18] sm:$0xff]  ;;  %v632_v34 = vld [vmem:[%s7034_s5 + $0x30] sm:$0xff]  ;;  %v634_v36 = vld [vmem:[%s7034_s5 + $0x40] sm:$0xff] }
   0xa   :  { %193 = vmatprep.mubr.f32.mxu1 %v7041_v3  ;;  %3198 = vmatprep.subr.bf16.mxu1 %v3197_v14  ;;  %v628_v35 = vld [vmem:[%s7034_s5 + $0x10] sm:$0xff]  ;;  %v639_v37 = vld [vmem:[%s7034_s5 + $0x68] sm:$0xff]  ;;  %v645_v38 = vld [vmem:[%s7034_s5 + $0x98] sm:$0xff]  ;;  %v5150_v41 = vpack.c.bf16 %v632_v34, %v626_v33 }
   0xb   :  { %3204 = vmatpush3.bf16.msra.mxu0 %v3201_v17  ;;  %7295 = vst [vmem:[#allocation6_spill] sm:$0xff] %v5079_v29  ;;  %v641_v39 = vld [vmem:[%s7034_s5 + $0x78] sm:$0xff]  ;;  %v647_v40 = vld [vmem:[%s7034_s5 + $0xa8] sm:$0xff]  ;;  %v5152_v42 = vpack.c.bf16 %v634_v36, %v628_v35  ;;  %v638_v43 = vld [vmem:[%s7034_s5 + $0x60] sm:$0xff]  ;;  %v5160_v45 = vpack.c.bf16 %v645_v38, %v639_v37 }
   0xc   :  { %3064 = vmatmul.mubr.msk.f32.gmra.mrb[2].mxu0 %vm62_vm0, %v5045_v20  ;;  %3070 = vmatmul.mubr.msk.f32.gmra.mrb[2].mxu1 %vm62_vm0, %v5050_v21  ;;  %7296 = vst [vmem:[#allocation7_spill] sm:$0xff] %v5150_v41  ;;  %v644_v44 = vld [vmem:[%s7034_s5 + $0x90] sm:$0xff]  ;;  %v5162_v46 = vpack.c.bf16 %v647_v40, %v641_v39  ;;  %v646_v48 = vld [vmem:[%s7034_s5 + $0xa0] sm:$0xff]  ;;  %v651_v49 = vld [vmem:[%s7034_s5 + $0xc8] sm:$0xff] }
   0xd   :  { %163 = vmatprep.mubr.f32.mxu0 %v7041_v3  ;;  %3161 = vmatprep.mubr.msk.f32.mxu1 %vm62_vm0, %v5015_v11  ;;  %7297 = vst [vmem:[#allocation8_spill] sm:$0xff] %v5152_v42  ;;  %7298 = vst [vmem:[#allocation9_spill] sm:$0xff] %v5160_v45  ;;  %v640_v47 = vld [vmem:[%s7034_s5 + $0x70] sm:$0xff]  ;;  %v657_v50 = vld [vmem:[%s7034_s5 + $0xf8] sm:$0xff]  ;;  %v5188_v53 = vpack.c.bf16 %v644_v44, %v638_v43 }
   0xe   :  { %3206 = vmatprep.subr.bf16.mxu0 %v5059_v24  ;;  %7299 = vst [vmem:[#allocation10_spill] sm:$0xff] %v5162_v46  ;;  %v653_v51 = vld [vmem:[%s7034_s5 + $0xd8] sm:$0xff]  ;;  %v659_v52 = vld [vmem:[%s7034_s5 + $0x108] sm:$0xff]  ;;  %v5190_v54 = vpack.c.bf16 %v646_v48, %v640_v47  ;;  %v650_v55 = vld [vmem:[%s7034_s5 + $0xc0] sm:$0xff]  ;;  %v5200_v57 = vpack.c.bf16 %v657_v50, %v651_v49 }
   0xf   :  { %7300 = vst [vmem:[#allocation11_spill] sm:$0xff] %v5188_v53  ;;  %v656_v56 = vld [vmem:[%s7034_s5 + $0xf0] sm:$0xff]  ;;  %v5202_v58 = vpack.c.bf16 %v659_v52, %v653_v51  ;;  %v658_v60 = vld [vmem:[%s7034_s5 + $0x100] sm:$0xff]  ;;  %v663_v61 = vld [vmem:[%s7034_s5 + $0x128] sm:$0xff] }
  0x10   :  { %3065 = vmatmul.mubr.msk.f32.gmra.mrb[4].mxu0 %vm62_vm0, %v5077_v27  ;;  %3162 = vmatmul.mubr.msk.f32.vlgmr.msra.gmra.mrb[4].mxu1 %vm62_vm0, %v5045_v20  ;;  %7301 = vst [vmem:[#allocation12_spill] sm:$0xff] %v5190_v54  ;;  %7302 = vst [vmem:[#allocation13_spill] sm:$0xff] %v5200_v57  ;;  %v652_v59 = vld [vmem:[%s7034_s5 + $0xd0] sm:$0xff]  ;;  %v669_v62 = vld [vmem:[%s7034_s5 + $0x158] sm:$0xff]  ;;  %v5231_v1 = vpack.c.bf16 %v656_v56, %v650_v55 }
  0x11   :  { %3200 = vmatpush1.bf16.msra.mxu1 %v3199_v28  ;;  %169 = vmatprep.mubr.f32.mxu0 %v7041_v3  ;;  %7303 = vst [vmem:[#allocation14_spill] sm:$0xff] %v5202_v58  ;;  %v665_v63 = vld [vmem:[%s7034_s5 + $0x138] sm:$0xff]  ;;  %v671_v0 = vld [vmem:[%s7034_s5 + $0x168] sm:$0xff]  ;;  %v5233_v2 = vpack.c.bf16 %v658_v60, %v652_v59  ;;  %v662_v4 = vld [vmem:[%s7034_s5 + $0x120] sm:$0xff]  ;;  %v5243_v6 = vpack.c.bf16 %v669_v62, %v663_v61 }
  0x12   :  { %3164 = vmatprep.mubr.msk.f32.mxu1 %vm62_vm0, %v5077_v27  ;;  %3270 = vmatprep.subr.bf16.mxu1 %v5079_v29  ;;  %7304 = vst [vmem:[#allocation15_spill] sm:$0xff] %v5231_v1  ;;  %v668_v5 = vld [vmem:[%s7034_s5 + $0x150] sm:$0xff]  ;;  %v5245_v7 = vpack.c.bf16 %v671_v0, %v665_v63  ;;  %v670_v9 = vld [vmem:[%s7034_s5 + $0x160] sm:$0xff]  ;;  %v675_v10 = vld [vmem:[%s7034_s5 + $0x188] sm:$0xff] }
  0x13   :  { %7305 = vst [vmem:[#allocation16_spill] sm:$0xff] %v5233_v2  ;;  %7306 = vst [vmem:[#allocation17_spill] sm:$0xff] %v5243_v6  ;;  %v664_v8 = vld [vmem:[%s7034_s5 + $0x130] sm:$0xff]  ;;  %v677_v13 = vld [vmem:[%s7034_s5 + $0x198] sm:$0xff]  ;;  %v5274_v15 = vpack.c.bf16 %v668_v5, %v662_v4 }
  0x14   :  { %3066 = vmatmul.mubr.msk.f32.gmra.mrb[6].mxu0 %vm62_vm0, %v5090_v30  ;;  %3165 = vmatmul.mubr.msk.f32.gmra.mrb[6].mxu1 %vm62_vm0, %v5090_v30  ;;  %7307 = vst [vmem:[#allocation18_spill] sm:$0xff] %v5245_v7  ;;  %v683_v14 = vld [vmem:[%s7034_s5 + $0x1c8] sm:$0xff]  ;;  %v5276_v16 = vpack.c.bf16 %v670_v9, %v664_v8  ;;  %v674_v17 = vld [vmem:[%s7034_s5 + $0x180] sm:$0xff]  ;;  %v680_v18 = vld [vmem:[%s7034_s5 + $0x1b0] sm:$0xff] }
  0x15   :  { %175 = vmatprep.mubr.f32.mxu0 %v7041_v3  ;;  %3167 = vmatprep.mubr.msk.f32.mxu1 %vm62_vm0, %v5097_v31  ;;  %7308 = vst [vmem:[#allocation19_spill] sm:$0xff] %v5274_v15  ;;  %v676_v22 = vld [vmem:[%s7034_s5 + $0x190] sm:$0xff]  ;;  %v682_v23 = vld [vmem:[%s7034_s5 + $0x1c0] sm:$0xff]  ;;  %v687_v25 = vld [vmem:[%s7034_s5 + $0x1e8] sm:$0xff]  ;;  %v5317_v33 = vpack.c.bf16 %v680_v18, %v674_v17 }
  0x16   :  { %7309 = vst [vmem:[#allocation20_spill] sm:$0xff] %v5276_v16  ;;  %v693_v26 = vld [vmem:[%s7034_s5 + $0x218] sm:$0xff]  ;;  %v695_v28 = vld [vmem:[%s7034_s5 + $0x228] sm:$0xff]  ;;  %v5319_v34 = vpack.c.bf16 %v682_v23, %v676_v22  ;;  %v686_v35 = vld [vmem:[%s7034_s5 + $0x1e0] sm:$0xff] }
  0x17   :  { %7312 = vst [vmem:[#allocation23_spill] sm:$0xff] %v5317_v33  ;;  %v692_v36 = vld [vmem:[%s7034_s5 + $0x210] sm:$0xff]  ;;  %v694_v39 = vld [vmem:[%s7034_s5 + $0x220] sm:$0xff]  ;;  %v699_v40 = vld [vmem:[%s7034_s5 + $0x248] sm:$0xff] }
  0x18   :  { %3067 = vmatmul.mubr.msk.f32.gmra.mrb[8].mxu0 %vm62_vm0, %v5097_v31  ;;  %3168 = vmatmul.mubr.msk.f32.gmra.mrb[8].mxu1 %vm62_vm0, %v5110_v32  ;;  %7313 = vst [vmem:[#allocation24_spill] sm:$0xff] %v5319_v34  ;;  %v688_v38 = vld [vmem:[%s7034_s5 + $0x1f0] sm:$0xff]  ;;  %v705_v43 = vld [vmem:[%s7034_s5 + $0x278] sm:$0xff]  ;;  %v707_v47 = vld [vmem:[%s7034_s5 + $0x288] sm:$0xff]  ;;  %v5357_v48 = vpack.c.bf16 %v692_v36, %v686_v35 }
  0x19   :  { %181 = vmatprep.mubr.f32.mxu0 %v7041_v3  ;;  %3170 = vmatprep.mubr.msk.f32.mxu1 %vm62_vm0, %v5020_v12  ;;  %v701_v44 = vld [vmem:[%s7034_s5 + $0x258] sm:$0xff]  ;;  %v5359_v49 = vpack.c.bf16 %v694_v39, %v688_v38  ;;  %v698_v50 = vld [vmem:[%s7034_s5 + $0x240] sm:$0xff]  ;;  %v704_v51 = vld [vmem:[%s7034_s5 + $0x270] sm:$0xff] }
  0x1a   :  { %7316 = vst [vmem:[#allocation27_spill] sm:$0xff] %v5357_v48  ;;  %v5371_v52 = vpack.c.bf16 %v707_v47, %v701_v44  ;;  %v700_v55 = vld [vmem:[%s7034_s5 + $0x250] sm:$0xff]  ;;  %v706_v56 = vld [vmem:[%s7034_s5 + $0x280] sm:$0xff]  ;;  %v711_v59 = vld [vmem:[%s7034_s5 + $0x2a8] sm:$0xff]  ;;  %v5396_v63 = vpack.c.bf16 %v704_v51, %v698_v50 }
  0x1b   :  { %7317 = vst [vmem:[#allocation28_spill] sm:$0xff] %v5359_v49  ;;  %v717_v60 = vld [vmem:[%s7034_s5 + $0x2d8] sm:$0xff]  ;;  %v719_v62 = vld [vmem:[%s7034_s5 + $0x2e8] sm:$0xff]  ;;  %v5398_v0 = vpack.c.bf16 %v706_v56, %v700_v55  ;;  %v710_v4 = vld [vmem:[%s7034_s5 + $0x2a0] sm:$0xff] }
  0x1c   :  { %3068 = vmatmul.mubr.msk.f32.gmra.mrb[10].mxu0 %vm62_vm0, %v5110_v32  ;;  %3171 = vmatmul.mubr.msk.f32.gmra.mrb[10].mxu1 %vm62_vm0, %v5050_v21  ;;  %7319 = vst [vmem:[#allocation30_spill] sm:$0xff] %v5371_v52  ;;  %v713_v61 = vld [vmem:[%s7034_s5 + $0x2b8] sm:$0xff]  ;;  %7320 = vst [vmem:[#allocation31_spill] sm:$0xff] %v5396_v63  ;;  %v716_v5 = vld [vmem:[%s7034_s5 + $0x2d0] sm:$0xff] }
  0x1d   :  { %448 = vmatprep.mubr.f32.mxu1 %v7041_v3  ;;  %3177 = vmatprep.mubr.msk.f32.mxu0 %vm62_vm0, %v5015_v11  ;;  %7321 = vst [vmem:[#allocation32_spill] sm:$0xff] %v5398_v0  ;;  %v5410_v8 = vpack.c.bf16 %v719_v62, %v713_v61  ;;  %v712_v9 = vld [vmem:[%s7034_s5 + $0x2b0] sm:$0xff]  ;;  %v731_v17 = vld [vmem:[%s7034_s5 + $0x348] sm:$0xff]  ;;  %v5435_v18 = vpack.c.bf16 %v716_v5, %v710_v4  ;;  %v722_v23 = vld [vmem:[%s7034_s5 + $0x300] sm:$0xff] }
  0x1e   :  { %v735_v35 = vld [vmem:[%s7034_s5 + $0x368] sm:$0xff]  ;;  %v741_v36 = vld [vmem:[%s7034_s5 + $0x398] sm:$0xff]  ;;  %v734_v44 = vld [vmem:[%s7034_s5 + $0x360] sm:$0xff] }
  0x1f   :  { %7323 = vst [vmem:[#allocation34_spill] sm:$0xff] %v5410_v8  ;;  %7324 = vst [vmem:[#allocation35_spill] sm:$0xff] %v5435_v18  ;;  %v737_v38 = vld [vmem:[%s7034_s5 + $0x378] sm:$0xff]  ;;  %v743_v39 = vld [vmem:[%s7034_s5 + $0x3a8] sm:$0xff] }
  0x20   :  { %3079 = vmatmul.mubr.msk.f32.vlgmr.msra.gmra.mrb[12].mxu1 %vm62_vm0, %v5015_v11  ;;  %3178 = vmatmul.mubr.msk.f32.vlgmr.msra.gmra.mrb[12].mxu0 %vm62_vm0, %v5045_v20  ;;  %v681_v11 = vld [vmem:[%s7034_s5 + $0x1b8] sm:$0xff]  ;;  %v740_v47 = vld [vmem:[%s7034_s5 + $0x390] sm:$0xff]  ;;  %v5488_v50 = vpack.c.bf16 %v743_v39, %v737_v38  ;;  %v742_v55 = vld [vmem:[%s7034_s5 + $0x3a0] sm:$0xff] }
  0x21   :  { %3208 = vmatpush1.bf16.msra.mxu0 %v5150_v41  ;;  %3272 = vmatpush1.bf16.msra.mxu1 %v5152_v42  ;;  %v5286_v19 = vpack.c.bf16 %v681_v11, %v675_v10  ;;  %v718_v10 = vld [vmem:[%s7034_s5 + $0x2e0] sm:$0xff]  ;;  %v723_v11 = vld [vmem:[%s7034_s5 + $0x308] sm:$0xff]  ;;  %v736_v51 = vld [vmem:[%s7034_s5 + $0x370] sm:$0xff]  ;;  %v5511_v62 = vpack.c.bf16 %v740_v47, %v734_v44 }
  0x22   :  { %3210 = vmatprep.subr.bf16.mxu0 %v5160_v45  ;;  %3274 = vmatprep.subr.bf16.mxu1 %v5162_v46  ;;  %v5437_v22 = vpack.c.bf16 %v718_v10, %v712_v9  ;;  %7331 = vst [vmem:[#allocation42_spill] sm:$0xff] %v5488_v50  ;;  %v747_v56 = vld [vmem:[%s7034_s5 + $0x3c8] sm:$0xff]  ;;  %v5513_v4 = vpack.c.bf16 %v742_v55, %v736_v51  ;;  %v746_v5 = vld [vmem:[%s7034_s5 + $0x3c0] sm:$0xff]  ;;  %v752_v9 = vld [vmem:[%s7034_s5 + $0x3f0] sm:$0xff] }
  0x23   :  { %454 = vmatprep.mubr.f32.mxu1 %v7041_v3  ;;  %3180 = vmatprep.mubr.msk.f32.mxu0 %vm62_vm0, %v5077_v27  ;;  %7310 = vst [vmem:[#allocation21_spill] sm:$0xff] %v5286_v19  ;;  %v755_v61 = vld [vmem:[%s7034_s5 + $0x408] sm:$0xff]  ;;  %7332 = vst [vmem:[#allocation43_spill] sm:$0xff] %v5511_v62  ;;  %v764_v38 = vld [vmem:[%s7034_s5 + $0x450] sm:$0xff] }
  0x24   :  { %3080 = vmatmul.mubr.msk.f32.gmra.mrb[14].mxu1 %vm62_vm0, %v5045_v20  ;;  %3181 = vmatmul.mubr.msk.f32.gmra.mrb[14].mxu0 %vm62_vm0, %v5090_v30  ;;  %v5288_v20 = vpack.c.bf16 %v683_v14, %v677_v13  ;;  %v729_v13 = vld [vmem:[%s7034_s5 + $0x338] sm:$0xff]  ;;  %7325 = vst [vmem:[#allocation36_spill] sm:$0xff] %v5437_v22  ;;  %7333 = vst [vmem:[#allocation44_spill] sm:$0xff] %v5513_v4  ;;  %v760_v47 = vld [vmem:[%s7034_s5 + $0x430] sm:$0xff] }
  0x25   :  { %3212 = vmatpush1.bf16.msra.mxu0 %v5188_v53  ;;  %3276 = vmatpush1.bf16.msra.mxu1 %v5190_v54  ;;  %v725_v14 = vld [vmem:[%s7034_s5 + $0x318] sm:$0xff]  ;;  %v766_v51 = vld [vmem:[%s7034_s5 + $0x460] sm:$0xff]  ;;  %v771_v55 = vld [vmem:[%s7034_s5 + $0x488] sm:$0xff] }
  0x26   :  { %3214 = vmatprep.subr.bf16.mxu0 %v5200_v57  ;;  %3278 = vmatprep.subr.bf16.mxu1 %v5202_v58  ;;  %7311 = vst [vmem:[#allocation22_spill] sm:$0xff] %v5288_v20 }
  0x27   :  { %460 = vmatprep.mubr.f32.mxu1 %v7041_v3  ;;  %3183 = vmatprep.mubr.msk.f32.mxu0 %vm62_vm0, %v5097_v31 }
  0x28   :  { %3081 = vmatmul.mubr.msk.f32.gmra.mrb[16].mxu1 %vm62_vm0, %v5077_v27  ;;  %3184 = vmatmul.mubr.msk.f32.gmra.mrb[16].mxu0 %vm62_vm0, %v5110_v32  ;;  %v689_v27 = vld [vmem:[%s7034_s5 + $0x1f8] sm:$0xff] }
  0x29   :  { %3216 = vmatpush1.bf16.msra.mxu0 %v5231_v1  ;;  %3280 = vmatpush1.bf16.msra.mxu1 %v5233_v2  ;;  %v5331_v37 = vpack.c.bf16 %v695_v28, %v689_v27  ;;  %v724_v27 = vld [vmem:[%s7034_s5 + $0x310] sm:$0xff]  ;;  %v730_v28 = vld [vmem:[%s7034_s5 + $0x340] sm:$0xff] }
  0x2a   :  { %3218 = vmatprep.subr.bf16.mxu0 %v5243_v6  ;;  %3282 = vmatprep.subr.bf16.mxu1 %v5245_v7 }
  0x2b   :  { %466 = vmatprep.mubr.f32.mxu1 %v7041_v3  ;;  %3186 = vmatprep.mubr.msk.f32.mxu0 %vm62_vm0, %v5020_v12  ;;  %7315 = vst [vmem:[#allocation26_spill] sm:$0xff] %v5331_v37 }
  0x2c   :  { %3082 = vmatmul.mubr.msk.f32.gmra.mrb[18].mxu1 %vm62_vm0, %v5090_v30  ;;  %3187 = vmatmul.mubr.msk.f32.gmra.mrb[18].mxu0 %vm62_vm0, %v5050_v21  ;;  %v5329_v30 = vpack.c.bf16 %v693_v26, %v687_v25  ;;  %v728_v25 = vld [vmem:[%s7034_s5 + $0x330] sm:$0xff]  ;;  %v5449_v26 = vpack.c.bf16 %v731_v17, %v725_v14  ;;  %v754_v14 = vld [vmem:[%s7034_s5 + $0x400] sm:$0xff]  ;;  %v759_v17 = vld [vmem:[%s7034_s5 + $0x428] sm:$0xff] }
  0x2d   :  { %3220 = vmatpush1.bf16.msra.mxu0 %v5274_v15  ;;  %3284 = vmatpush1.bf16.msra.mxu1 %v5276_v16 }
  0x2e   :  { %3222 = vmatprep.subr.bf16.mxu0 %v5286_v19  ;;  %3286 = vmatprep.subr.bf16.mxu1 %v5288_v20  ;;  %7314 = vst [vmem:[#allocation25_spill] sm:$0xff] %v5329_v30  ;;  %7327 = vst [vmem:[#allocation38_spill] sm:$0xff] %v5449_v26 }
  0x2f   :  { %472 = vmatprep.mubr.f32.mxu1 %v7041_v3  ;;  %884 = vmatprep.mubr.f32.mxu0 %v7041_v3 }
  0x30   :  { %3083 = vmatmul.mubr.msk.f32.gmra.mrb[20].mxu1 %vm62_vm0, %v5097_v31  ;;  %v5369_v31 = vpack.c.bf16 %v705_v43, %v699_v40  ;;  %v5474_v40 = vpack.c.bf16 %v728_v25, %v722_v23  ;;  %v5476_v43 = vpack.c.bf16 %v730_v28, %v724_v27  ;;  %v765_v23 = vld [vmem:[%s7034_s5 + $0x458] sm:$0xff]  ;;  %v767_v27 = vld [vmem:[%s7034_s5 + $0x468] sm:$0xff]  ;;  %v5547_v28 = vpack.c.bf16 %v752_v9, %v746_v5  ;;  %v770_v9 = vld [vmem:[%s7034_s5 + $0x480] sm:$0xff] }
  0x31   :  { %3224 = vmatpush1.bf16.msra.mxu0 %v5317_v33  ;;  %3288 = vmatpush1.bf16.msra.mxu1 %v5319_v34  ;;  %v761_v25 = vld [vmem:[%s7034_s5 + $0x438] sm:$0xff]  ;;  %v5559_v39 = vpack.c.bf16 %v765_v23, %v759_v17  ;;  %v5585_v5 = vpack.c.bf16 %v766_v51, %v760_v47  ;;  %v772_v23 = vld [vmem:[%s7034_s5 + $0x490] sm:$0xff]  ;;  %v791_v47 = vld [vmem:[%s7034_s5 + $0x528] sm:$0xff] }
  0x32   :  { %3226 = vmatprep.subr.bf16.mxu0 %v5329_v30  ;;  %3290 = vmatprep.subr.bf16.mxu1 %v5331_v37  ;;  %7318 = vst [vmem:[#allocation29_spill] sm:$0xff] %v5369_v31  ;;  %7328 = vst [vmem:[#allocation39_spill] sm:$0xff] %v5474_v40  ;;  %v5561_v44 = vpack.c.bf16 %v767_v27, %v761_v25  ;;  %v778_v25 = vld [vmem:[%s7034_s5 + $0x4c0] sm:$0xff]  ;;  %v783_v27 = vld [vmem:[%s7034_s5 + $0x4e8] sm:$0xff] }
  0x33   :  { %478 = vmatprep.mubr.f32.mxu1 %v7041_v3  ;;  %7329 = vst [vmem:[#allocation40_spill] sm:$0xff] %v5476_v43  ;;  %7336 = vst [vmem:[#allocation47_spill] sm:$0xff] %v5547_v28 }
  0x34   :  { %3084 = vmatmul.mubr.msk.f32.gmra.mrb[22].mxu1 %vm62_vm0, %v5110_v32  ;;  %v5408_v32 = vpack.c.bf16 %v717_v60, %v711_v59  ;;  %v753_v59 = vld [vmem:[%s7034_s5 + $0x3f8] sm:$0xff]  ;;  %7338 = vst [vmem:[#allocation49_spill] sm:$0xff] %v5559_v39  ;;  %7339 = vst [vmem:[#allocation50_spill] sm:$0xff] %v5561_v44 }
  0x35   :  { %3228 = vmatpush1.bf16.msra.mxu0 %v5357_v48  ;;  %3292 = vmatpush1.bf16.msra.mxu1 %v5359_v49  ;;  %v749_v60 = vld [vmem:[%s7034_s5 + $0x3d8] sm:$0xff]  ;;  %v5523_v10 = vpack.c.bf16 %v753_v59, %v747_v56  ;;  %7341 = vst [vmem:[#allocation52_spill] sm:$0xff] %v5585_v5 }
  0x36   :  { %3230 = vmatprep.subr.bf16.mxu0 %v5369_v31  ;;  %3294 = vmatprep.subr.bf16.mxu1 %v5371_v52  ;;  %7322 = vst [vmem:[#allocation33_spill] sm:$0xff] %v5408_v32  ;;  %v777_v56 = vld [vmem:[%s7034_s5 + $0x4b8] sm:$0xff] }
  0x37   :  { %484 = vmatprep.mubr.f32.mxu1 %v7041_v3  ;;  %7334 = vst [vmem:[#allocation45_spill] sm:$0xff] %v5523_v10  ;;  %v773_v59 = vld [vmem:[%s7034_s5 + $0x498] sm:$0xff] }
  0x38   :  { %3085 = vmatmul.mubr.msk.f32.gmra.mrb[24].mxu1 %vm62_vm0, %v5020_v12  ;;  %v5447_v12 = vpack.c.bf16 %v729_v13, %v723_v11  ;;  %v5525_v11 = vpack.c.bf16 %v755_v61, %v749_v60  ;;  %v748_v13 = vld [vmem:[%s7034_s5 + $0x3d0] sm:$0xff]  ;;  %v779_v60 = vld [vmem:[%s7034_s5 + $0x4c8] sm:$0xff] }
  0x39   :  { %3232 = vmatpush1.bf16.msra.mxu0 %v5396_v63  ;;  %3296 = vmatpush1.bf16.msra.mxu1 %v5398_v0  ;;  %v5597_v17 = vpack.c.bf16 %v779_v60, %v773_v59  ;;  %v788_v59 = vld [vmem:[%s7034_s5 + $0x510] sm:$0xff] }
  0x3a   :  { %3234 = vmatprep.subr.bf16.mxu0 %v5408_v32  ;;  %3298 = vmatprep.subr.bf16.mxu1 %v5410_v8  ;;  %7326 = vst [vmem:[#allocation37_spill] sm:$0xff] %v5447_v12  ;;  %7335 = vst [vmem:[#allocation46_spill] sm:$0xff] %v5525_v11 }
  0x3b   :  { %490 = vmatprep.mubr.f32.mxu1 %v7041_v3  ;;  %7343 = vst [vmem:[#allocation54_spill] sm:$0xff] %v5597_v17 }
  0x3c   :  { %3086 = vmatmul.mubr.msk.f32.gmra.mrb[26].mxu1 %vm62_vm0, %v5050_v21  ;;  %v5486_v21 = vpack.c.bf16 %v741_v36, %v735_v35  ;;  %v5549_v35 = vpack.c.bf16 %v754_v14, %v748_v13  ;;  %v758_v36 = vld [vmem:[%s7034_s5 + $0x420] sm:$0xff]  ;;  %v776_v13 = vld [vmem:[%s7034_s5 + $0x4b0] sm:$0xff]  ;;  %v5595_v14 = vpack.c.bf16 %v777_v56, %v771_v55  ;;  %v5621_v55 = vpack.c.bf16 %v778_v25, %v772_v23  ;;  %v795_v23 = vld [vmem:[%s7034_s5 + $0x548] sm:$0xff] }
  0x3d   :  { %3236 = vmatpush1.bf16.msra.mxu0 %v5435_v18  ;;  %3300 = vmatpush1.bf16.msra.mxu1 %v5437_v22  ;;  %v5583_v61 = vpack.c.bf16 %v764_v38, %v758_v36  ;;  %v789_v36 = vld [vmem:[%s7034_s5 + $0x518] sm:$0xff]  ;;  %v5619_v51 = vpack.c.bf16 %v776_v13, %v770_v9  ;;  %v782_v56 = vld [vmem:[%s7034_s5 + $0x4e0] sm:$0xff]  ;;  %v784_v9 = vld [vmem:[%s7034_s5 + $0x4f0] sm:$0xff] }
  0x3e   :  { %3238 = vmatprep.subr.bf16.mxu0 %v5447_v12  ;;  %3302 = vmatprep.subr.bf16.mxu1 %v5449_v26  ;;  %7330 = vst [vmem:[#allocation41_spill] sm:$0xff] %v5486_v21  ;;  %7337 = vst [vmem:[#allocation48_spill] sm:$0xff] %v5549_v35  ;;  %v785_v38 = vld [vmem:[%s7034_s5 + $0x4f8] sm:$0xff]  ;;  %v5631_v60 = vpack.c.bf16 %v789_v36, %v783_v27  ;;  %v790_v13 = vld [vmem:[%s7034_s5 + $0x520] sm:$0xff] }
  0x3f   :  { %955 = vmatprep.mubr.f32.mxu1 %v7041_v3  ;;  %7340 = vst [vmem:[#allocation51_spill] sm:$0xff] %v5583_v61  ;;  %7342 = vst [vmem:[#allocation53_spill] sm:$0xff] %v5595_v14  ;;  %v5633_v3 = vpack.c.bf16 %v791_v47, %v785_v38  ;;  %v801_v25 = vld [vmem:[%s7034_s5 + $0x578] sm:$0xff]  ;;  %v803_v36 = vld [vmem:[%s7034_s5 + $0x588] sm:$0xff]  ;;  %v5655_v38 = vpack.c.bf16 %v788_v59, %v782_v56  ;;  %v5657_v47 = vpack.c.bf16 %v790_v13, %v784_v9 }
  0x40   :  { %7344 = vst [vmem:[#allocation55_spill] sm:$0xff] %v5619_v51  ;;  %7345 = vst [vmem:[#allocation56_spill] sm:$0xff] %v5621_v55  ;;  %v797_v27 = vld [vmem:[%s7034_s5 + $0x558] sm:$0xff]  ;;  %v796_v56 = vld [vmem:[%s7034_s5 + $0x550] sm:$0xff] }
  0x41   :  { %3240 = vmatpush1.bf16.msra.mxu0 %v5474_v40  ;;  %3304 = vmatpush1.bf16.msra.mxu1 %v5476_v43  ;;  %7346 = vst [vmem:[#allocation57_spill] sm:$0xff] %v5631_v60  ;;  %7347 = vst [vmem:[#allocation58_spill] sm:$0xff] %v5633_v3  ;;  %v802_v59 = vld [vmem:[%s7034_s5 + $0x580] sm:$0xff]  ;;  %v807_v9 = vld [vmem:[%s7034_s5 + $0x5a8] sm:$0xff] }
  0x42   :  { %3242 = vmatprep.subr.bf16.mxu0 %v5486_v21  ;;  %3306 = vmatprep.subr.bf16.mxu1 %v5488_v50  ;;  %7348 = vst [vmem:[#allocation59_spill] sm:$0xff] %v5655_v38  ;;  %7349 = vst [vmem:[#allocation60_spill] sm:$0xff] %v5657_v47  ;;  %v813_v13 = vld [vmem:[%s7034_s5 + $0x5d8] sm:$0xff] }
  0x45   :  { %3244 = vmatpush1.bf16.msra.mxu0 %v5511_v62  ;;  %3308 = vmatpush1.bf16.msra.mxu1 %v5513_v4 }
  0x46   :  { %3246 = vmatprep.subr.bf16.mxu0 %v5523_v10  ;;  %3310 = vmatprep.subr.bf16.mxu1 %v5525_v11 }
  0x49   :  { %3248 = vmatpush1.bf16.msra.mxu0 %v5547_v28  ;;  %3312 = vmatpush1.bf16.msra.mxu1 %v5549_v35  ;;  %v5669_v35 = vpack.c.bf16 %v803_v36, %v797_v27  ;;  %v5693_v36 = vpack.c.bf16 %v802_v59, %v796_v56  ;;  %v631_v56 = vld [vmem:[%s7034_s5 + $0x28] sm:$0xff]  ;;  %v637_v59 = vld [vmem:[%s7034_s5 + $0x58] sm:$0xff] }
  0x4a   :  { %3250 = vmatprep.subr.bf16.mxu0 %v5559_v39  ;;  %3314 = vmatprep.subr.bf16.mxu1 %v5561_v44  ;;  %v5667_v44 = vpack.c.bf16 %v801_v25, %v795_v23  ;;  %v809_v23 = vld [vmem:[%s7034_s5 + $0x5b8] sm:$0xff]  ;;  %v815_v25 = vld [vmem:[%s7034_s5 + $0x5e8] sm:$0xff] }
  0x4b   :  { %7351 = vst [vmem:[#allocation62_spill] sm:$0xff] %v5669_v35  ;;  %7353 = vst [vmem:[#allocation64_spill] sm:$0xff] %v5693_v36  ;;  %v5702_v11 = vpack.c.bf16 %v815_v25, %v809_v23  ;;  %v5727_v23 = vpack.c.bf16 %v637_v59, %v631_v56  ;;  %v630_v25 = vld [vmem:[%s7034_s5 + $0x20] sm:$0xff]  ;;  %v648_v59 = vld [vmem:[%s7034_s5 + $0xb0] sm:$0xff] }
  0x4c   :  { %7350 = vst [vmem:[#allocation61_spill] sm:$0xff] %v5667_v44  ;;  %v642_v56 = vld [vmem:[%s7034_s5 + $0x80] sm:$0xff] }
  0x4d   :  { %3252 = vmatpush1.bf16.msra.mxu0 %v5583_v61  ;;  %3316 = vmatpush1.bf16.msra.mxu1 %v5585_v5  ;;  %v800_v5 = vld [vmem:[%s7034_s5 + $0x570] sm:$0xff]  ;;  %7355 = vst [vmem:[#allocation66_spill] sm:$0xff] %v5702_v11  ;;  %7358 = vst [vmem:[#allocation69_spill] sm:$0xff] %v5727_v23 }
  0x4e   :  { %3254 = vmatprep.subr.bf16.mxu0 %v5595_v14  ;;  %3318 = vmatprep.subr.bf16.mxu1 %v5597_v17  ;;  %v794_v17 = vld [vmem:[%s7034_s5 + $0x540] sm:$0xff] }
  0x4f   :  { %v5691_v27 = vpack.c.bf16 %v800_v5, %v794_v17  ;;  %v808_v5 = vld [vmem:[%s7034_s5 + $0x5b0] sm:$0xff]  ;;  %v814_v17 = vld [vmem:[%s7034_s5 + $0x5e0] sm:$0xff] }
  0x51   :  { %3256 = vmatpush1.bf16.msra.mxu0 %v5619_v51  ;;  %3320 = vmatpush1.bf16.msra.mxu1 %v5621_v55  ;;  %7352 = vst [vmem:[#allocation63_spill] sm:$0xff] %v5691_v27  ;;  %v5700_v55 = vpack.c.bf16 %v813_v13, %v807_v9  ;;  %v5723_v13 = vpack.c.bf16 %v814_v17, %v808_v5 }
  0x52   :  { %3258 = vmatprep.subr.bf16.mxu0 %v5631_v60  ;;  %3322 = vmatprep.subr.bf16.mxu1 %v5633_v3  ;;  %v806_v3 = vld [vmem:[%s7034_s5 + $0x5a0] sm:$0xff] }
  0x53   :  { %7354 = vst [vmem:[#allocation65_spill] sm:$0xff] %v5700_v55  ;;  %7357 = vst [vmem:[#allocation68_spill] sm:$0xff] %v5723_v13 }
  0x55   :  { %3260 = vmatpush1.bf16.msra.mxu0 %v5655_v38  ;;  %3324 = vmatpush1.bf16.msra.mxu1 %v5657_v47  ;;  %v812_v47 = vld [vmem:[%s7034_s5 + $0x5d0] sm:$0xff] }
  0x56   :  { %3262 = vmatprep.subr.bf16.mxu0 %v5667_v44  ;;  %3326 = vmatprep.subr.bf16.mxu1 %v5669_v35  ;;  %v5721_v9 = vpack.c.bf16 %v812_v47, %v806_v3  ;;  %v636_v35 = vld [vmem:[%s7034_s5 + $0x50] sm:$0xff]  ;;  %v643_v3 = vld [vmem:[%s7034_s5 + $0x88] sm:$0xff]  ;;  %v649_v47 = vld [vmem:[%s7034_s5 + $0xb8] sm:$0xff] }
  0x57   :  { %v5743_v5 = vpack.c.bf16 %v636_v35, %v630_v25  ;;  %v5746_v17 = vpack.c.bf16 %v649_v47, %v643_v3  ;;  %v661_v35 = vld [vmem:[%s7034_s5 + $0x118] sm:$0xff]  ;;  %v7360_v25 = vmov 0.0   ;;  %v5764_v3 = vpack.c.bf16 %v648_v59, %v642_v56  ;;  %v667_v56 = vld [vmem:[%s7034_s5 + $0x148] sm:$0xff] }
  0x58   :  { %7356 = vst [vmem:[#allocation67_spill] sm:$0xff] %v5721_v9  ;;  %v673_v59 = vld [vmem:[%s7034_s5 + $0x178] sm:$0xff] }
  0x59   :  { %3264 = vmatpush1.bf16.msra.mxu0 %v5691_v27  ;;  %3328 = vmatpush1.bf16.msra.mxu1 %v5693_v36  ;;  %7359 = vst [vmem:[#allocation70_spill] sm:$0xff] %v5746_v17 }
  0x5a   :  { %3266 = vmatprep.subr.bf16.mxu0 %v5700_v55  ;;  %3330 = vmatprep.subr.bf16.mxu1 %v5702_v11  ;;  %v660_v11 = vld [vmem:[%s7034_s5 + $0x110] sm:$0xff] }
  0x5d   :  { %3268 = vmatpush1.bf16.msra.mxu0 %v5721_v9  ;;  %3332 = vmatpush1.bf16.msra.mxu1 %v5723_v13  ;;  %v655_v13 = vld [vmem:[%s7034_s5 + $0xe8] sm:$0xff] }
  0x5e   :  { %3334 = vmatprep.subr.bf16.mxu1 %v5727_v23  ;;  %3398 = vmatprep.subr.bf16.mxu0 %v5059_v24  ;;  %v5768_v47 = vpack.c.bf16 %v661_v35, %v655_v13  ;;  %v654_v24 = vld [vmem:[%s7034_s5 + $0xe0] sm:$0xff]  ;;  %v5788_v35 = vpack.c.bf16 %v673_v59, %v667_v56 }
  0x5f   :  { %v5785_v13 = vpack.c.bf16 %v660_v11, %v654_v24  ;;  %v685_v24 = vld [vmem:[%s7034_s5 + $0x1d8] sm:$0xff]  ;;  %v678_v59 = vld [vmem:[%s7034_s5 + $0x1a0] sm:$0xff] }
  0x60   :  { %885 = vmatmul.mubr.f32.vlgmr.msra.gmra.mrb[0].mxu0 %v7360_v25  ;;  %956 = vmatmul.mubr.f32.vlgmr.msra.gmra.mrb[28].mxu1 %v7360_v25 }
  0x61   :  { %3336 = vmatpush1.bf16.msra.mxu1 %v5743_v5  ;;  %1026 = vmatprep.mubr.f32.mxu1 %v7360_v25 }
  0x62   :  { %3338 = vmatprep.subr.bf16.mxu1 %v5746_v17  ;;  %3400 = vmatpush1.bf16.msra.mxu0 %v5150_v41  ;;  %v666_v41 = vld [vmem:[%s7034_s5 + $0x140] sm:$0xff]  ;;  %v672_v17 = vld [vmem:[%s7034_s5 + $0x170] sm:$0xff] }
  0x63   :  { %3402 = vmatprep.subr.bf16.mxu0 %v5160_v45  ;;  %v679_v45 = vld [vmem:[%s7034_s5 + $0x1a8] sm:$0xff]  ;;  %v5805_v11 = vpack.c.bf16 %v672_v17, %v666_v41  ;;  %v697_v41 = vld [vmem:[%s7034_s5 + $0x238] sm:$0xff] }
  0x64   :  { %v5808_v56 = vpack.c.bf16 %v685_v24, %v679_v45  ;;  %v690_v24 = vld [vmem:[%s7034_s5 + $0x200] sm:$0xff] }
  0x65   :  { %3340 = vmatpush1.bf16.msra.mxu1 %v5764_v3 }
  0x66   :  { %3342 = vmatprep.subr.bf16.mxu1 %v5768_v47  ;;  %3404 = vmatpush1.bf16.msra.mxu0 %v5188_v53  ;;  %v684_v53 = vld [vmem:[%s7034_s5 + $0x1d0] sm:$0xff] }
  0x67   :  { %3406 = vmatprep.subr.bf16.mxu0 %v5200_v57  ;;  %v691_v57 = vld [vmem:[%s7034_s5 + $0x208] sm:$0xff]  ;;  %v5825_v45 = vpack.c.bf16 %v684_v53, %v678_v59  ;;  %v709_v53 = vld [vmem:[%s7034_s5 + $0x298] sm:$0xff] }
  0x68   :  { %v5828_v17 = vpack.c.bf16 %v697_v41, %v691_v57  ;;  %v702_v41 = vld [vmem:[%s7034_s5 + $0x260] sm:$0xff] }
  0x69   :  { %3344 = vmatpush1.bf16.msra.mxu1 %v5785_v13 }
  0x6a   :  { %3346 = vmatprep.subr.bf16.mxu1 %v5788_v35  ;;  %3408 = vmatpush1.bf16.msra.mxu0 %v5231_v1  ;;  %v696_v1 = vld [vmem:[%s7034_s5 + $0x230] sm:$0xff] }
  0x6b   :  { %3410 = vmatprep.subr.bf16.mxu0 %v5243_v6  ;;  %v703_v6 = vld [vmem:[%s7034_s5 + $0x268] sm:$0xff]  ;;  %v5845_v57 = vpack.c.bf16 %v696_v1, %v690_v24  ;;  %v721_v1 = vld [vmem:[%s7034_s5 + $0x2f8] sm:$0xff] }
  0x6c   :  { %v5848_v59 = vpack.c.bf16 %v709_v53, %v703_v6  ;;  %v714_v53 = vld [vmem:[%s7034_s5 + $0x2c0] sm:$0xff] }
  0x6d   :  { %3348 = vmatpush1.bf16.msra.mxu1 %v5805_v11 }
  0x6e   :  { %3350 = vmatprep.subr.bf16.mxu1 %v5808_v56  ;;  %3412 = vmatpush1.bf16.msra.mxu0 %v5274_v15  ;;  %v708_v15 = vld [vmem:[%s7034_s5 + $0x290] sm:$0xff] }
  0x6f   :  { %3414 = vmatprep.subr.bf16.mxu0 %v5286_v19  ;;  %v715_v19 = vld [vmem:[%s7034_s5 + $0x2c8] sm:$0xff]  ;;  %v5865_v6 = vpack.c.bf16 %v708_v15, %v702_v41  ;;  %v733_v15 = vld [vmem:[%s7034_s5 + $0x358] sm:$0xff] }
  0x70   :  { %v5868_v24 = vpack.c.bf16 %v721_v1, %v715_v19  ;;  %v726_v1 = vld [vmem:[%s7034_s5 + $0x320] sm:$0xff] }
  0x71   :  { %3352 = vmatpush1.bf16.msra.mxu1 %v5825_v45 }
  0x72   :  { %3354 = vmatprep.subr.bf16.mxu1 %v5828_v17  ;;  %3416 = vmatpush1.bf16.msra.mxu0 %v5317_v33  ;;  %v720_v33 = vld [vmem:[%s7034_s5 + $0x2f0] sm:$0xff] }
  0x73   :  { %3418 = vmatprep.subr.bf16.mxu0 %v5329_v30  ;;  %v727_v30 = vld [vmem:[%s7034_s5 + $0x328] sm:$0xff]  ;;  %v5885_v19 = vpack.c.bf16 %v720_v33, %v714_v53  ;;  %v745_v33 = vld [vmem:[%s7034_s5 + $0x3b8] sm:$0xff] }
  0x74   :  { %v5888_v41 = vpack.c.bf16 %v733_v15, %v727_v30  ;;  %v738_v15 = vld [vmem:[%s7034_s5 + $0x380] sm:$0xff] }
  0x75   :  { %3356 = vmatpush1.bf16.msra.mxu1 %v5845_v57 }
  0x76   :  { %3358 = vmatprep.subr.bf16.mxu1 %v5848_v59  ;;  %3420 = vmatpush1.bf16.msra.mxu0 %v5357_v48  ;;  %v732_v48 = vld [vmem:[%s7034_s5 + $0x350] sm:$0xff] }
  0x77   :  { %3422 = vmatprep.subr.bf16.mxu0 %v5369_v31  ;;  %v739_v31 = vld [vmem:[%s7034_s5 + $0x388] sm:$0xff]  ;;  %v5905_v30 = vpack.c.bf16 %v732_v48, %v726_v1  ;;  %v757_v48 = vld [vmem:[%s7034_s5 + $0x418] sm:$0xff] }
  0x78   :  { %v5908_v53 = vpack.c.bf16 %v745_v33, %v739_v31  ;;  %v750_v33 = vld [vmem:[%s7034_s5 + $0x3e0] sm:$0xff] }
  0x79   :  { %3360 = vmatpush1.bf16.msra.mxu1 %v5865_v6 }
  0x7a   :  { %3362 = vmatprep.subr.bf16.mxu1 %v5868_v24  ;;  %3424 = vmatpush1.bf16.msra.mxu0 %v5396_v63  ;;  %v744_v63 = vld [vmem:[%s7034_s5 + $0x3b0] sm:$0xff] }
  0x7b   :  { %3426 = vmatprep.subr.bf16.mxu0 %v5408_v32  ;;  %v751_v32 = vld [vmem:[%s7034_s5 + $0x3e8] sm:$0xff]  ;;  %v5925_v31 = vpack.c.bf16 %v744_v63, %v738_v15  ;;  %v769_v63 = vld [vmem:[%s7034_s5 + $0x478] sm:$0xff] }
  0x7c   :  { %v5928_v1 = vpack.c.bf16 %v757_v48, %v751_v32  ;;  %v762_v48 = vld [vmem:[%s7034_s5 + $0x440] sm:$0xff] }
  0x7d   :  { %3364 = vmatpush1.bf16.msra.mxu1 %v5885_v19 }
  0x7e   :  { %3366 = vmatprep.subr.bf16.mxu1 %v5888_v41  ;;  %3428 = vmatpush1.bf16.msra.mxu0 %v5435_v18  ;;  %v756_v18 = vld [vmem:[%s7034_s5 + $0x410] sm:$0xff] }
  0x7f   :  { %3430 = vmatprep.subr.bf16.mxu0 %v5447_v12  ;;  %v763_v12 = vld [vmem:[%s7034_s5 + $0x448] sm:$0xff]  ;;  %v5945_v32 = vpack.c.bf16 %v756_v18, %v750_v33  ;;  %v781_v18 = vld [vmem:[%s7034_s5 + $0x4d8] sm:$0xff] }
  0x80   :  { %v5948_v15 = vpack.c.bf16 %v769_v63, %v763_v12  ;;  %v774_v63 = vld [vmem:[%s7034_s5 + $0x4a0] sm:$0xff] }
  0x81   :  { %3368 = vmatpush1.bf16.msra.mxu1 %v5905_v30 }
  0x82   :  { %3370 = vmatprep.subr.bf16.mxu1 %v5908_v53  ;;  %3432 = vmatpush1.bf16.msra.mxu0 %v5474_v40  ;;  %7361 = vst [vmem:[#allocation71_spill] sm:$0xff] %v5948_v15  ;;  %v768_v40 = vld [vmem:[%s7034_s5 + $0x470] sm:$0xff] }
  0x83   :  { %3434 = vmatprep.subr.bf16.mxu0 %v5486_v21  ;;  %v775_v21 = vld [vmem:[%s7034_s5 + $0x4a8] sm:$0xff]  ;;  %v5965_v12 = vpack.c.bf16 %v768_v40, %v762_v48  ;;  %v793_v40 = vld [vmem:[%s7034_s5 + $0x538] sm:$0xff] }
  0x84   :  { %v5968_v33 = vpack.c.bf16 %v781_v18, %v775_v21  ;;  %v786_v18 = vld [vmem:[%s7034_s5 + $0x500] sm:$0xff] }
  0x85   :  { %3372 = vmatpush1.bf16.msra.mxu1 %v5925_v31  ;;  %7362 = vst [vmem:[#allocation72_spill] sm:$0xff] %v5965_v12 }
  0x86   :  { %3374 = vmatprep.subr.bf16.mxu1 %v5928_v1  ;;  %3436 = vmatpush1.bf16.msra.mxu0 %v5511_v62  ;;  %7363 = vst [vmem:[#allocation73_spill] sm:$0xff] %v5968_v33  ;;  %v780_v62 = vld [vmem:[%s7034_s5 + $0x4d0] sm:$0xff] }
  0x87   :  { %3438 = vmatprep.subr.bf16.mxu0 %v5523_v10  ;;  %v787_v10 = vld [vmem:[%s7034_s5 + $0x508] sm:$0xff]  ;;  %v5985_v21 = vpack.c.bf16 %v780_v62, %v774_v63  ;;  %v805_v62 = vld [vmem:[%s7034_s5 + $0x598] sm:$0xff] }
  0x88   :  { %v5988_v48 = vpack.c.bf16 %v793_v40, %v787_v10  ;;  %v798_v40 = vld [vmem:[%s7034_s5 + $0x560] sm:$0xff] }
  0x89   :  { %3376 = vmatpush1.bf16.msra.mxu1 %v5945_v32  ;;  %7364 = vst [vmem:[#allocation74_spill] sm:$0xff] %v5985_v21 }
  0x8a   :  { %3378 = vmatprep.subr.bf16.mxu1 %v5948_v15  ;;  %3440 = vmatpush1.bf16.msra.mxu0 %v5547_v28  ;;  %7365 = vst [vmem:[#allocation75_spill] sm:$0xff] %v5988_v48  ;;  %v792_v28 = vld [vmem:[%s7034_s5 + $0x530] sm:$0xff] }
  0x8b   :  { %3442 = vmatprep.subr.bf16.mxu0 %v5559_v39  ;;  %v799_v39 = vld [vmem:[%s7034_s5 + $0x568] sm:$0xff]  ;;  %v6005_v10 = vpack.c.bf16 %v792_v28, %v786_v18  ;;  %v817_v28 = vld [vmem:[%s7034_s5 + $0x5f8] sm:$0xff] }
  0x8c   :  { %v6008_v63 = vpack.c.bf16 %v805_v62, %v799_v39  ;;  %v810_v62 = vld [vmem:[%s7034_s5 + $0x5c0] sm:$0xff] }
  0x8d   :  { %3380 = vmatpush1.bf16.msra.mxu1 %v5965_v12  ;;  %7366 = vst [vmem:[#allocation76_spill] sm:$0xff] %v6005_v10 }
  0x8e   :  { %3382 = vmatprep.subr.bf16.mxu1 %v5968_v33  ;;  %3444 = vmatpush1.bf16.msra.mxu0 %v5583_v61  ;;  %7367 = vst [vmem:[#allocation77_spill] sm:$0xff] %v6008_v63  ;;  %v804_v61 = vld [vmem:[%s7034_s5 + $0x590] sm:$0xff] }
  0x8f   :  { %3446 = vmatprep.subr.bf16.mxu0 %v5595_v14  ;;  %v811_v14 = vld [vmem:[%s7034_s5 + $0x5c8] sm:$0xff]  ;;  %v6025_v39 = vpack.c.bf16 %v804_v61, %v798_v40  ;;  %v7374_v40 = vld [vmem:[#allocation52_spill] sm:$0xff] }
  0x90   :  { %v6028_v18 = vpack.c.bf16 %v817_v28, %v811_v14  ;;  %v7371_v14 = vld [vmem:[#allocation46_spill] sm:$0xff] }
  0x91   :  { %3384 = vmatpush1.bf16.msra.mxu1 %v5985_v21  ;;  %7368 = vst [vmem:[#allocation78_spill] sm:$0xff] %v6025_v39  ;;  %v7375_v28 = vld [vmem:[#allocation54_spill] sm:$0xff] }
  0x92   :  { %3386 = vmatprep.subr.bf16.mxu1 %v5988_v48  ;;  %3448 = vmatpush1.bf16.msra.mxu0 %v5619_v51  ;;  %7369 = vst [vmem:[#allocation79_spill] sm:$0xff] %v6028_v18  ;;  %v816_v51 = vld [vmem:[%s7034_s5 + $0x5f0] sm:$0xff] }
  0x93   :  { %3450 = vmatprep.subr.bf16.mxu0 %v5631_v60  ;;  %v6039_v61 = vpack.c.bf16 %v816_v51, %v810_v62  ;;  %v7372_v51 = vld [vmem:[#allocation48_spill] sm:$0xff]  ;;  %v7380_v60 = vld [vmem:[#allocation66_spill] sm:$0xff] }
  0x94   :  { %v7376_v62 = vld [vmem:[#allocation56_spill] sm:$0xff] }
  0x95   :  { %3388 = vmatpush1.bf16.msra.mxu1 %v6005_v10  ;;  %7370 = vst [vmem:[#allocation80_spill] sm:$0xff] %v6039_v61 }
  0x96   :  { %3390 = vmatprep.subr.bf16.mxu1 %v6008_v63  ;;  %3452 = vmatpush1.bf16.msra.mxu0 %v5655_v38 }
  0x97   :  { %3454 = vmatprep.subr.bf16.mxu0 %v5667_v44  ;;  %v7379_v44 = vld [vmem:[#allocation62_spill] sm:$0xff] }
  0x99   :  { %3392 = vmatpush1.bf16.msra.mxu1 %v6025_v39  ;;  %v7383_v39 = vld [vmem:[#allocation68_spill] sm:$0xff] }
  0x9a   :  { %3394 = vmatprep.subr.bf16.mxu1 %v6028_v18  ;;  %3456 = vmatpush1.bf16.msra.mxu0 %v5691_v27  ;;  %v47_v27 = vlaneseq }
  0x9b   :  { %3458 = vmatprep.subr.bf16.mxu0 %v5700_v55  ;;  %v7378_v55 = vld [vmem:[#allocation60_spill] sm:$0xff] }
  0x9c   :  { %v6078_v38 = vshrl.u32 %v47_v27, 7 }
  0x9d   :  { %3396 = vmatpush1.bf16.msra.mxu1 %v6039_v61 }
  0x9e   :  { %3462 = vmatprep.subr.bf16.mxu1 %v5079_v29  ;;  %3460 = vmatpush1.bf16.msra.mxu0 %v5721_v9  ;;  %v7377_v9 = vld [vmem:[#allocation58_spill] sm:$0xff]  ;;  %v57_v18 = vsub.s32 2, %v6078_v38 }
  0x9f   :  { %3526 = vmatprep.subr.bf16.mxu0 %v5727_v23 }
  0xa0   :  { %1027 = vmatmul.mubr.f32.vlgmr.msra.gmra.mrb[30].mxu1 %v7360_v25  ;;  %v7373_v25 = vld [vmem:[#allocation50_spill] sm:$0xff] }
  0xa1   :  { %3464 = vmatpush1.bf16.msra.mxu1 %v5152_v42 }
  0xa2   :  { %3466 = vmatprep.subr.bf16.mxu1 %v5162_v46 }
  0xa5   :  { %3468 = vmatpush1.bf16.msra.mxu1 %v5190_v54 }
  0xa6   :  { %3470 = vmatprep.subr.bf16.mxu1 %v5202_v58 }
  0xa9   :  { %3472 = vmatpush1.bf16.msra.mxu1 %v5233_v2 }
  0xaa   :  { %3474 = vmatprep.subr.bf16.mxu1 %v5245_v7 }
  0xad   :  { %3476 = vmatpush1.bf16.msra.mxu1 %v5276_v16 }
  0xae   :  { %3478 = vmatprep.subr.bf16.mxu1 %v5288_v20 }
  0xb1   :  { %3480 = vmatpush1.bf16.msra.mxu1 %v5319_v34 }
  0xb2   :  { %3482 = vmatprep.subr.bf16.mxu1 %v5331_v37 }
  0xb5   :  { %3484 = vmatpush1.bf16.msra.mxu1 %v5359_v49 }
  0xb6   :  { %3486 = vmatprep.subr.bf16.mxu1 %v5371_v52 }
  0xb9   :  { %3488 = vmatpush1.bf16.msra.mxu1 %v5398_v0 }
  0xba   :  { %3490 = vmatprep.subr.bf16.mxu1 %v5410_v8 }
  0xbd   :  { %3492 = vmatpush1.bf16.msra.mxu1 %v5437_v22 }
  0xbe   :  { %3494 = vmatprep.subr.bf16.mxu1 %v5449_v26 }
  0xc1   :  { %3496 = vmatpush1.bf16.msra.mxu1 %v5476_v43 }
  0xc2   :  { %3498 = vmatprep.subr.bf16.mxu1 %v5488_v50 }
  0xc5   :  { %3500 = vmatpush1.bf16.msra.mxu1 %v5513_v4 }
  0xc6   :  { %3502 = vmatprep.subr.bf16.mxu1 %v7371_v14 }
  0xc9   :  { %3504 = vmatpush1.bf16.msra.mxu1 %v7372_v51 }
  0xca   :  { %3506 = vmatprep.subr.bf16.mxu1 %v7373_v25 }
  0xcd   :  { %3508 = vmatpush1.bf16.msra.mxu1 %v7374_v40 }
  0xce   :  { %3510 = vmatprep.subr.bf16.mxu1 %v7375_v28 }
  0xd1   :  { %3512 = vmatpush1.bf16.msra.mxu1 %v7376_v62 }
  0xd2   :  { %3514 = vmatprep.subr.bf16.mxu1 %v7377_v9 }
  0xd5   :  { %3516 = vmatpush1.bf16.msra.mxu1 %v7378_v55 }
  0xd6   :  { %3518 = vmatprep.subr.bf16.mxu1 %v7379_v44  ;;  %v6091_v44 = vld [vmem:[%s7035_s3] sm:$0x7] }
  0xd9   :  { %3520 = vmatpush1.bf16.msra.mxu1 %v5693_v36 }
  0xda   :  { %3522 = vmatprep.subr.bf16.mxu1 %v7380_v60  ;;  %v6098_v60 = vrot.slane %v6091_v44, %v57_v18 }
  0xdb   :  { %v6081_v23 = vpop.f32.mrb[0].mxu1 }
  0xdc   :  { %7381 = vst [vmem:[#allocation81_spill] sm:$0xff] %v6081_v23  ;;  %v6083_v61 = vpop.f32.mrb[1].mxu1 }
  0xdd   :  { %7382 = vst [vmem:[#allocation82_spill] sm:$0xff] %v6083_v61  ;;  %3524 = vmatpush1.bf16.msra.mxu1 %v7383_v39 }
  0xde   :  { %3654 = vmatprep.subr.bf16.mxu1 %v5079_v29 }
  0xdf   :  { %v6093_v36 = vpop.f32.mrb[2].mxu1 }
  0xe0   :  { %7384 = vst [vmem:[#allocation83_spill] sm:$0xff] %v6093_v36  ;;  %v6095_v27 = vpop.f32.mrb[3].mxu1 }
  0xe1   :  { %7385 = vst [vmem:[#allocation84_spill] sm:$0xff] %v6095_v27 }
  0xe3   :  { %v3163_v23 = vpop.f32.mrb[4].mxu1 }
  0xe4   :  { %v6101_v61 = vadd.f32 %v3163_v23, %v6098_v60  ;;  %v6103_v55 = vpop.f32.mrb[5].mxu1  ;;  %v343_v23 = vld [vmem:[%s7036_s4] sm:$0x7] }
  0xe6   :  { %7386 = vst [vmem:[#allocation85_spill] sm:$0xff] %v6101_v61  ;;  %v49_v61 = vsub.s32 0, %v6078_v38 }
  0xe7   :  { %v3166_v39 = vpop.f32.mrb[6].mxu1 }
  0xe8   :  { %v6106_v29 = vadd.f32 %v3166_v39, %v6098_v60  ;;  %v276_v63 = vpop.f32.mrb[7].mxu1  ;;  %v53_v39 = vsub.s32 1, %v6078_v38  ;;  %v348_v48 = vrot.slane %v343_v23, %v49_v61 }
  0xe9   :  { %v6109_v10 = vadd.f32 %v276_v63, %v6098_v60 }
  0xea   :  { %7387 = vst [vmem:[#allocation86_spill] sm:$0xff] %v6106_v29 }
  0xeb   :  { %7388 = vst [vmem:[#allocation87_spill] sm:$0xff] %v6109_v10  ;;  %v3169_v36 = vpop.f32.mrb[8].mxu1 }
  0xec   :  { %v6112_v27 = vadd.f32 %v3169_v36, %v6098_v60  ;;  %v286_v9 = vpop.f32.mrb[9].mxu1  ;;  %v6125_v36 = vrot.slane %v343_v23, %v57_v18 }
  0xed   :  { %v6115_v62 = vadd.f32 %v286_v9, %v6098_v60  ;;  %v6130_v9 = vrot.slane %v343_v23, %v53_v39 }
  0xee   :  { %7389 = vst [vmem:[#allocation88_spill] sm:$0xff] %v6112_v27 }
  0xef   :  { %7390 = vst [vmem:[#allocation89_spill] sm:$0xff] %v6115_v62  ;;  %v3172_v29 = vpop.f32.mrb[10].mxu1 }
  0xf0   :  { %v6123_v63 = vadd.f32 %v3172_v29, %v6098_v60  ;;  %v296_v10 = vpop.f32.mrb[11].mxu1 }
  0xf1   :  { %v6128_v27 = vadd.f32 %v296_v10, %v6098_v60 }
  0xf2   :  { %7391 = vst [vmem:[#allocation90_spill] sm:$0xff] %v6123_v63 }
  0xf3   :  { %7392 = vst [vmem:[#allocation91_spill] sm:$0xff] %v6128_v27  ;;  %v450_v62 = vpop.f32.mrb[12].mxu1  ;;  %v3179_v21 = vpop.f32.mrb[12].mxu0 }
  0xf4   :  { %v6132_v28 = vadd.f32 %v450_v62, %v348_v48  ;;  %v452_v40 = vpop.f32.mrb[13].mxu1  ;;  %v6135_v38 = vadd.f32 %v3179_v21, %v6125_v36  ;;  %v563_v33 = vpop.f32.mrb[13].mxu0 }
  0xf5   :  { %v6138_v29 = vadd.f32 %v452_v40, %v6130_v9  ;;  %v6141_v18 = vadd.f32 %v563_v33, %v6125_v36 }
  0xf6   :  { %7393 = vst [vmem:[#allocation92_spill] sm:$0xff] %v6132_v28  ;;  %7394 = vst [vmem:[#allocation93_spill] sm:$0xff] %v6135_v38 }
  0xf7   :  { %7395 = vst [vmem:[#allocation94_spill] sm:$0xff] %v6138_v29  ;;  %7396 = vst [vmem:[#allocation95_spill] sm:$0xff] %v6141_v18  ;;  %v456_v63 = vpop.f32.mrb[14].mxu1  ;;  %v3182_v10 = vpop.f32.mrb[14].mxu0 }
  0xf8   :  { %v6143_v27 = vadd.f32 %v456_v63, %v348_v48  ;;  %v458_v23 = vpop.f32.mrb[15].mxu1  ;;  %v6146_v12 = vadd.f32 %v3182_v10, %v6125_v36  ;;  %v573_v62 = vpop.f32.mrb[15].mxu0 }
  0xf9   :  { %v6149_v28 = vadd.f32 %v458_v23, %v6130_v9  ;;  %v6152_v21 = vadd.f32 %v573_v62, %v6125_v36 }
  0xfa   :  { %7397 = vst [vmem:[#allocation96_spill] sm:$0xff] %v6143_v27  ;;  %7398 = vst [vmem:[#allocation97_spill] sm:$0xff] %v6146_v12 }
  0xfb   :  { %7399 = vst [vmem:[#allocation98_spill] sm:$0xff] %v6149_v28  ;;  %7400 = vst [vmem:[#allocation99_spill] sm:$0xff] %v6152_v21  ;;  %v462_v40 = vpop.f32.mrb[16].mxu1  ;;  %v3185_v29 = vpop.f32.mrb[16].mxu0 }
  0xfc   :  { %v6154_v38 = vadd.f32 %v462_v40, %v348_v48  ;;  %v464_v33 = vpop.f32.mrb[17].mxu1  ;;  %v6157_v18 = vadd.f32 %v3185_v29, %v6125_v36  ;;  %v583_v63 = vpop.f32.mrb[17].mxu0 }
  0xfd   :  { %v6160_v27 = vadd.f32 %v464_v33, %v6130_v9  ;;  %v6163_v10 = vadd.f32 %v583_v63, %v6125_v36 }
  0xfe   :  { %7401 = vst [vmem:[#allocation100_spill] sm:$0xff] %v6154_v38  ;;  %7402 = vst [vmem:[#allocation101_spill] sm:$0xff] %v6157_v18 }
  0xff   :  { %7403 = vst [vmem:[#allocation102_spill] sm:$0xff] %v6160_v27  ;;  %7404 = vst [vmem:[#allocation103_spill] sm:$0xff] %v6163_v10  ;;  %v468_v23 = vpop.f32.mrb[18].mxu1  ;;  %v6165_v28 = vpop.f32.mrb[18].mxu0 }
 0x100   :  { %v6167_v62 = vadd.f32 %v468_v23, %v348_v48  ;;  %v470_v21 = vpop.f32.mrb[19].mxu1  ;;  %v593_v12 = vpop.f32.mrb[19].mxu0 }
 0x101   :  { %v6170_v40 = vadd.f32 %v470_v21, %v6130_v9  ;;  %v6173_v29 = vadd.f32 %v593_v12, %v6125_v36 }
 0x102   :  { %7405 = vst [vmem:[#allocation104_spill] sm:$0xff] %v6167_v62 }
 0x103   :  { %7406 = vst [vmem:[#allocation105_spill] sm:$0xff] %v6170_v40  ;;  %7407 = vst [vmem:[#allocation106_spill] sm:$0xff] %v6173_v29  ;;  %v474_v38 = vpop.f32.mrb[20].mxu1  ;;  %v6191_v29 = vrot.slane %v6091_v44, %v49_v61 }
 0x104   :  { %v6175_v18 = vadd.f32 %v474_v38, %v348_v48  ;;  %v476_v33 = vpop.f32.mrb[21].mxu1 }
 0x105   :  { %v6178_v63 = vadd.f32 %v476_v33, %v6130_v9  ;;  %7414 = vst [vmem:[#allocation113_spill] sm:$0xff] %v6191_v29 }
 0x106   :  { %7408 = vst [vmem:[#allocation107_spill] sm:$0xff] %v6175_v18 }
 0x107   :  { %7409 = vst [vmem:[#allocation108_spill] sm:$0xff] %v6178_v63  ;;  %v480_v27 = vpop.f32.mrb[22].mxu1 }
 0x108   :  { %v6180_v10 = vadd.f32 %v480_v27, %v348_v48  ;;  %v482_v23 = vpop.f32.mrb[23].mxu1 }
 0x109   :  { %v6183_v62 = vadd.f32 %v482_v23, %v6130_v9 }
 0x10a   :  { %7410 = vst [vmem:[#allocation109_spill] sm:$0xff] %v6180_v10 }
 0x10b   :  { %7411 = vst [vmem:[#allocation110_spill] sm:$0xff] %v6183_v62  ;;  %v486_v25 = vpop.f32.mrb[24].mxu1  ;;  %v6195_v62 = vrot.slane %v6091_v44, %v53_v39 }
 0x10c   :  { %v6185_v21 = vadd.f32 %v486_v25, %v348_v48  ;;  %v488_v40 = vpop.f32.mrb[25].mxu1 }
 0x10d   :  { %v6188_v12 = vadd.f32 %v488_v40, %v6130_v9  ;;  %7415 = vst [vmem:[#allocation114_spill] sm:$0xff] %v6195_v62 }
 0x10e   :  { %7412 = vst [vmem:[#allocation111_spill] sm:$0xff] %v6185_v21 }
 0x10f   :  { %7413 = vst [vmem:[#allocation112_spill] sm:$0xff] %v6188_v12  ;;  %v492_v38 = vpop.f32.mrb[26].mxu1 }
 0x110   :  { %v494_v18 = vpop.f32.mrb[27].mxu1  ;;  %v493_v33 = vadd.f32 %v492_v38, %v348_v48 }
 0x133   :  { %v886_v63 = vpop.f32.mrb[0].mxu0  ;;  %v957_v27 = vpop.f32.mrb[28].mxu1 }
 0x134   :  { %v4743_v10 = vadd.f32 %v886_v63, %v6191_v29  ;;  %v888_v51 = vpop.f32.mrb[1].mxu0  ;;  %v959_v23 = vpop.f32.mrb[29].mxu1  ;;  %v6201_v63 = vld [vmem:[%s7037_s6] ss:$0 sm:$0xff] }
 0x135   :  { %v1073_v25 = vadd.f32 %v959_v23, %v493_v33  ;;  %v4744_v40 = vadd.f32 %v888_v51, %v6195_v62  ;;  %v1065_v44 = vadd.f32 %v6201_v63, %v957_v27 }
 0x136   :  { %v3095_v21 = vmul.f32 -1.442695, %v4743_v10  ;;  %v267_v10 = vadd.f32 %v6103_v55, %v6098_v60  ;;  %v495_v60 = vadd.f32 %v494_v18, %v6130_v9 }
 0x137   :  { %v3096_v12 = vmul.f32 -1.442695, %v4744_v40 }
 0x138   :  { %4776 = vpow2.f32 %v3095_v21 }
 0x139   :  { %4778 = vpow2.f32 %v3096_v12  ;;  %v3098_v12 = vmul.f32 -1.442695, %v1073_v25  ;;  %v6216_v25 = vld [vmem:[%s7039_s7] ss:$0 sm:$0xff] }
 0x142   :  { %v4777_v15 = vpop.eup %4776 }
 0x143   :  { %v1053_v61 = vadd.f32 1.0, %v4777_v15  ;;  %v4779_v48 = vpop.eup %4778 }
 0x144   :  { %v1054_v38 = vadd.f32 1.0, %v4779_v48 }
 0x145   :  { %4780 = vrcp.f32 %v1053_v61 }
 0x146   :  { %4782 = vrcp.f32 %v1054_v38 }
 0x14f   :  { %v4781_v39 = vpop.eup %4780 }
 0x150   :  { %v1066_v51 = vmul.f32 %v4781_v39, %v1065_v44  ;;  %v4783_v15 = vpop.eup %4782 }
 0x151   :  { %v1069_v33 = vsub.f32 1.0, %v4783_v15  ;;  %v1071_v61 = vmul.f32 0.0, %v4783_v15 }
 0x152   :  { %v1067_v21 = vadd.f32 %v1066_v51, %v267_v10 }
 0x154   :  { %4784 = vtanh.f32 %v1067_v21  ;;  %v599_v21 = vadd.f32 %v6165_v28, %v6125_v36  ;;  %v7417_v28 = vld [vmem:[#allocation70_spill] sm:$0xff]  ;;  %v7418_v36 = vld [vmem:[#allocation71_spill] sm:$0xff] }
 0x155   :  { %4786 = vpow2.f32 %v3098_v12 }
 0x15e   :  { %v4785_v23 = vpop.eup %4784 }
 0x15f   :  { %v1070_v40 = vmul.f32 %v4785_v23, %v1069_v33  ;;  %v4787_v27 = vpop.eup %4786 }
 0x160   :  { %v1081_v55 = vadd.f32 1.0, %v4787_v27 }
 0x161   :  { %v6206_v62 = vadd.f32 %v1071_v61, %v1070_v40 }
 0x162   :  { %4788 = vrcp.f32 %v1081_v55 }
 0x163   :  { %1101 = vst [vmem:[%s7038_s8] sm:$0xff] %v6206_v62 }
 0x16c   :  { %v4789_v10 = vpop.eup %4788 }
 0x173   :  { %v1028_v48 = vpop.f32.mrb[30].mxu1 }
 0x174   :  { %v1074_v38 = vadd.f32 %v1028_v48, %v495_v60  ;;  %v1030_v44 = vpop.f32.mrb[31].mxu1  ;;  %v7419_v60 = vld [vmem:[#allocation48_spill] sm:$0xff]  ;;  %v7420_v48 = vld [vmem:[#allocation50_spill] sm:$0xff] }
 0x175   :  { %v1093_v39 = vadd.f32 %v6216_v25, %v1030_v44  ;;  %v7422_v44 = vld [vmem:[#allocation73_spill] sm:$0xff] }
 0x176   :  { %v3099_v51 = vmul.f32 -1.442695, %v1074_v38  ;;  %v7421_v38 = vld [vmem:[#allocation72_spill] sm:$0xff] }
 0x177   :  { %v1094_v12 = vmul.f32 %v4789_v10, %v1093_v39  ;;  %v7423_v39 = vld [vmem:[#allocation52_spill] sm:$0xff]  ;;  %v7424_v10 = vld [vmem:[#allocation54_spill] sm:$0xff] }
 0x178   :  { %4790 = vpow2.f32 %v3099_v51  ;;  %v7425_v51 = vld [vmem:[#allocation74_spill] sm:$0xff] }
 0x179   :  { %v1095_v15 = vadd.f32 %v1094_v12, %v599_v21  ;;  %v7426_v21 = vld [vmem:[#allocation75_spill] sm:$0xff]  ;;  %v7427_v12 = vld [vmem:[#allocation56_spill] sm:$0xff] }
 0x182   :  { %v4791_v33 = vpop.eup %4790 }
 0x183   :  { %v1082_v9 = vadd.f32 1.0, %v4791_v33  ;;  %v7429_v33 = vld [vmem:[#allocation76_spill] sm:$0xff] }
 0x185   :  { %4792 = vrcp.f32 %v1082_v9  ;;  %v7430_v9 = vld [vmem:[#allocation77_spill] sm:$0xff] }
 0x186   :  { %4794 = vtanh.f32 %v1095_v15  ;;  %v7428_v15 = vld [vmem:[#allocation58_spill] sm:$0xff] }
 0x18f   :  { %v4793_v18 = vpop.eup %4792 }
 0x190   :  { %v1097_v23 = vsub.f32 1.0, %v4793_v18  ;;  %v4795_v40 = vpop.eup %4794  ;;  %v1099_v27 = vmul.f32 0.0, %v4793_v18  ;;  %v7431_v18 = vld [vmem:[#allocation60_spill] sm:$0xff] }
 0x192   :  { %v1098_v61 = vmul.f32 %v4795_v40, %v1097_v23  ;;  %v7432_v23 = vld [vmem:[#allocation62_spill] sm:$0xff] }
 0x193   :  { %v7433_v40 = vld [vmem:[#allocation78_spill] sm:$0xff] }
 0x194   :  { %v6221_v55 = vadd.f32 %v1099_v27, %v1098_v61  ;;  %v7434_v61 = vld [vmem:[#allocation79_spill] sm:$0xff]  ;;  %v7435_v27 = vld [vmem:[#allocation64_spill] sm:$0xff] }
 0x196   :  { %7416 = vst [vmem:[#allocation115_spill] sm:$0xff] %v6221_v55  ;;  %1168 = vmatprep.mubr.f32.mxu0 %v6221_v55  ;;  %1239 = vmatprep.mubr.f32.mxu1 %v6221_v55 }
 0x197   :  { %1169 = vmatmul.mubr.f32.vlgmr.msra.gmra.mrb[2].mxu0 %v6206_v62  ;;  %1240 = vmatmul.mubr.f32.vlgmr.msra.gmra.mrb[32].mxu1 %v6206_v62 }
 0x198   :  { %3528 = vmatpush1.bf16.msra.mxu0 %v5743_v5  ;;  %1310 = vmatprep.mubr.f32.mxu0 %v6221_v55 }
 0x199   :  { %3530 = vmatprep.subr.bf16.mxu0 %v7417_v28  ;;  %3656 = vmatpush1.bf16.msra.mxu1 %v5152_v42  ;;  %v7466_v42 = vld [vmem:[#allocation57_spill] sm:$0xff] }
 0x19a   :  { %3658 = vmatprep.subr.bf16.mxu1 %v5162_v46  ;;  %v7465_v46 = vld [vmem:[#allocation55_spill] sm:$0xff] }
 0x19c   :  { %3532 = vmatpush1.bf16.msra.mxu0 %v5764_v3 }
 0x19d   :  { %3534 = vmatprep.subr.bf16.mxu0 %v5768_v47  ;;  %3660 = vmatpush1.bf16.msra.mxu1 %v5190_v54  ;;  %v7464_v54 = vld [vmem:[#allocation53_spill] sm:$0xff] }
 0x19e   :  { %3662 = vmatprep.subr.bf16.mxu1 %v5202_v58  ;;  %v7463_v58 = vld [vmem:[#allocation51_spill] sm:$0xff] }
 0x1a0   :  { %3536 = vmatpush1.bf16.msra.mxu0 %v5785_v13 }
 0x1a1   :  { %3538 = vmatprep.subr.bf16.mxu0 %v5788_v35  ;;  %3664 = vmatpush1.bf16.msra.mxu1 %v5233_v2  ;;  %v7462_v2 = vld [vmem:[#allocation49_spill] sm:$0xff] }
 0x1a2   :  { %3666 = vmatprep.subr.bf16.mxu1 %v5245_v7  ;;  %v7461_v7 = vld [vmem:[#allocation47_spill] sm:$0xff] }
 0x1a4   :  { %3540 = vmatpush1.bf16.msra.mxu0 %v5805_v11 }
 0x1a5   :  { %3542 = vmatprep.subr.bf16.mxu0 %v5808_v56  ;;  %3668 = vmatpush1.bf16.msra.mxu1 %v5276_v16  ;;  %v7460_v16 = vld [vmem:[#allocation45_spill] sm:$0xff] }
 0x1a6   :  { %3670 = vmatprep.subr.bf16.mxu1 %v5288_v20  ;;  %v7459_v20 = vld [vmem:[#allocation43_spill] sm:$0xff] }
 0x1a8   :  { %3544 = vmatpush1.bf16.msra.mxu0 %v5825_v45 }
 0x1a9   :  { %3546 = vmatprep.subr.bf16.mxu0 %v5828_v17  ;;  %3672 = vmatpush1.bf16.msra.mxu1 %v5319_v34  ;;  %v7458_v34 = vld [vmem:[#allocation41_spill] sm:$0xff] }
 0x1aa   :  { %3674 = vmatprep.subr.bf16.mxu1 %v5331_v37  ;;  %v7457_v37 = vld [vmem:[#allocation39_spill] sm:$0xff] }
 0x1ac   :  { %3548 = vmatpush1.bf16.msra.mxu0 %v5845_v57 }
 0x1ad   :  { %3550 = vmatprep.subr.bf16.mxu0 %v5848_v59  ;;  %3676 = vmatpush1.bf16.msra.mxu1 %v5359_v49  ;;  %v7456_v49 = vld [vmem:[#allocation37_spill] sm:$0xff] }
 0x1ae   :  { %3678 = vmatprep.subr.bf16.mxu1 %v5371_v52  ;;  %v7455_v52 = vld [vmem:[#allocation35_spill] sm:$0xff] }
 0x1b0   :  { %3552 = vmatpush1.bf16.msra.mxu0 %v5865_v6 }
 0x1b1   :  { %3554 = vmatprep.subr.bf16.mxu0 %v5868_v24  ;;  %3680 = vmatpush1.bf16.msra.mxu1 %v5398_v0  ;;  %v7454_v0 = vld [vmem:[#allocation33_spill] sm:$0xff] }
 0x1b2   :  { %3682 = vmatprep.subr.bf16.mxu1 %v5410_v8  ;;  %v7453_v8 = vld [vmem:[#allocation31_spill] sm:$0xff] }
 0x1b4   :  { %3556 = vmatpush1.bf16.msra.mxu0 %v5885_v19 }
 0x1b5   :  { %3558 = vmatprep.subr.bf16.mxu0 %v5888_v41  ;;  %3684 = vmatpush1.bf16.msra.mxu1 %v5437_v22  ;;  %v7452_v22 = vld [vmem:[#allocation29_spill] sm:$0xff] }
 0x1b6   :  { %3686 = vmatprep.subr.bf16.mxu1 %v5449_v26  ;;  %v7451_v26 = vld [vmem:[#allocation27_spill] sm:$0xff] }
 0x1b8   :  { %3560 = vmatpush1.bf16.msra.mxu0 %v5905_v30 }
 0x1b9   :  { %3562 = vmatprep.subr.bf16.mxu0 %v5908_v53  ;;  %3688 = vmatpush1.bf16.msra.mxu1 %v5476_v43  ;;  %v7450_v43 = vld [vmem:[#allocation25_spill] sm:$0xff] }
 0x1ba   :  { %3690 = vmatprep.subr.bf16.mxu1 %v5488_v50  ;;  %v7448_v50 = vld [vmem:[#allocation21_spill] sm:$0xff] }
 0x1bc   :  { %3564 = vmatpush1.bf16.msra.mxu0 %v5925_v31 }
 0x1bd   :  { %3566 = vmatprep.subr.bf16.mxu0 %v5928_v1  ;;  %3692 = vmatpush1.bf16.msra.mxu1 %v5513_v4  ;;  %v7447_v4 = vld [vmem:[#allocation19_spill] sm:$0xff] }
 0x1be   :  { %3694 = vmatprep.subr.bf16.mxu1 %v7371_v14  ;;  %v7444_v14 = vld [vmem:[#allocation13_spill] sm:$0xff] }
 0x1c0   :  { %3568 = vmatpush1.bf16.msra.mxu0 %v5945_v32 }
 0x1c1   :  { %3570 = vmatprep.subr.bf16.mxu0 %v7418_v36  ;;  %3696 = vmatpush1.bf16.msra.mxu1 %v7419_v60  ;;  %v7443_v60 = vld [vmem:[#allocation11_spill] sm:$0xff] }
 0x1c2   :  { %3698 = vmatprep.subr.bf16.mxu1 %v7420_v48  ;;  %v7440_v48 = vld [vmem:[#allocation69_spill] sm:$0xff] }
 0x1c4   :  { %3572 = vmatpush1.bf16.msra.mxu0 %v7421_v38 }
 0x1c5   :  { %3574 = vmatprep.subr.bf16.mxu0 %v7422_v44  ;;  %3700 = vmatpush1.bf16.msra.mxu1 %v7423_v39  ;;  %v7437_v39 = vld [vmem:[#allocation80_spill] sm:$0xff] }
 0x1c6   :  { %3702 = vmatprep.subr.bf16.mxu1 %v7424_v10  ;;  %v7436_v10 = vld [vmem:[#allocation66_spill] sm:$0xff] }
 0x1c8   :  { %3576 = vmatpush1.bf16.msra.mxu0 %v7425_v51 }
 0x1c9   :  { %3578 = vmatprep.subr.bf16.mxu0 %v7426_v21  ;;  %3704 = vmatpush1.bf16.msra.mxu1 %v7427_v12  ;;  %v7438_v12 = vld [vmem:[#allocation5_spill] sm:$0xff] }
 0x1ca   :  { %3706 = vmatprep.subr.bf16.mxu1 %v7428_v15  ;;  %v7439_v15 = vld [vmem:[#allocation68_spill] sm:$0xff] }
 0x1cc   :  { %3580 = vmatpush1.bf16.msra.mxu0 %v7429_v33 }
 0x1cd   :  { %3582 = vmatprep.subr.bf16.mxu0 %v7430_v9  ;;  %3708 = vmatpush1.bf16.msra.mxu1 %v7431_v18  ;;  %v7441_v18 = vld [vmem:[#allocation7_spill] sm:$0xff] }
 0x1ce   :  { %3710 = vmatprep.subr.bf16.mxu1 %v7432_v23  ;;  %v7442_v23 = vld [vmem:[#allocation9_spill] sm:$0xff]  ;;  %v7471_v9 = vld [vmem:[#allocation67_spill] sm:$0xff] }
 0x1d0   :  { %3584 = vmatpush1.bf16.msra.mxu0 %v7433_v40  ;;  %v7470_v40 = vld [vmem:[#allocation65_spill] sm:$0xff] }
 0x1d1   :  { %3586 = vmatprep.subr.bf16.mxu0 %v7434_v61  ;;  %3712 = vmatpush1.bf16.msra.mxu1 %v7435_v27  ;;  %v7445_v27 = vld [vmem:[#allocation15_spill] sm:$0xff] }
 0x1d2   :  { %3714 = vmatprep.subr.bf16.mxu1 %v7436_v10  ;;  %v7446_v10 = vld [vmem:[#allocation17_spill] sm:$0xff]  ;;  %v7469_v61 = vld [vmem:[#allocation63_spill] sm:$0xff] }
 0x1d4   :  { %3588 = vmatpush1.bf16.msra.mxu0 %v7437_v39  ;;  %v7468_v39 = vld [vmem:[#allocation61_spill] sm:$0xff] }
 0x1d5   :  { %3590 = vmatprep.subr.bf16.mxu0 %v7438_v12  ;;  %3716 = vmatpush1.bf16.msra.mxu1 %v7439_v15  ;;  %v7449_v15 = vld [vmem:[#allocation23_spill] sm:$0xff] }
 0x1d6   :  { %3718 = vmatprep.subr.bf16.mxu1 %v7440_v48  ;;  %v7467_v48 = vld [vmem:[#allocation59_spill] sm:$0xff] }
 0x1d7   :  { %1311 = vmatmul.mubr.f32.vlgmr.msra.gmra.mrb[20].mxu0 %v6206_v62 }
 0x1d8   :  { %3592 = vmatpush1.bf16.msra.mxu0 %v7441_v18 }
 0x1d9   :  { %3594 = vmatprep.subr.bf16.mxu0 %v7442_v23 }
 0x1dc   :  { %3596 = vmatpush1.bf16.msra.mxu0 %v7443_v60 }
 0x1dd   :  { %3598 = vmatprep.subr.bf16.mxu0 %v7444_v14 }
 0x1e0   :  { %3600 = vmatpush1.bf16.msra.mxu0 %v7445_v27 }
 0x1e1   :  { %3602 = vmatprep.subr.bf16.mxu0 %v7446_v10 }
 0x1e4   :  { %3604 = vmatpush1.bf16.msra.mxu0 %v7447_v4 }
 0x1e5   :  { %3606 = vmatprep.subr.bf16.mxu0 %v7448_v50 }
 0x1e8   :  { %3608 = vmatpush1.bf16.msra.mxu0 %v7449_v15 }
 0x1e9   :  { %3610 = vmatprep.subr.bf16.mxu0 %v7450_v43 }
 0x1ec   :  { %3612 = vmatpush1.bf16.msra.mxu0 %v7451_v26 }
 0x1ed   :  { %3614 = vmatprep.subr.bf16.mxu0 %v7452_v22 }
 0x1f0   :  { %3616 = vmatpush1.bf16.msra.mxu0 %v7453_v8 }
 0x1f1   :  { %3618 = vmatprep.subr.bf16.mxu0 %v7454_v0 }
 0x1f4   :  { %3620 = vmatpush1.bf16.msra.mxu0 %v7455_v52 }
 0x1f5   :  { %3622 = vmatprep.subr.bf16.mxu0 %v7456_v49 }
 0x1f8   :  { %3624 = vmatpush1.bf16.msra.mxu0 %v7457_v37 }
 0x1f9   :  { %3626 = vmatprep.subr.bf16.mxu0 %v7458_v34 }
 0x1fc   :  { %3628 = vmatpush1.bf16.msra.mxu0 %v7459_v20 }
 0x1fd   :  { %3630 = vmatprep.subr.bf16.mxu0 %v7460_v16 }
 0x200   :  { %3632 = vmatpush1.bf16.msra.mxu0 %v7461_v7 }
 0x201   :  { %3634 = vmatprep.subr.bf16.mxu0 %v7462_v2 }
 0x204   :  { %3636 = vmatpush1.bf16.msra.mxu0 %v7463_v58  ;;  %v7472_v58 = vld [vmem:[#allocation111_spill] sm:$0xff] }
 0x205   :  { %3638 = vmatprep.subr.bf16.mxu0 %v7464_v54 }
 0x208   :  { %3640 = vmatpush1.bf16.msra.mxu0 %v7465_v46 }
 0x209   :  { %3642 = vmatprep.subr.bf16.mxu0 %v7466_v42 }
 0x20c   :  { %3644 = vmatpush1.bf16.msra.mxu0 %v7467_v48  ;;  %v7473_v48 = vld [vmem:[#allocation114_spill] sm:$0xff] }
 0x20d   :  { %3646 = vmatprep.subr.bf16.mxu0 %v7468_v39 }
 0x210   :  { %3648 = vmatpush1.bf16.msra.mxu0 %v7469_v61 }
 0x211   :  { %3650 = vmatprep.subr.bf16.mxu0 %v7470_v40 }
 0x214   :  { %3652 = vmatpush1.bf16.msra.mxu0 %v7471_v9 }
 0x215   :  { %3782 = vmatprep.subr.bf16.mxu0 %v7438_v12 }
 0x26a   :  { %v1170_v33 = vpop.f32.mrb[2].mxu0  ;;  %v1241_v21 = vpop.f32.mrb[32].mxu1 }
 0x26b   :  { %v4745_v51 = vadd.f32 %v1170_v33, %v6191_v29  ;;  %v1172_v54 = vpop.f32.mrb[3].mxu0  ;;  %v1243_v46 = vpop.f32.mrb[33].mxu1  ;;  %v1343_v12 = vadd.f32 %v6201_v63, %v1241_v21  ;;  %v7474_v33 = vld [vmem:[#allocation85_spill] sm:$0xff] }
 0x26c   :  { %v1351_v42 = vadd.f32 %v1243_v46, %v7472_v58  ;;  %v4746_v38 = vadd.f32 %v1172_v54, %v7473_v48 }
 0x26d   :  { %v3101_v44 = vmul.f32 -1.442695, %v4745_v51 }
 0x26e   :  { %v3102_v39 = vmul.f32 -1.442695, %v4746_v38  ;;  %v3103_v46 = vmul.f32 -1.442695, %v1351_v42 }
 0x26f   :  { %4796 = vpow2.f32 %v3101_v44 }
 0x270   :  { %4798 = vpow2.f32 %v3102_v39 }
 0x279   :  { %v4797_v61 = vpop.eup %4796 }
 0x27a   :  { %v1337_v40 = vadd.f32 1.0, %v4797_v61  ;;  %v4799_v9 = vpop.eup %4798 }
 0x27b   :  { %v1338_v2 = vadd.f32 1.0, %v4799_v9 }
 0x27c   :  { %4800 = vrcp.f32 %v1337_v40 }
 0x27d   :  { %4802 = vrcp.f32 %v1338_v2 }
 0x286   :  { %v4801_v7 = vpop.eup %4800 }
 0x287   :  { %v1344_v36 = vmul.f32 %v4801_v7, %v1343_v12  ;;  %v4803_v58 = vpop.eup %4802 }
 0x288   :  { %v1347_v54 = vsub.f32 1.0, %v4803_v58  ;;  %v1349_v39 = vmul.f32 %v4803_v58, %v6206_v62  ;;  %v7476_v62 = vld [vmem:[#allocation106_spill] sm:$0xff] }
 0x289   :  { %v1345_v29 = vadd.f32 %v1344_v36, %v7474_v33 }
 0x28b   :  { %4804 = vtanh.f32 %v1345_v29  ;;  %v7475_v29 = vld [vmem:[#allocation112_spill] sm:$0xff] }
 0x28c   :  { %4806 = vpow2.f32 %v3103_v46 }
 0x295   :  { %v4805_v44 = vpop.eup %4804 }
 0x296   :  { %v1348_v38 = vmul.f32 %v4805_v44, %v1347_v54  ;;  %v4807_v7 = vpop.eup %4806 }
 0x297   :  { %v1359_v2 = vadd.f32 1.0, %v4807_v7 }
 0x298   :  { %v6331_v51 = vadd.f32 %v1349_v39, %v1348_v38 }
 0x299   :  { %4808 = vrcp.f32 %v1359_v2 }
 0x29a   :  { %3105 = vst [vmem:[%s7038_s8 + $0x8] sm:$0xff] %v6331_v51 }
 0x2a3   :  { %v4809_v9 = vpop.eup %4808 }
 0x2aa   :  { %v1312_v36 = vpop.f32.mrb[20].mxu0 }
 0x2ab   :  { %v1352_v42 = vadd.f32 %v1312_v36, %v7475_v29  ;;  %v1314_v21 = vpop.f32.mrb[21].mxu0  ;;  %v7478_v36 = vld [vmem:[#allocation71_spill] sm:$0xff] }
 0x2ac   :  { %v1365_v12 = vadd.f32 %v6216_v25, %v1314_v21  ;;  %v7479_v29 = vld [vmem:[#allocation47_spill] sm:$0xff]  ;;  %v7481_v21 = vld [vmem:[#allocation72_spill] sm:$0xff] }
 0x2ad   :  { %v3104_v40 = vmul.f32 -1.442695, %v1352_v42  ;;  %v7480_v42 = vld [vmem:[#allocation49_spill] sm:$0xff] }
 0x2ae   :  { %v1366_v61 = vmul.f32 %v4809_v9, %v1365_v12  ;;  %v7482_v12 = vld [vmem:[#allocation73_spill] sm:$0xff]  ;;  %v7483_v9 = vld [vmem:[#allocation51_spill] sm:$0xff] }
 0x2af   :  { %4810 = vpow2.f32 %v3104_v40  ;;  %v7484_v40 = vld [vmem:[#allocation53_spill] sm:$0xff] }
 0x2b0   :  { %v1367_v33 = vadd.f32 %v1366_v61, %v7476_v62  ;;  %v7485_v61 = vld [vmem:[#allocation74_spill] sm:$0xff]  ;;  %v7486_v62 = vld [vmem:[#allocation75_spill] sm:$0xff] }
 0x2b9   :  { %v4811_v46 = vpop.eup %4810 }
 0x2ba   :  { %v1360_v58 = vadd.f32 1.0, %v4811_v46  ;;  %v7488_v46 = vld [vmem:[#allocation57_spill] sm:$0xff] }
 0x2bc   :  { %4812 = vrcp.f32 %v1360_v58  ;;  %v7489_v58 = vld [vmem:[#allocation76_spill] sm:$0xff] }
 0x2bd   :  { %4814 = vtanh.f32 %v1367_v33  ;;  %v7487_v33 = vld [vmem:[#allocation55_spill] sm:$0xff] }
 0x2c6   :  { %v4813_v54 = vpop.eup %4812 }
 0x2c7   :  { %v1369_v44 = vsub.f32 1.0, %v4813_v54  ;;  %v4815_v38 = vpop.eup %4814  ;;  %v1371_v7 = vmul.f32 %v4813_v54, %v6221_v55  ;;  %v7490_v54 = vld [vmem:[#allocation77_spill] sm:$0xff]  ;;  %v7495_v55 = vld [vmem:[#allocation63_spill] sm:$0xff] }
 0x2c9   :  { %v1370_v39 = vmul.f32 %v4815_v38, %v1369_v44  ;;  %v7491_v44 = vld [vmem:[#allocation59_spill] sm:$0xff]  ;;  %v7492_v38 = vld [vmem:[#allocation61_spill] sm:$0xff] }
 0x2cb   :  { %v6341_v2 = vadd.f32 %v1371_v7, %v1370_v39  ;;  %v7493_v39 = vld [vmem:[#allocation78_spill] sm:$0xff]  ;;  %v7494_v7 = vld [vmem:[#allocation79_spill] sm:$0xff] }
 0x2cd   :  { %7477 = vst [vmem:[#allocation70_spill] sm:$0xff] %v6341_v2  ;;  %1441 = vmatprep.mubr.f32.mxu0 %v6341_v2  ;;  %1512 = vmatprep.mubr.f32.mxu1 %v6341_v2 }
 0x2ce   :  { %1442 = vmatmul.mubr.f32.vlgmr.msra.gmra.mrb[4].mxu0 %v6331_v51  ;;  %1513 = vmatmul.mubr.f32.vlgmr.msra.gmra.mrb[34].mxu1 %v6331_v51 }
 0x2cf   :  { %3720 = vmatpush1.bf16.msra.mxu1 %v5743_v5  ;;  %1583 = vmatprep.mubr.f32.mxu1 %v6341_v2 }
 0x2d0   :  { %3722 = vmatprep.subr.bf16.mxu1 %v7417_v28  ;;  %3784 = vmatpush1.bf16.msra.mxu0 %v7441_v18  ;;  %v7526_v18 = vld [vmem:[#allocation58_spill] sm:$0xff] }
 0x2d1   :  { %3786 = vmatprep.subr.bf16.mxu0 %v7442_v23  ;;  %v7525_v23 = vld [vmem:[#allocation56_spill] sm:$0xff] }
 0x2d3   :  { %3724 = vmatpush1.bf16.msra.mxu1 %v5764_v3 }
 0x2d4   :  { %3726 = vmatprep.subr.bf16.mxu1 %v5768_v47  ;;  %3788 = vmatpush1.bf16.msra.mxu0 %v7443_v60  ;;  %v7524_v60 = vld [vmem:[#allocation54_spill] sm:$0xff] }
 0x2d5   :  { %3790 = vmatprep.subr.bf16.mxu0 %v7444_v14  ;;  %v7523_v14 = vld [vmem:[#allocation52_spill] sm:$0xff] }
 0x2d7   :  { %3728 = vmatpush1.bf16.msra.mxu1 %v5785_v13 }
 0x2d8   :  { %3730 = vmatprep.subr.bf16.mxu1 %v5788_v35  ;;  %3792 = vmatpush1.bf16.msra.mxu0 %v7445_v27  ;;  %v7522_v27 = vld [vmem:[#allocation50_spill] sm:$0xff] }
 0x2d9   :  { %3794 = vmatprep.subr.bf16.mxu0 %v7446_v10  ;;  %v7521_v10 = vld [vmem:[#allocation48_spill] sm:$0xff] }
 0x2db   :  { %3732 = vmatpush1.bf16.msra.mxu1 %v5805_v11 }
 0x2dc   :  { %3734 = vmatprep.subr.bf16.mxu1 %v5808_v56  ;;  %3796 = vmatpush1.bf16.msra.mxu0 %v7447_v4  ;;  %v7520_v4 = vld [vmem:[#allocation46_spill] sm:$0xff] }
 0x2dd   :  { %3798 = vmatprep.subr.bf16.mxu0 %v7448_v50  ;;  %v7519_v50 = vld [vmem:[#allocation44_spill] sm:$0xff] }
 0x2df   :  { %3736 = vmatpush1.bf16.msra.mxu1 %v5825_v45 }
 0x2e0   :  { %3738 = vmatprep.subr.bf16.mxu1 %v5828_v17  ;;  %3800 = vmatpush1.bf16.msra.mxu0 %v7449_v15  ;;  %v7518_v15 = vld [vmem:[#allocation42_spill] sm:$0xff] }
 0x2e1   :  { %3802 = vmatprep.subr.bf16.mxu0 %v7450_v43  ;;  %v7517_v43 = vld [vmem:[#allocation40_spill] sm:$0xff] }
 0x2e3   :  { %3740 = vmatpush1.bf16.msra.mxu1 %v5845_v57 }
 0x2e4   :  { %3742 = vmatprep.subr.bf16.mxu1 %v5848_v59  ;;  %3804 = vmatpush1.bf16.msra.mxu0 %v7451_v26  ;;  %v7516_v26 = vld [vmem:[#allocation38_spill] sm:$0xff] }
 0x2e5   :  { %3806 = vmatprep.subr.bf16.mxu0 %v7452_v22  ;;  %v7515_v22 = vld [vmem:[#allocation36_spill] sm:$0xff] }
 0x2e7   :  { %3744 = vmatpush1.bf16.msra.mxu1 %v5865_v6 }
 0x2e8   :  { %3746 = vmatprep.subr.bf16.mxu1 %v5868_v24  ;;  %3808 = vmatpush1.bf16.msra.mxu0 %v7453_v8  ;;  %v7514_v8 = vld [vmem:[#allocation34_spill] sm:$0xff] }
 0x2e9   :  { %3810 = vmatprep.subr.bf16.mxu0 %v7454_v0  ;;  %v7513_v0 = vld [vmem:[#allocation32_spill] sm:$0xff] }
 0x2eb   :  { %3748 = vmatpush1.bf16.msra.mxu1 %v5885_v19 }
 0x2ec   :  { %3750 = vmatprep.subr.bf16.mxu1 %v5888_v41  ;;  %3812 = vmatpush1.bf16.msra.mxu0 %v7455_v52  ;;  %v7512_v52 = vld [vmem:[#allocation30_spill] sm:$0xff] }
 0x2ed   :  { %3814 = vmatprep.subr.bf16.mxu0 %v7456_v49  ;;  %v7511_v49 = vld [vmem:[#allocation28_spill] sm:$0xff] }
 0x2ef   :  { %3752 = vmatpush1.bf16.msra.mxu1 %v5905_v30 }
 0x2f0   :  { %3754 = vmatprep.subr.bf16.mxu1 %v5908_v53  ;;  %3816 = vmatpush1.bf16.msra.mxu0 %v7457_v37  ;;  %v7510_v37 = vld [vmem:[#allocation26_spill] sm:$0xff] }
 0x2f1   :  { %3818 = vmatprep.subr.bf16.mxu0 %v7458_v34  ;;  %v7508_v34 = vld [vmem:[#allocation22_spill] sm:$0xff] }
 0x2f3   :  { %3756 = vmatpush1.bf16.msra.mxu1 %v5925_v31 }
 0x2f4   :  { %3758 = vmatprep.subr.bf16.mxu1 %v5928_v1  ;;  %3820 = vmatpush1.bf16.msra.mxu0 %v7459_v20  ;;  %v7507_v20 = vld [vmem:[#allocation20_spill] sm:$0xff] }
 0x2f5   :  { %3822 = vmatprep.subr.bf16.mxu0 %v7460_v16  ;;  %v7504_v16 = vld [vmem:[#allocation14_spill] sm:$0xff] }
 0x2f7   :  { %3760 = vmatpush1.bf16.msra.mxu1 %v5945_v32 }
 0x2f8   :  { %3762 = vmatprep.subr.bf16.mxu1 %v7478_v36  ;;  %3824 = vmatpush1.bf16.msra.mxu0 %v7479_v29  ;;  %v7503_v29 = vld [vmem:[#allocation12_spill] sm:$0xff] }
 0x2f9   :  { %3826 = vmatprep.subr.bf16.mxu0 %v7480_v42  ;;  %v7500_v42 = vld [vmem:[#allocation69_spill] sm:$0xff] }
 0x2fb   :  { %3764 = vmatpush1.bf16.msra.mxu1 %v7481_v21 }
 0x2fc   :  { %3766 = vmatprep.subr.bf16.mxu1 %v7482_v12  ;;  %3828 = vmatpush1.bf16.msra.mxu0 %v7483_v9  ;;  %v7497_v9 = vld [vmem:[#allocation80_spill] sm:$0xff]  ;;  %v7533_v12 = vld [vmem:[#allocation109_spill] sm:$0xff] }
 0x2fd   :  { %3830 = vmatprep.subr.bf16.mxu0 %v7484_v40  ;;  %v7496_v40 = vld [vmem:[#allocation65_spill] sm:$0xff] }
 0x2ff   :  { %3768 = vmatpush1.bf16.msra.mxu1 %v7485_v61  ;;  %v7532_v61 = vld [vmem:[#allocation113_spill] sm:$0xff] }
 0x300   :  { %3770 = vmatprep.subr.bf16.mxu1 %v7486_v62  ;;  %3832 = vmatpush1.bf16.msra.mxu0 %v7487_v33  ;;  %v7498_v33 = vld [vmem:[#allocation6_spill] sm:$0xff] }
 0x301   :  { %3834 = vmatprep.subr.bf16.mxu0 %v7488_v46  ;;  %v7499_v46 = vld [vmem:[#allocation67_spill] sm:$0xff] }
 0x303   :  { %3772 = vmatpush1.bf16.msra.mxu1 %v7489_v58 }
 0x304   :  { %3774 = vmatprep.subr.bf16.mxu1 %v7490_v54  ;;  %3836 = vmatpush1.bf16.msra.mxu0 %v7491_v44  ;;  %v7501_v44 = vld [vmem:[#allocation8_spill] sm:$0xff] }
 0x305   :  { %3838 = vmatprep.subr.bf16.mxu0 %v7492_v38  ;;  %v7502_v38 = vld [vmem:[#allocation10_spill] sm:$0xff]  ;;  %v7531_v54 = vld [vmem:[#allocation68_spill] sm:$0xff] }
 0x307   :  { %3776 = vmatpush1.bf16.msra.mxu1 %v7493_v39  ;;  %v7530_v39 = vld [vmem:[#allocation66_spill] sm:$0xff] }
 0x308   :  { %3778 = vmatprep.subr.bf16.mxu1 %v7494_v7  ;;  %3840 = vmatpush1.bf16.msra.mxu0 %v7495_v55  ;;  %v7505_v55 = vld [vmem:[#allocation16_spill] sm:$0xff] }
 0x309   :  { %3842 = vmatprep.subr.bf16.mxu0 %v7496_v40  ;;  %v7506_v40 = vld [vmem:[#allocation18_spill] sm:$0xff]  ;;  %v7529_v7 = vld [vmem:[#allocation64_spill] sm:$0xff] }
 0x30b   :  { %3780 = vmatpush1.bf16.msra.mxu1 %v7497_v9  ;;  %v7528_v9 = vld [vmem:[#allocation62_spill] sm:$0xff] }
 0x30c   :  { %3846 = vmatprep.subr.bf16.mxu1 %v7498_v33  ;;  %3844 = vmatpush1.bf16.msra.mxu0 %v7499_v46  ;;  %v7509_v46 = vld [vmem:[#allocation24_spill] sm:$0xff] }
 0x30d   :  { %3910 = vmatprep.subr.bf16.mxu0 %v7500_v42  ;;  %v7527_v42 = vld [vmem:[#allocation60_spill] sm:$0xff] }
 0x30e   :  { %1584 = vmatmul.mubr.f32.vlgmr.msra.gmra.mrb[36].mxu1 %v6331_v51 }
 0x30f   :  { %3848 = vmatpush1.bf16.msra.mxu1 %v7501_v44 }
 0x310   :  { %3850 = vmatprep.subr.bf16.mxu1 %v7502_v38 }
 0x313   :  { %3852 = vmatpush1.bf16.msra.mxu1 %v7503_v29 }
 0x314   :  { %3854 = vmatprep.subr.bf16.mxu1 %v7504_v16 }
 0x317   :  { %3856 = vmatpush1.bf16.msra.mxu1 %v7505_v55 }
 0x318   :  { %3858 = vmatprep.subr.bf16.mxu1 %v7506_v40 }
 0x31b   :  { %3860 = vmatpush1.bf16.msra.mxu1 %v7507_v20 }
 0x31c   :  { %3862 = vmatprep.subr.bf16.mxu1 %v7508_v34 }
 0x31f   :  { %3864 = vmatpush1.bf16.msra.mxu1 %v7509_v46 }
 0x320   :  { %3866 = vmatprep.subr.bf16.mxu1 %v7510_v37 }
 0x323   :  { %3868 = vmatpush1.bf16.msra.mxu1 %v7511_v49 }
 0x324   :  { %3870 = vmatprep.subr.bf16.mxu1 %v7512_v52 }
 0x327   :  { %3872 = vmatpush1.bf16.msra.mxu1 %v7513_v0 }
 0x328   :  { %3874 = vmatprep.subr.bf16.mxu1 %v7514_v8 }
 0x32b   :  { %3876 = vmatpush1.bf16.msra.mxu1 %v7515_v22 }
 0x32c   :  { %3878 = vmatprep.subr.bf16.mxu1 %v7516_v26 }
 0x32f   :  { %3880 = vmatpush1.bf16.msra.mxu1 %v7517_v43 }
 0x330   :  { %3882 = vmatprep.subr.bf16.mxu1 %v7518_v15 }
 0x333   :  { %3884 = vmatpush1.bf16.msra.mxu1 %v7519_v50 }
 0x334   :  { %3886 = vmatprep.subr.bf16.mxu1 %v7520_v4 }
 0x337   :  { %3888 = vmatpush1.bf16.msra.mxu1 %v7521_v10 }
 0x338   :  { %3890 = vmatprep.subr.bf16.mxu1 %v7522_v27 }
 0x33b   :  { %3892 = vmatpush1.bf16.msra.mxu1 %v7523_v14 }
 0x33c   :  { %3894 = vmatprep.subr.bf16.mxu1 %v7524_v60 }
 0x33f   :  { %3896 = vmatpush1.bf16.msra.mxu1 %v7525_v23 }
 0x340   :  { %3898 = vmatprep.subr.bf16.mxu1 %v7526_v18 }
 0x343   :  { %3900 = vmatpush1.bf16.msra.mxu1 %v7527_v42 }
 0x344   :  { %3902 = vmatprep.subr.bf16.mxu1 %v7528_v9 }
 0x347   :  { %3904 = vmatpush1.bf16.msra.mxu1 %v7529_v7 }
 0x348   :  { %3906 = vmatprep.subr.bf16.mxu1 %v7530_v39 }
 0x34b   :  { %3908 = vmatpush1.bf16.msra.mxu1 %v7531_v54 }
 0x34c   :  { %4038 = vmatprep.subr.bf16.mxu1 %v7498_v33 }
 0x3a1   :  { %v1443_v58 = vpop.f32.mrb[4].mxu0  ;;  %v1514_v62 = vpop.f32.mrb[34].mxu1 }
 0x3a2   :  { %v4747_v60 = vadd.f32 %v1443_v58, %v7532_v61  ;;  %v1445_v14 = vpop.f32.mrb[5].mxu0  ;;  %v1516_v23 = vpop.f32.mrb[35].mxu1  ;;  %v1616_v33 = vadd.f32 %v6201_v63, %v1514_v62  ;;  %v7534_v58 = vld [vmem:[#allocation87_spill] sm:$0xff] }
 0x3a3   :  { %v1624_v18 = vadd.f32 %v1516_v23, %v7533_v12  ;;  %v4748_v42 = vadd.f32 %v1445_v14, %v7473_v48 }
 0x3a4   :  { %v3106_v21 = vmul.f32 -1.442695, %v4747_v60 }
 0x3a5   :  { %v3107_v9 = vmul.f32 -1.442695, %v4748_v42  ;;  %v3108_v23 = vmul.f32 -1.442695, %v1624_v18 }
 0x3a6   :  { %4816 = vpow2.f32 %v3106_v21 }
 0x3a7   :  { %4818 = vpow2.f32 %v3107_v9 }
 0x3b0   :  { %v4817_v7 = vpop.eup %4816 }
 0x3b1   :  { %v1610_v39 = vadd.f32 1.0, %v4817_v7  ;;  %v4819_v54 = vpop.eup %4818  ;;  %v7536_v7 = vld [vmem:[#allocation110_spill] sm:$0xff] }
 0x3b2   :  { %v1611_v27 = vadd.f32 1.0, %v4819_v54 }
 0x3b3   :  { %4820 = vrcp.f32 %v1610_v39 }
 0x3b4   :  { %4822 = vrcp.f32 %v1611_v27 }
 0x3bd   :  { %v4821_v10 = vpop.eup %4820 }
 0x3be   :  { %v1617_v36 = vmul.f32 %v4821_v10, %v1616_v33  ;;  %v4823_v60 = vpop.eup %4822 }
 0x3bf   :  { %v1620_v14 = vsub.f32 1.0, %v4823_v60  ;;  %v1622_v12 = vmul.f32 %v4823_v60, %v6331_v51 }
 0x3c0   :  { %v1618_v61 = vadd.f32 %v1617_v36, %v7534_v58  ;;  %v7537_v58 = vld [vmem:[#allocation101_spill] sm:$0xff] }
 0x3c2   :  { %4824 = vtanh.f32 %v1618_v61 }
 0x3c3   :  { %4826 = vpow2.f32 %v3108_v23 }
 0x3cc   :  { %v4825_v21 = vpop.eup %4824 }
 0x3cd   :  { %v1621_v42 = vmul.f32 %v4825_v21, %v1620_v14  ;;  %v4827_v39 = vpop.eup %4826 }
 0x3ce   :  { %v1632_v54 = vadd.f32 1.0, %v4827_v39 }
 0x3cf   :  { %v6451_v9 = vadd.f32 %v1622_v12, %v1621_v42 }
 0x3d0   :  { %4828 = vrcp.f32 %v1632_v54 }
 0x3d1   :  { %7535 = vst [vmem:[#allocation111_spill] sm:$0xff] %v6451_v9 }
 0x3da   :  { %v4829_v61 = vpop.eup %4828 }
 0x3e1   :  { %v1585_v62 = vpop.f32.mrb[36].mxu1 }
 0x3e2   :  { %v1625_v10 = vadd.f32 %v1585_v62, %v7536_v7  ;;  %v1587_v27 = vpop.f32.mrb[37].mxu1  ;;  %v7539_v62 = vld [vmem:[#allocation71_spill] sm:$0xff]  ;;  %v7540_v7 = vld [vmem:[#allocation48_spill] sm:$0xff] }
 0x3e3   :  { %v1638_v36 = vadd.f32 %v6216_v25, %v1587_v27  ;;  %v7542_v27 = vld [vmem:[#allocation72_spill] sm:$0xff] }
 0x3e4   :  { %v3109_v18 = vmul.f32 -1.442695, %v1625_v10  ;;  %v7541_v10 = vld [vmem:[#allocation50_spill] sm:$0xff] }
 0x3e5   :  { %v1639_v33 = vmul.f32 %v4829_v61, %v1638_v36  ;;  %v7543_v36 = vld [vmem:[#allocation73_spill] sm:$0xff]  ;;  %v7544_v61 = vld [vmem:[#allocation52_spill] sm:$0xff] }
 0x3e6   :  { %4830 = vpow2.f32 %v3109_v18  ;;  %v7545_v18 = vld [vmem:[#allocation54_spill] sm:$0xff] }
 0x3e7   :  { %v1640_v23 = vadd.f32 %v1639_v33, %v7537_v58  ;;  %v7546_v33 = vld [vmem:[#allocation74_spill] sm:$0xff]  ;;  %v7547_v58 = vld [vmem:[#allocation75_spill] sm:$0xff] }
 0x3f0   :  { %v4831_v14 = vpop.eup %4830 }
 0x3f1   :  { %v1633_v21 = vadd.f32 1.0, %v4831_v14  ;;  %v7549_v14 = vld [vmem:[#allocation58_spill] sm:$0xff] }
 0x3f3   :  { %4832 = vrcp.f32 %v1633_v21  ;;  %v7550_v21 = vld [vmem:[#allocation76_spill] sm:$0xff] }
 0x3f4   :  { %4834 = vtanh.f32 %v1640_v23  ;;  %v7548_v23 = vld [vmem:[#allocation56_spill] sm:$0xff] }
 0x3fd   :  { %v4833_v51 = vpop.eup %4832 }
 0x3fe   :  { %v1642_v60 = vsub.f32 1.0, %v4833_v51  ;;  %v4835_v42 = vpop.eup %4834  ;;  %v1644_v39 = vmul.f32 %v4833_v51, %v6341_v2  ;;  %v7551_v51 = vld [vmem:[#allocation77_spill] sm:$0xff]  ;;  %v7556_v2 = vld [vmem:[#allocation64_spill] sm:$0xff] }
 0x400   :  { %v1643_v12 = vmul.f32 %v4835_v42, %v1642_v60  ;;  %v7552_v60 = vld [vmem:[#allocation60_spill] sm:$0xff]  ;;  %v7553_v42 = vld [vmem:[#allocation62_spill] sm:$0xff] }
 0x402   :  { %v6457_v54 = vadd.f32 %v1644_v39, %v1643_v12  ;;  %v7554_v12 = vld [vmem:[#allocation78_spill] sm:$0xff]  ;;  %v7555_v39 = vld [vmem:[#allocation79_spill] sm:$0xff] }
 0x404   :  { %7538 = vst [vmem:[#allocation85_spill] sm:$0xff] %v6457_v54  ;;  %1714 = vmatprep.mubr.f32.mxu0 %v6457_v54  ;;  %1785 = vmatprep.mubr.f32.mxu1 %v6457_v54 }
 0x405   :  { %1715 = vmatmul.mubr.f32.vlgmr.msra.gmra.mrb[6].mxu0 %v6451_v9  ;;  %1786 = vmatmul.mubr.f32.vlgmr.msra.gmra.mrb[38].mxu1 %v6451_v9 }
 0x406   :  { %3912 = vmatpush1.bf16.msra.mxu0 %v5743_v5  ;;  %1856 = vmatprep.mubr.f32.mxu0 %v6457_v54 }
 0x407   :  { %3914 = vmatprep.subr.bf16.mxu0 %v7417_v28  ;;  %4040 = vmatpush1.bf16.msra.mxu1 %v7501_v44  ;;  %v7587_v44 = vld [vmem:[#allocation57_spill] sm:$0xff] }
 0x408   :  { %4042 = vmatprep.subr.bf16.mxu1 %v7502_v38  ;;  %v7586_v38 = vld [vmem:[#allocation55_spill] sm:$0xff] }
 0x40a   :  { %3916 = vmatpush1.bf16.msra.mxu0 %v5764_v3 }
 0x40b   :  { %3918 = vmatprep.subr.bf16.mxu0 %v5768_v47  ;;  %4044 = vmatpush1.bf16.msra.mxu1 %v7503_v29  ;;  %v7585_v29 = vld [vmem:[#allocation53_spill] sm:$0xff] }
 0x40c   :  { %4046 = vmatprep.subr.bf16.mxu1 %v7504_v16  ;;  %v7584_v16 = vld [vmem:[#allocation51_spill] sm:$0xff] }
 0x40e   :  { %3920 = vmatpush1.bf16.msra.mxu0 %v5785_v13 }
 0x40f   :  { %3922 = vmatprep.subr.bf16.mxu0 %v5788_v35  ;;  %4048 = vmatpush1.bf16.msra.mxu1 %v7505_v55  ;;  %v7583_v55 = vld [vmem:[#allocation49_spill] sm:$0xff] }
 0x410   :  { %4050 = vmatprep.subr.bf16.mxu1 %v7506_v40  ;;  %v7582_v40 = vld [vmem:[#allocation47_spill] sm:$0xff] }
 0x412   :  { %3924 = vmatpush1.bf16.msra.mxu0 %v5805_v11 }
 0x413   :  { %3926 = vmatprep.subr.bf16.mxu0 %v5808_v56  ;;  %4052 = vmatpush1.bf16.msra.mxu1 %v7507_v20  ;;  %v7581_v20 = vld [vmem:[#allocation45_spill] sm:$0xff] }
 0x414   :  { %4054 = vmatprep.subr.bf16.mxu1 %v7508_v34  ;;  %v7580_v34 = vld [vmem:[#allocation43_spill] sm:$0xff] }
 0x416   :  { %3928 = vmatpush1.bf16.msra.mxu0 %v5825_v45 }
 0x417   :  { %3930 = vmatprep.subr.bf16.mxu0 %v5828_v17  ;;  %4056 = vmatpush1.bf16.msra.mxu1 %v7509_v46  ;;  %v7579_v46 = vld [vmem:[#allocation41_spill] sm:$0xff] }
 0x418   :  { %4058 = vmatprep.subr.bf16.mxu1 %v7510_v37  ;;  %v7578_v37 = vld [vmem:[#allocation39_spill] sm:$0xff] }
 0x41a   :  { %3932 = vmatpush1.bf16.msra.mxu0 %v5845_v57 }
 0x41b   :  { %3934 = vmatprep.subr.bf16.mxu0 %v5848_v59  ;;  %4060 = vmatpush1.bf16.msra.mxu1 %v7511_v49  ;;  %v7577_v49 = vld [vmem:[#allocation37_spill] sm:$0xff] }
 0x41c   :  { %4062 = vmatprep.subr.bf16.mxu1 %v7512_v52  ;;  %v7576_v52 = vld [vmem:[#allocation35_spill] sm:$0xff] }
 0x41e   :  { %3936 = vmatpush1.bf16.msra.mxu0 %v5865_v6 }
 0x41f   :  { %3938 = vmatprep.subr.bf16.mxu0 %v5868_v24  ;;  %4064 = vmatpush1.bf16.msra.mxu1 %v7513_v0  ;;  %v7575_v0 = vld [vmem:[#allocation33_spill] sm:$0xff] }
 0x420   :  { %4066 = vmatprep.subr.bf16.mxu1 %v7514_v8  ;;  %v7574_v8 = vld [vmem:[#allocation31_spill] sm:$0xff] }
 0x422   :  { %3940 = vmatpush1.bf16.msra.mxu0 %v5885_v19 }
 0x423   :  { %3942 = vmatprep.subr.bf16.mxu0 %v5888_v41  ;;  %4068 = vmatpush1.bf16.msra.mxu1 %v7515_v22  ;;  %v7573_v22 = vld [vmem:[#allocation29_spill] sm:$0xff] }
 0x424   :  { %4070 = vmatprep.subr.bf16.mxu1 %v7516_v26  ;;  %v7572_v26 = vld [vmem:[#allocation27_spill] sm:$0xff] }
 0x426   :  { %3944 = vmatpush1.bf16.msra.mxu0 %v5905_v30 }
 0x427   :  { %3946 = vmatprep.subr.bf16.mxu0 %v5908_v53  ;;  %4072 = vmatpush1.bf16.msra.mxu1 %v7517_v43  ;;  %v7571_v43 = vld [vmem:[#allocation25_spill] sm:$0xff] }
 0x428   :  { %4074 = vmatprep.subr.bf16.mxu1 %v7518_v15  ;;  %v7569_v15 = vld [vmem:[#allocation21_spill] sm:$0xff] }
 0x42a   :  { %3948 = vmatpush1.bf16.msra.mxu0 %v5925_v31 }
 0x42b   :  { %3950 = vmatprep.subr.bf16.mxu0 %v5928_v1  ;;  %4076 = vmatpush1.bf16.msra.mxu1 %v7519_v50  ;;  %v7568_v50 = vld [vmem:[#allocation19_spill] sm:$0xff] }
 0x42c   :  { %4078 = vmatprep.subr.bf16.mxu1 %v7520_v4  ;;  %v7565_v4 = vld [vmem:[#allocation13_spill] sm:$0xff] }
 0x42e   :  { %3952 = vmatpush1.bf16.msra.mxu0 %v5945_v32 }
 0x42f   :  { %3954 = vmatprep.subr.bf16.mxu0 %v7539_v62  ;;  %4080 = vmatpush1.bf16.msra.mxu1 %v7540_v7  ;;  %v7564_v7 = vld [vmem:[#allocation11_spill] sm:$0xff] }
 0x430   :  { %4082 = vmatprep.subr.bf16.mxu1 %v7541_v10  ;;  %v7561_v10 = vld [vmem:[#allocation69_spill] sm:$0xff] }
 0x432   :  { %3956 = vmatpush1.bf16.msra.mxu0 %v7542_v27 }
 0x433   :  { %3958 = vmatprep.subr.bf16.mxu0 %v7543_v36  ;;  %4084 = vmatpush1.bf16.msra.mxu1 %v7544_v61  ;;  %v7558_v61 = vld [vmem:[#allocation80_spill] sm:$0xff]  ;;  %v7594_v36 = vld [vmem:[#allocation107_spill] sm:$0xff] }
 0x434   :  { %4086 = vmatprep.subr.bf16.mxu1 %v7545_v18  ;;  %v7557_v18 = vld [vmem:[#allocation66_spill] sm:$0xff] }
 0x436   :  { %3960 = vmatpush1.bf16.msra.mxu0 %v7546_v33  ;;  %v7593_v33 = vld [vmem:[#allocation113_spill] sm:$0xff] }
 0x437   :  { %3962 = vmatprep.subr.bf16.mxu0 %v7547_v58  ;;  %4088 = vmatpush1.bf16.msra.mxu1 %v7548_v23  ;;  %v7559_v23 = vld [vmem:[#allocation5_spill] sm:$0xff] }
 0x438   :  { %4090 = vmatprep.subr.bf16.mxu1 %v7549_v14  ;;  %v7560_v14 = vld [vmem:[#allocation68_spill] sm:$0xff] }
 0x43a   :  { %3964 = vmatpush1.bf16.msra.mxu0 %v7550_v21 }
 0x43b   :  { %3966 = vmatprep.subr.bf16.mxu0 %v7551_v51  ;;  %4092 = vmatpush1.bf16.msra.mxu1 %v7552_v60  ;;  %v7562_v60 = vld [vmem:[#allocation7_spill] sm:$0xff] }
 0x43c   :  { %4094 = vmatprep.subr.bf16.mxu1 %v7553_v42  ;;  %v7563_v42 = vld [vmem:[#allocation9_spill] sm:$0xff]  ;;  %v7592_v51 = vld [vmem:[#allocation67_spill] sm:$0xff] }
 0x43e   :  { %3968 = vmatpush1.bf16.msra.mxu0 %v7554_v12  ;;  %v7591_v12 = vld [vmem:[#allocation65_spill] sm:$0xff] }
 0x43f   :  { %3970 = vmatprep.subr.bf16.mxu0 %v7555_v39  ;;  %4096 = vmatpush1.bf16.msra.mxu1 %v7556_v2  ;;  %v7566_v2 = vld [vmem:[#allocation15_spill] sm:$0xff] }
 0x440   :  { %4098 = vmatprep.subr.bf16.mxu1 %v7557_v18  ;;  %v7567_v18 = vld [vmem:[#allocation17_spill] sm:$0xff]  ;;  %v7590_v39 = vld [vmem:[#allocation63_spill] sm:$0xff] }
 0x442   :  { %3972 = vmatpush1.bf16.msra.mxu0 %v7558_v61  ;;  %v7589_v61 = vld [vmem:[#allocation61_spill] sm:$0xff] }
 0x443   :  { %3974 = vmatprep.subr.bf16.mxu0 %v7559_v23  ;;  %4100 = vmatpush1.bf16.msra.mxu1 %v7560_v14  ;;  %v7570_v14 = vld [vmem:[#allocation23_spill] sm:$0xff] }
 0x444   :  { %4102 = vmatprep.subr.bf16.mxu1 %v7561_v10  ;;  %v7588_v10 = vld [vmem:[#allocation59_spill] sm:$0xff] }
 0x445   :  { %1857 = vmatmul.mubr.f32.vlgmr.msra.gmra.mrb[22].mxu0 %v6451_v9 }
 0x446   :  { %3976 = vmatpush1.bf16.msra.mxu0 %v7562_v60 }
 0x447   :  { %3978 = vmatprep.subr.bf16.mxu0 %v7563_v42 }
 0x44a   :  { %3980 = vmatpush1.bf16.msra.mxu0 %v7564_v7 }
 0x44b   :  { %3982 = vmatprep.subr.bf16.mxu0 %v7565_v4 }
 0x44e   :  { %3984 = vmatpush1.bf16.msra.mxu0 %v7566_v2 }
 0x44f   :  { %3986 = vmatprep.subr.bf16.mxu0 %v7567_v18 }
 0x452   :  { %3988 = vmatpush1.bf16.msra.mxu0 %v7568_v50 }
 0x453   :  { %3990 = vmatprep.subr.bf16.mxu0 %v7569_v15 }
 0x456   :  { %3992 = vmatpush1.bf16.msra.mxu0 %v7570_v14 }
 0x457   :  { %3994 = vmatprep.subr.bf16.mxu0 %v7571_v43 }
 0x45a   :  { %3996 = vmatpush1.bf16.msra.mxu0 %v7572_v26 }
 0x45b   :  { %3998 = vmatprep.subr.bf16.mxu0 %v7573_v22 }
 0x45e   :  { %4000 = vmatpush1.bf16.msra.mxu0 %v7574_v8 }
 0x45f   :  { %4002 = vmatprep.subr.bf16.mxu0 %v7575_v0 }
 0x462   :  { %4004 = vmatpush1.bf16.msra.mxu0 %v7576_v52 }
 0x463   :  { %4006 = vmatprep.subr.bf16.mxu0 %v7577_v49 }
 0x466   :  { %4008 = vmatpush1.bf16.msra.mxu0 %v7578_v37 }
 0x467   :  { %4010 = vmatprep.subr.bf16.mxu0 %v7579_v46 }
 0x46a   :  { %4012 = vmatpush1.bf16.msra.mxu0 %v7580_v34 }
 0x46b   :  { %4014 = vmatprep.subr.bf16.mxu0 %v7581_v20 }
 0x46e   :  { %4016 = vmatpush1.bf16.msra.mxu0 %v7582_v40 }
 0x46f   :  { %4018 = vmatprep.subr.bf16.mxu0 %v7583_v55 }
 0x472   :  { %4020 = vmatpush1.bf16.msra.mxu0 %v7584_v16 }
 0x473   :  { %4022 = vmatprep.subr.bf16.mxu0 %v7585_v29 }
 0x476   :  { %4024 = vmatpush1.bf16.msra.mxu0 %v7586_v38 }
 0x477   :  { %4026 = vmatprep.subr.bf16.mxu0 %v7587_v44 }
 0x47a   :  { %4028 = vmatpush1.bf16.msra.mxu0 %v7588_v10 }
 0x47b   :  { %4030 = vmatprep.subr.bf16.mxu0 %v7589_v61 }
 0x47e   :  { %4032 = vmatpush1.bf16.msra.mxu0 %v7590_v39 }
 0x47f   :  { %4034 = vmatprep.subr.bf16.mxu0 %v7591_v12 }
 0x482   :  { %4036 = vmatpush1.bf16.msra.mxu0 %v7592_v51 }
 0x483   :  { %4166 = vmatprep.subr.bf16.mxu0 %v7559_v23 }
 0x4d8   :  { %v1716_v21 = vpop.f32.mrb[6].mxu0  ;;  %v1787_v58 = vpop.f32.mrb[38].mxu1 }
 0x4d9   :  { %v4749_v29 = vadd.f32 %v1716_v21, %v7593_v33  ;;  %v1718_v16 = vpop.f32.mrb[7].mxu0  ;;  %v1789_v38 = vpop.f32.mrb[39].mxu1  ;;  %v1889_v23 = vadd.f32 %v6201_v63, %v1787_v58  ;;  %v7595_v21 = vld [vmem:[#allocation86_spill] sm:$0xff]  ;;  %v7596_v58 = vld [vmem:[#allocation108_spill] sm:$0xff] }
 0x4da   :  { %v1897_v44 = vadd.f32 %v1789_v38, %v7594_v36  ;;  %v4750_v10 = vadd.f32 %v1718_v16, %v7473_v48 }
 0x4db   :  { %v3111_v27 = vmul.f32 -1.442695, %v4749_v29 }
 0x4dc   :  { %v3112_v61 = vmul.f32 -1.442695, %v4750_v10  ;;  %v3113_v38 = vmul.f32 -1.442695, %v1897_v44 }
 0x4dd   :  { %4836 = vpow2.f32 %v3111_v27 }
 0x4de   :  { %4838 = vpow2.f32 %v3112_v61 }
 0x4e7   :  { %v4837_v39 = vpop.eup %4836 }
 0x4e8   :  { %v1883_v12 = vadd.f32 1.0, %v4837_v39  ;;  %v4839_v51 = vpop.eup %4838  ;;  %v7597_v39 = vld [vmem:[#allocation103_spill] sm:$0xff] }
 0x4e9   :  { %v1884_v55 = vadd.f32 1.0, %v4839_v51 }
 0x4ea   :  { %4840 = vrcp.f32 %v1883_v12 }
 0x4eb   :  { %4842 = vrcp.f32 %v1884_v55 }
 0x4f4   :  { %v4841_v40 = vpop.eup %4840 }
 0x4f5   :  { %v1890_v62 = vmul.f32 %v4841_v40, %v1889_v23  ;;  %v4843_v29 = vpop.eup %4842 }
 0x4f6   :  { %v1893_v16 = vsub.f32 1.0, %v4843_v29  ;;  %v1895_v36 = vmul.f32 %v4843_v29, %v6451_v9  ;;  %v7616_v9 = vld [vmem:[#allocation65_spill] sm:$0xff] }
 0x4f7   :  { %v1891_v33 = vadd.f32 %v1890_v62, %v7595_v21 }
 0x4f9   :  { %4844 = vtanh.f32 %v1891_v33 }
 0x4fa   :  { %4846 = vpow2.f32 %v3113_v38 }
 0x503   :  { %v4845_v27 = vpop.eup %4844 }
 0x504   :  { %v1894_v10 = vmul.f32 %v4845_v27, %v1893_v16  ;;  %v4847_v12 = vpop.eup %4846 }
 0x505   :  { %v1905_v51 = vadd.f32 1.0, %v4847_v12 }
 0x506   :  { %v6567_v61 = vadd.f32 %v1895_v36, %v1894_v10 }
 0x507   :  { %4848 = vrcp.f32 %v1905_v51 }
 0x511   :  { %v4849_v33 = vpop.eup %4848 }
 0x518   :  { %v1858_v63 = vpop.f32.mrb[22].mxu0 }
 0x519   :  { %v1898_v40 = vadd.f32 %v1858_v63, %v7596_v58  ;;  %v1860_v55 = vpop.f32.mrb[23].mxu0  ;;  %v7599_v63 = vld [vmem:[#allocation47_spill] sm:$0xff]  ;;  %v7600_v58 = vld [vmem:[#allocation49_spill] sm:$0xff] }
 0x51a   :  { %v1911_v62 = vadd.f32 %v6216_v25, %v1860_v55  ;;  %v7598_v25 = vld [vmem:[#allocation71_spill] sm:$0xff]  ;;  %v7602_v55 = vld [vmem:[#allocation73_spill] sm:$0xff] }
 0x51b   :  { %v3114_v44 = vmul.f32 -1.442695, %v1898_v40  ;;  %v7601_v40 = vld [vmem:[#allocation72_spill] sm:$0xff] }
 0x51c   :  { %v1912_v23 = vmul.f32 %v4849_v33, %v1911_v62  ;;  %v7603_v62 = vld [vmem:[#allocation51_spill] sm:$0xff]  ;;  %v7604_v33 = vld [vmem:[#allocation53_spill] sm:$0xff] }
 0x51d   :  { %4850 = vpow2.f32 %v3114_v44  ;;  %v7605_v44 = vld [vmem:[#allocation74_spill] sm:$0xff] }
 0x51e   :  { %v1913_v21 = vadd.f32 %v1912_v23, %v7597_v39  ;;  %v7606_v23 = vld [vmem:[#allocation75_spill] sm:$0xff] }
 0x51f   :  { %v7607_v39 = vld [vmem:[#allocation55_spill] sm:$0xff] }
 0x527   :  { %v4851_v38 = vpop.eup %4850 }
 0x528   :  { %v1906_v16 = vadd.f32 1.0, %v4851_v38  ;;  %v7609_v38 = vld [vmem:[#allocation76_spill] sm:$0xff] }
 0x52a   :  { %4852 = vrcp.f32 %v1906_v16  ;;  %v7610_v16 = vld [vmem:[#allocation77_spill] sm:$0xff] }
 0x52b   :  { %4854 = vtanh.f32 %v1913_v21  ;;  %v7608_v21 = vld [vmem:[#allocation57_spill] sm:$0xff] }
 0x534   :  { %v4853_v29 = vpop.eup %4852 }
 0x535   :  { %v1915_v27 = vsub.f32 1.0, %v4853_v29  ;;  %v4855_v10 = vpop.eup %4854  ;;  %v1917_v12 = vmul.f32 %v4853_v29, %v6457_v54  ;;  %v7611_v29 = vld [vmem:[#allocation59_spill] sm:$0xff]  ;;  %v7617_v54 = vld [vmem:[#allocation80_spill] sm:$0xff] }
 0x537   :  { %v1916_v36 = vmul.f32 %v4855_v10, %v1915_v27  ;;  %v7612_v27 = vld [vmem:[#allocation61_spill] sm:$0xff]  ;;  %v7613_v10 = vld [vmem:[#allocation78_spill] sm:$0xff] }
 0x539   :  { %v6573_v51 = vadd.f32 %v1917_v12, %v1916_v36  ;;  %v7614_v36 = vld [vmem:[#allocation79_spill] sm:$0xff] }
 0x53a   :  { %v7615_v12 = vld [vmem:[#allocation63_spill] sm:$0xff] }
 0x53b   :  { %1987 = vmatprep.mubr.f32.mxu0 %v6573_v51  ;;  %2058 = vmatprep.mubr.f32.mxu1 %v6573_v51 }
 0x53c   :  { %1988 = vmatmul.mubr.f32.vlgmr.msra.gmra.mrb[8].mxu0 %v6567_v61  ;;  %2059 = vmatmul.mubr.f32.vlgmr.msra.gmra.mrb[40].mxu1 %v6567_v61 }
 0x53d   :  { %4104 = vmatpush1.bf16.msra.mxu1 %v5743_v5  ;;  %2129 = vmatprep.mubr.f32.mxu1 %v6573_v51 }
 0x53e   :  { %4106 = vmatprep.subr.bf16.mxu1 %v7417_v28  ;;  %4168 = vmatpush1.bf16.msra.mxu0 %v7562_v60  ;;  %v7648_v60 = vld [vmem:[#allocation62_spill] sm:$0xff] }
 0x53f   :  { %4170 = vmatprep.subr.bf16.mxu0 %v7563_v42  ;;  %v7647_v42 = vld [vmem:[#allocation60_spill] sm:$0xff] }
 0x541   :  { %4108 = vmatpush1.bf16.msra.mxu1 %v5764_v3 }
 0x542   :  { %4110 = vmatprep.subr.bf16.mxu1 %v5768_v47  ;;  %4172 = vmatpush1.bf16.msra.mxu0 %v7564_v7  ;;  %v7646_v7 = vld [vmem:[#allocation58_spill] sm:$0xff] }
 0x543   :  { %4174 = vmatprep.subr.bf16.mxu0 %v7565_v4  ;;  %v7645_v4 = vld [vmem:[#allocation56_spill] sm:$0xff] }
 0x545   :  { %4112 = vmatpush1.bf16.msra.mxu1 %v5785_v13 }
 0x546   :  { %4114 = vmatprep.subr.bf16.mxu1 %v5788_v35  ;;  %4176 = vmatpush1.bf16.msra.mxu0 %v7566_v2  ;;  %v7644_v2 = vld [vmem:[#allocation54_spill] sm:$0xff] }
 0x547   :  { %4178 = vmatprep.subr.bf16.mxu0 %v7567_v18  ;;  %v7643_v18 = vld [vmem:[#allocation52_spill] sm:$0xff] }
 0x549   :  { %4116 = vmatpush1.bf16.msra.mxu1 %v5805_v11 }
 0x54a   :  { %4118 = vmatprep.subr.bf16.mxu1 %v5808_v56  ;;  %4180 = vmatpush1.bf16.msra.mxu0 %v7568_v50  ;;  %v7642_v50 = vld [vmem:[#allocation50_spill] sm:$0xff] }
 0x54b   :  { %4182 = vmatprep.subr.bf16.mxu0 %v7569_v15  ;;  %v7641_v15 = vld [vmem:[#allocation48_spill] sm:$0xff] }
 0x54d   :  { %4120 = vmatpush1.bf16.msra.mxu1 %v5825_v45 }
 0x54e   :  { %4122 = vmatprep.subr.bf16.mxu1 %v5828_v17  ;;  %4184 = vmatpush1.bf16.msra.mxu0 %v7570_v14  ;;  %v7640_v14 = vld [vmem:[#allocation46_spill] sm:$0xff] }
 0x54f   :  { %4186 = vmatprep.subr.bf16.mxu0 %v7571_v43  ;;  %v7639_v43 = vld [vmem:[#allocation44_spill] sm:$0xff] }
 0x551   :  { %4124 = vmatpush1.bf16.msra.mxu1 %v5845_v57 }
 0x552   :  { %4126 = vmatprep.subr.bf16.mxu1 %v5848_v59  ;;  %4188 = vmatpush1.bf16.msra.mxu0 %v7572_v26  ;;  %v7638_v26 = vld [vmem:[#allocation42_spill] sm:$0xff] }
 0x553   :  { %4190 = vmatprep.subr.bf16.mxu0 %v7573_v22  ;;  %v7637_v22 = vld [vmem:[#allocation40_spill] sm:$0xff] }
 0x555   :  { %4128 = vmatpush1.bf16.msra.mxu1 %v5865_v6 }
 0x556   :  { %4130 = vmatprep.subr.bf16.mxu1 %v5868_v24  ;;  %4192 = vmatpush1.bf16.msra.mxu0 %v7574_v8  ;;  %v7636_v8 = vld [vmem:[#allocation38_spill] sm:$0xff] }
 0x557   :  { %4194 = vmatprep.subr.bf16.mxu0 %v7575_v0  ;;  %v7635_v0 = vld [vmem:[#allocation36_spill] sm:$0xff] }
 0x559   :  { %4132 = vmatpush1.bf16.msra.mxu1 %v5885_v19 }
 0x55a   :  { %4134 = vmatprep.subr.bf16.mxu1 %v5888_v41  ;;  %4196 = vmatpush1.bf16.msra.mxu0 %v7576_v52  ;;  %v7634_v52 = vld [vmem:[#allocation34_spill] sm:$0xff] }
 0x55b   :  { %4198 = vmatprep.subr.bf16.mxu0 %v7577_v49  ;;  %v7633_v49 = vld [vmem:[#allocation32_spill] sm:$0xff] }
 0x55d   :  { %4136 = vmatpush1.bf16.msra.mxu1 %v5905_v30 }
 0x55e   :  { %4138 = vmatprep.subr.bf16.mxu1 %v5908_v53  ;;  %4200 = vmatpush1.bf16.msra.mxu0 %v7578_v37  ;;  %v7632_v37 = vld [vmem:[#allocation30_spill] sm:$0xff] }
 0x55f   :  { %4202 = vmatprep.subr.bf16.mxu0 %v7579_v46  ;;  %v7631_v46 = vld [vmem:[#allocation28_spill] sm:$0xff] }
 0x561   :  { %4140 = vmatpush1.bf16.msra.mxu1 %v5925_v31 }
 0x562   :  { %4142 = vmatprep.subr.bf16.mxu1 %v5928_v1  ;;  %4204 = vmatpush1.bf16.msra.mxu0 %v7580_v34  ;;  %v7630_v34 = vld [vmem:[#allocation26_spill] sm:$0xff] }
 0x563   :  { %4206 = vmatprep.subr.bf16.mxu0 %v7581_v20  ;;  %v7628_v20 = vld [vmem:[#allocation22_spill] sm:$0xff] }
 0x565   :  { %4144 = vmatpush1.bf16.msra.mxu1 %v5945_v32 }
 0x566   :  { %4146 = vmatprep.subr.bf16.mxu1 %v7598_v25  ;;  %4208 = vmatpush1.bf16.msra.mxu0 %v7599_v63  ;;  %v7627_v63 = vld [vmem:[#allocation20_spill] sm:$0xff] }
 0x567   :  { %4210 = vmatprep.subr.bf16.mxu0 %v7600_v58  ;;  %v7624_v58 = vld [vmem:[#allocation14_spill] sm:$0xff] }
 0x569   :  { %4148 = vmatpush1.bf16.msra.mxu1 %v7601_v40 }
 0x56a   :  { %4150 = vmatprep.subr.bf16.mxu1 %v7602_v55  ;;  %4212 = vmatpush1.bf16.msra.mxu0 %v7603_v62  ;;  %v7623_v62 = vld [vmem:[#allocation12_spill] sm:$0xff] }
 0x56b   :  { %4214 = vmatprep.subr.bf16.mxu0 %v7604_v33  ;;  %v7620_v33 = vld [vmem:[#allocation69_spill] sm:$0xff] }
 0x56d   :  { %4152 = vmatpush1.bf16.msra.mxu1 %v7605_v44 }
 0x56e   :  { %4154 = vmatprep.subr.bf16.mxu1 %v7606_v23  ;;  %4216 = vmatpush1.bf16.msra.mxu0 %v7607_v39  ;;  %v7618_v39 = vld [vmem:[#allocation6_spill] sm:$0xff] }
 0x56f   :  { %4218 = vmatprep.subr.bf16.mxu0 %v7608_v21  ;;  %v7619_v21 = vld [vmem:[#allocation67_spill] sm:$0xff] }
 0x571   :  { %4156 = vmatpush1.bf16.msra.mxu1 %v7609_v38  ;;  %v7652_v38 = vld [vmem:[#allocation113_spill] sm:$0xff] }
 0x572   :  { %4158 = vmatprep.subr.bf16.mxu1 %v7610_v16  ;;  %4220 = vmatpush1.bf16.msra.mxu0 %v7611_v29  ;;  %v7621_v29 = vld [vmem:[#allocation8_spill] sm:$0xff] }
 0x573   :  { %4222 = vmatprep.subr.bf16.mxu0 %v7612_v27  ;;  %v7622_v27 = vld [vmem:[#allocation10_spill] sm:$0xff] }
 0x575   :  { %4160 = vmatpush1.bf16.msra.mxu1 %v7613_v10 }
 0x576   :  { %4162 = vmatprep.subr.bf16.mxu1 %v7614_v36  ;;  %4224 = vmatpush1.bf16.msra.mxu0 %v7615_v12  ;;  %v7625_v12 = vld [vmem:[#allocation16_spill] sm:$0xff] }
 0x577   :  { %4226 = vmatprep.subr.bf16.mxu0 %v7616_v9  ;;  %v7626_v9 = vld [vmem:[#allocation18_spill] sm:$0xff]  ;;  %v7651_v36 = vld [vmem:[#allocation68_spill] sm:$0xff] }
 0x579   :  { %4164 = vmatpush1.bf16.msra.mxu1 %v7617_v54  ;;  %v7650_v54 = vld [vmem:[#allocation66_spill] sm:$0xff] }
 0x57a   :  { %4230 = vmatprep.subr.bf16.mxu1 %v7618_v39  ;;  %4228 = vmatpush1.bf16.msra.mxu0 %v7619_v21  ;;  %v7629_v21 = vld [vmem:[#allocation24_spill] sm:$0xff] }
 0x57b   :  { %4294 = vmatprep.subr.bf16.mxu0 %v7620_v33  ;;  %v7649_v33 = vld [vmem:[#allocation64_spill] sm:$0xff] }
 0x57c   :  { %2130 = vmatmul.mubr.f32.vlgmr.msra.gmra.mrb[42].mxu1 %v6567_v61 }
 0x57d   :  { %4232 = vmatpush1.bf16.msra.mxu1 %v7621_v29 }
 0x57e   :  { %4234 = vmatprep.subr.bf16.mxu1 %v7622_v27 }
 0x581   :  { %4236 = vmatpush1.bf16.msra.mxu1 %v7623_v62 }
 0x582   :  { %4238 = vmatprep.subr.bf16.mxu1 %v7624_v58 }
 0x585   :  { %4240 = vmatpush1.bf16.msra.mxu1 %v7625_v12 }
 0x586   :  { %4242 = vmatprep.subr.bf16.mxu1 %v7626_v9 }
 0x589   :  { %4244 = vmatpush1.bf16.msra.mxu1 %v7627_v63 }
 0x58a   :  { %4246 = vmatprep.subr.bf16.mxu1 %v7628_v20 }
 0x58d   :  { %4248 = vmatpush1.bf16.msra.mxu1 %v7629_v21 }
 0x58e   :  { %4250 = vmatprep.subr.bf16.mxu1 %v7630_v34 }
 0x591   :  { %4252 = vmatpush1.bf16.msra.mxu1 %v7631_v46 }
 0x592   :  { %4254 = vmatprep.subr.bf16.mxu1 %v7632_v37 }
 0x595   :  { %4256 = vmatpush1.bf16.msra.mxu1 %v7633_v49 }
 0x596   :  { %4258 = vmatprep.subr.bf16.mxu1 %v7634_v52 }
 0x599   :  { %4260 = vmatpush1.bf16.msra.mxu1 %v7635_v0 }
 0x59a   :  { %4262 = vmatprep.subr.bf16.mxu1 %v7636_v8 }
 0x59d   :  { %4264 = vmatpush1.bf16.msra.mxu1 %v7637_v22 }
 0x59e   :  { %4266 = vmatprep.subr.bf16.mxu1 %v7638_v26 }
 0x5a1   :  { %4268 = vmatpush1.bf16.msra.mxu1 %v7639_v43 }
 0x5a2   :  { %4270 = vmatprep.subr.bf16.mxu1 %v7640_v14 }
 0x5a5   :  { %4272 = vmatpush1.bf16.msra.mxu1 %v7641_v15 }
 0x5a6   :  { %4274 = vmatprep.subr.bf16.mxu1 %v7642_v50 }
 0x5a9   :  { %4276 = vmatpush1.bf16.msra.mxu1 %v7643_v18 }
 0x5aa   :  { %4278 = vmatprep.subr.bf16.mxu1 %v7644_v2  ;;  %v7653_v2 = vld [vmem:[#allocation104_spill] sm:$0xff] }
 0x5ad   :  { %4280 = vmatpush1.bf16.msra.mxu1 %v7645_v4 }
 0x5ae   :  { %4282 = vmatprep.subr.bf16.mxu1 %v7646_v7 }
 0x5b1   :  { %4284 = vmatpush1.bf16.msra.mxu1 %v7647_v42 }
 0x5b2   :  { %4286 = vmatprep.subr.bf16.mxu1 %v7648_v60 }
 0x5b5   :  { %4288 = vmatpush1.bf16.msra.mxu1 %v7649_v33 }
 0x5b6   :  { %4290 = vmatprep.subr.bf16.mxu1 %v7650_v54 }
 0x5b9   :  { %4292 = vmatpush1.bf16.msra.mxu1 %v7651_v36 }
 0x5ba   :  { %4422 = vmatprep.subr.bf16.mxu1 %v7618_v39  ;;  %v6683_v39 = vld [vmem:[%s7037_s6] ss:$0 sm:$0xff] }
 0x5bb   :  { %7654 = vst [vmem:[#allocation112_spill] sm:$0xff] %v6683_v39 }
 0x60f   :  { %v1989_v10 = vpop.f32.mrb[8].mxu0  ;;  %v2060_v16 = vpop.f32.mrb[40].mxu1 }
 0x610   :  { %v4751_v23 = vadd.f32 %v1989_v10, %v7652_v38  ;;  %v1991_v44 = vpop.f32.mrb[9].mxu0  ;;  %v2062_v4 = vpop.f32.mrb[41].mxu1  ;;  %v2160_v10 = vadd.f32 %v6683_v39, %v2060_v16 }
 0x611   :  { %v2168_v7 = vadd.f32 %v2062_v4, %v7653_v2  ;;  %v4752_v42 = vadd.f32 %v1991_v44, %v7473_v48  ;;  %v7655_v2 = vld [vmem:[#allocation89_spill] sm:$0xff] }
 0x612   :  { %v3116_v18 = vmul.f32 -1.442695, %v4751_v23 }
 0x613   :  { %v3117_v60 = vmul.f32 -1.442695, %v4752_v42 }
 0x614   :  { %4856 = vpow2.f32 %v3116_v18  ;;  %v3118_v18 = vmul.f32 -1.442695, %v2168_v7 }
 0x615   :  { %4858 = vpow2.f32 %v3117_v60 }
 0x61e   :  { %v4857_v33 = vpop.eup %4856 }
 0x61f   :  { %v2154_v54 = vadd.f32 1.0, %v4857_v33  ;;  %v4859_v36 = vpop.eup %4858 }
 0x620   :  { %v2155_v55 = vadd.f32 1.0, %v4859_v36 }
 0x621   :  { %4860 = vrcp.f32 %v2154_v54 }
 0x622   :  { %4862 = vrcp.f32 %v2155_v55 }
 0x62b   :  { %v4861_v38 = vpop.eup %4860 }
 0x62c   :  { %v2161_v4 = vmul.f32 %v4861_v38, %v2160_v10  ;;  %v4863_v60 = vpop.eup %4862  ;;  %v7656_v38 = vld [vmem:[#allocation105_spill] sm:$0xff] }
 0x62d   :  { %v2164_v42 = vsub.f32 1.0, %v4863_v60  ;;  %v2166_v23 = vmul.f32 %v4863_v60, %v6567_v61 }
 0x62e   :  { %v2162_v44 = vadd.f32 %v2161_v4, %v7655_v2  ;;  %v6699_v2 = vld [vmem:[%s7039_s7] ss:$0 sm:$0xff] }
 0x630   :  { %4864 = vtanh.f32 %v2162_v44 }
 0x631   :  { %4866 = vpow2.f32 %v3118_v18 }
 0x63a   :  { %v4865_v54 = vpop.eup %4864 }
 0x63b   :  { %v2165_v33 = vmul.f32 %v4865_v54, %v2164_v42  ;;  %v4867_v16 = vpop.eup %4866  ;;  %v7657_v54 = vld [vmem:[#allocation97_spill] sm:$0xff] }
 0x63c   :  { %v2176_v55 = vadd.f32 1.0, %v4867_v16 }
 0x63d   :  { %v6688_v36 = vadd.f32 %v2166_v23, %v2165_v33 }
 0x63e   :  { %4868 = vrcp.f32 %v2176_v55 }
 0x63f   :  { %v3026_v48 = vadd.f32 %v6688_v36, %v6573_v51 }
 0x641   :  { %3034 = vst [vmem:[%s7038_s8 + $0x20] sm:$0xff] %v3026_v48 }
 0x648   :  { %v4869_v18 = vpop.eup %4868 }
 0x64f   :  { %v2131_v7 = vpop.f32.mrb[42].mxu1 }
 0x650   :  { %v2169_v10 = vadd.f32 %v2131_v7, %v7656_v38  ;;  %v2133_v4 = vpop.f32.mrb[43].mxu1 }
 0x651   :  { %v2182_v44 = vadd.f32 %v6699_v2, %v2133_v4  ;;  %v7661_v4 = vld [vmem:[#allocation54_spill] sm:$0xff] }
 0x652   :  { %v3119_v60 = vmul.f32 -1.442695, %v2169_v10 }
 0x653   :  { %v2183_v42 = vmul.f32 %v4869_v18, %v2182_v44  ;;  %v7662_v44 = vld [vmem:[#allocation74_spill] sm:$0xff]  ;;  %v7663_v18 = vld [vmem:[#allocation75_spill] sm:$0xff] }
 0x654   :  { %4870 = vpow2.f32 %v3119_v60  ;;  %v7664_v60 = vld [vmem:[#allocation56_spill] sm:$0xff] }
 0x655   :  { %v2184_v33 = vadd.f32 %v2183_v42, %v7657_v54  ;;  %v7665_v42 = vld [vmem:[#allocation58_spill] sm:$0xff]  ;;  %v7666_v54 = vld [vmem:[#allocation76_spill] sm:$0xff] }
 0x65e   :  { %v4871_v48 = vpop.eup %4870 }
 0x65f   :  { %v2177_v23 = vadd.f32 1.0, %v4871_v48  ;;  %v7668_v48 = vld [vmem:[#allocation60_spill] sm:$0xff] }
 0x661   :  { %4872 = vrcp.f32 %v2177_v23  ;;  %v7669_v23 = vld [vmem:[#allocation62_spill] sm:$0xff] }
 0x662   :  { %4874 = vtanh.f32 %v2184_v33  ;;  %v7667_v33 = vld [vmem:[#allocation77_spill] sm:$0xff] }
 0x66b   :  { %v4873_v16 = vpop.eup %4872 }
 0x66c   :  { %v2186_v55 = vsub.f32 1.0, %v4873_v16  ;;  %v4875_v7 = vpop.eup %4874  ;;  %v2188_v39 = vmul.f32 %v4873_v16, %v6573_v51  ;;  %v7659_v51 = vld [vmem:[#allocation73_spill] sm:$0xff]  ;;  %v7670_v16 = vld [vmem:[#allocation78_spill] sm:$0xff] }
 0x66e   :  { %v2187_v38 = vmul.f32 %v4875_v7, %v2186_v55  ;;  %v7671_v55 = vld [vmem:[#allocation79_spill] sm:$0xff]  ;;  %v7672_v7 = vld [vmem:[#allocation64_spill] sm:$0xff] }
 0x670   :  { %v6704_v40 = vadd.f32 %v2188_v39, %v2187_v38  ;;  %v7660_v39 = vld [vmem:[#allocation52_spill] sm:$0xff]  ;;  %v7673_v38 = vld [vmem:[#allocation66_spill] sm:$0xff] }
 0x672   :  { %2258 = vmatprep.mubr.f32.mxu0 %v6704_v40  ;;  %v3025_v10 = vadd.f32 %v6704_v40, %v6567_v61  ;;  %2329 = vmatprep.mubr.f32.mxu1 %v6704_v40  ;;  %v7658_v61 = vld [vmem:[#allocation72_spill] sm:$0xff] }
 0x673   :  { %2259 = vmatmul.mubr.f32.vlgmr.msra.gmra.mrb[10].mxu0 %v6688_v36  ;;  %2330 = vmatmul.mubr.f32.vlgmr.msra.gmra.mrb[44].mxu1 %v6688_v36 }
 0x674   :  { %3033 = vst [vmem:[%s7038_s8 + $0x18] sm:$0xff] %v3025_v10  ;;  %4296 = vmatpush1.bf16.msra.mxu0 %v5743_v5  ;;  %2400 = vmatprep.mubr.f32.mxu0 %v6704_v40  ;;  %v7674_v10 = vld [vmem:[#allocation80_spill] sm:$0xff] }
 0x675   :  { %4298 = vmatprep.subr.bf16.mxu0 %v7417_v28  ;;  %4424 = vmatpush1.bf16.msra.mxu1 %v7621_v29  ;;  %v7705_v29 = vld [vmem:[#allocation61_spill] sm:$0xff] }
 0x676   :  { %4426 = vmatprep.subr.bf16.mxu1 %v7622_v27  ;;  %v7704_v27 = vld [vmem:[#allocation59_spill] sm:$0xff] }
 0x678   :  { %4300 = vmatpush1.bf16.msra.mxu0 %v5764_v3 }
 0x679   :  { %4302 = vmatprep.subr.bf16.mxu0 %v5768_v47  ;;  %4428 = vmatpush1.bf16.msra.mxu1 %v7623_v62  ;;  %v7703_v62 = vld [vmem:[#allocation57_spill] sm:$0xff] }
 0x67a   :  { %4430 = vmatprep.subr.bf16.mxu1 %v7624_v58  ;;  %v7702_v58 = vld [vmem:[#allocation55_spill] sm:$0xff] }
 0x67c   :  { %4304 = vmatpush1.bf16.msra.mxu0 %v5785_v13 }
 0x67d   :  { %4306 = vmatprep.subr.bf16.mxu0 %v5788_v35  ;;  %4432 = vmatpush1.bf16.msra.mxu1 %v7625_v12  ;;  %v7701_v12 = vld [vmem:[#allocation53_spill] sm:$0xff] }
 0x67e   :  { %4434 = vmatprep.subr.bf16.mxu1 %v7626_v9  ;;  %v7700_v9 = vld [vmem:[#allocation51_spill] sm:$0xff] }
 0x680   :  { %4308 = vmatpush1.bf16.msra.mxu0 %v5805_v11 }
 0x681   :  { %4310 = vmatprep.subr.bf16.mxu0 %v5808_v56  ;;  %4436 = vmatpush1.bf16.msra.mxu1 %v7627_v63  ;;  %v7699_v63 = vld [vmem:[#allocation49_spill] sm:$0xff] }
 0x682   :  { %4438 = vmatprep.subr.bf16.mxu1 %v7628_v20  ;;  %v7698_v20 = vld [vmem:[#allocation47_spill] sm:$0xff] }
 0x684   :  { %4312 = vmatpush1.bf16.msra.mxu0 %v5825_v45 }
 0x685   :  { %4314 = vmatprep.subr.bf16.mxu0 %v5828_v17  ;;  %4440 = vmatpush1.bf16.msra.mxu1 %v7629_v21  ;;  %v7697_v21 = vld [vmem:[#allocation45_spill] sm:$0xff] }
 0x686   :  { %4442 = vmatprep.subr.bf16.mxu1 %v7630_v34  ;;  %v7696_v34 = vld [vmem:[#allocation43_spill] sm:$0xff] }
 0x688   :  { %4316 = vmatpush1.bf16.msra.mxu0 %v5845_v57 }
 0x689   :  { %4318 = vmatprep.subr.bf16.mxu0 %v5848_v59  ;;  %4444 = vmatpush1.bf16.msra.mxu1 %v7631_v46  ;;  %v7695_v46 = vld [vmem:[#allocation41_spill] sm:$0xff] }
 0x68a   :  { %4446 = vmatprep.subr.bf16.mxu1 %v7632_v37  ;;  %v7694_v37 = vld [vmem:[#allocation39_spill] sm:$0xff] }
 0x68c   :  { %4320 = vmatpush1.bf16.msra.mxu0 %v5865_v6 }
 0x68d   :  { %4322 = vmatprep.subr.bf16.mxu0 %v5868_v24  ;;  %4448 = vmatpush1.bf16.msra.mxu1 %v7633_v49  ;;  %v7693_v49 = vld [vmem:[#allocation37_spill] sm:$0xff] }
 0x68e   :  { %4450 = vmatprep.subr.bf16.mxu1 %v7634_v52  ;;  %v7692_v52 = vld [vmem:[#allocation35_spill] sm:$0xff] }
 0x690   :  { %4324 = vmatpush1.bf16.msra.mxu0 %v5885_v19 }
 0x691   :  { %4326 = vmatprep.subr.bf16.mxu0 %v5888_v41  ;;  %4452 = vmatpush1.bf16.msra.mxu1 %v7635_v0  ;;  %v7691_v0 = vld [vmem:[#allocation33_spill] sm:$0xff] }
 0x692   :  { %4454 = vmatprep.subr.bf16.mxu1 %v7636_v8  ;;  %v7690_v8 = vld [vmem:[#allocation31_spill] sm:$0xff] }
 0x694   :  { %4328 = vmatpush1.bf16.msra.mxu0 %v5905_v30 }
 0x695   :  { %4330 = vmatprep.subr.bf16.mxu0 %v5908_v53  ;;  %4456 = vmatpush1.bf16.msra.mxu1 %v7637_v22  ;;  %v7689_v22 = vld [vmem:[#allocation29_spill] sm:$0xff] }
 0x696   :  { %4458 = vmatprep.subr.bf16.mxu1 %v7638_v26  ;;  %v7688_v26 = vld [vmem:[#allocation27_spill] sm:$0xff] }
 0x698   :  { %4332 = vmatpush1.bf16.msra.mxu0 %v5925_v31 }
 0x699   :  { %4334 = vmatprep.subr.bf16.mxu0 %v5928_v1  ;;  %4460 = vmatpush1.bf16.msra.mxu1 %v7639_v43  ;;  %v7687_v43 = vld [vmem:[#allocation25_spill] sm:$0xff] }
 0x69a   :  { %4462 = vmatprep.subr.bf16.mxu1 %v7640_v14  ;;  %v7685_v14 = vld [vmem:[#allocation21_spill] sm:$0xff] }
 0x69c   :  { %4336 = vmatpush1.bf16.msra.mxu0 %v5945_v32 }
 0x69d   :  { %4338 = vmatprep.subr.bf16.mxu0 %v7598_v25  ;;  %4464 = vmatpush1.bf16.msra.mxu1 %v7641_v15  ;;  %v7684_v15 = vld [vmem:[#allocation19_spill] sm:$0xff] }
 0x69e   :  { %4466 = vmatprep.subr.bf16.mxu1 %v7642_v50  ;;  %v7681_v50 = vld [vmem:[#allocation13_spill] sm:$0xff] }
 0x6a0   :  { %4340 = vmatpush1.bf16.msra.mxu0 %v7658_v61 }
 0x6a1   :  { %4342 = vmatprep.subr.bf16.mxu0 %v7659_v51  ;;  %4468 = vmatpush1.bf16.msra.mxu1 %v7660_v39  ;;  %v7680_v39 = vld [vmem:[#allocation11_spill] sm:$0xff] }
 0x6a2   :  { %4470 = vmatprep.subr.bf16.mxu1 %v7661_v4  ;;  %v7677_v4 = vld [vmem:[#allocation69_spill] sm:$0xff] }
 0x6a4   :  { %4344 = vmatpush1.bf16.msra.mxu0 %v7662_v44 }
 0x6a5   :  { %4346 = vmatprep.subr.bf16.mxu0 %v7663_v18  ;;  %4472 = vmatpush1.bf16.msra.mxu1 %v7664_v60  ;;  %v7675_v60 = vld [vmem:[#allocation5_spill] sm:$0xff] }
 0x6a6   :  { %4474 = vmatprep.subr.bf16.mxu1 %v7665_v42  ;;  %v7676_v42 = vld [vmem:[#allocation68_spill] sm:$0xff] }
 0x6a8   :  { %4348 = vmatpush1.bf16.msra.mxu0 %v7666_v54  ;;  %v7709_v54 = vld [vmem:[#allocation113_spill] sm:$0xff] }
 0x6a9   :  { %4350 = vmatprep.subr.bf16.mxu0 %v7667_v33  ;;  %4476 = vmatpush1.bf16.msra.mxu1 %v7668_v48  ;;  %v7678_v48 = vld [vmem:[#allocation7_spill] sm:$0xff] }
 0x6aa   :  { %4478 = vmatprep.subr.bf16.mxu1 %v7669_v23  ;;  %v7679_v23 = vld [vmem:[#allocation9_spill] sm:$0xff] }
 0x6ac   :  { %4352 = vmatpush1.bf16.msra.mxu0 %v7670_v16 }
 0x6ad   :  { %4354 = vmatprep.subr.bf16.mxu0 %v7671_v55  ;;  %4480 = vmatpush1.bf16.msra.mxu1 %v7672_v7  ;;  %v7682_v7 = vld [vmem:[#allocation15_spill] sm:$0xff] }
 0x6ae   :  { %4482 = vmatprep.subr.bf16.mxu1 %v7673_v38  ;;  %v7683_v38 = vld [vmem:[#allocation17_spill] sm:$0xff]  ;;  %v7708_v55 = vld [vmem:[#allocation67_spill] sm:$0xff] }
 0x6b0   :  { %4356 = vmatpush1.bf16.msra.mxu0 %v7674_v10  ;;  %v7707_v10 = vld [vmem:[#allocation65_spill] sm:$0xff] }
 0x6b1   :  { %4358 = vmatprep.subr.bf16.mxu0 %v7675_v60  ;;  %4484 = vmatpush1.bf16.msra.mxu1 %v7676_v42  ;;  %v7686_v42 = vld [vmem:[#allocation23_spill] sm:$0xff] }
 0x6b2   :  { %4486 = vmatprep.subr.bf16.mxu1 %v7677_v4  ;;  %v7706_v4 = vld [vmem:[#allocation63_spill] sm:$0xff] }
 0x6b3   :  { %2401 = vmatmul.mubr.f32.vlgmr.msra.gmra.mrb[24].mxu0 %v6688_v36 }
 0x6b4   :  { %4360 = vmatpush1.bf16.msra.mxu0 %v7678_v48 }
 0x6b5   :  { %4362 = vmatprep.subr.bf16.mxu0 %v7679_v23 }
 0x6b8   :  { %4364 = vmatpush1.bf16.msra.mxu0 %v7680_v39 }
 0x6b9   :  { %4366 = vmatprep.subr.bf16.mxu0 %v7681_v50 }
 0x6bc   :  { %4368 = vmatpush1.bf16.msra.mxu0 %v7682_v7 }
 0x6bd   :  { %4370 = vmatprep.subr.bf16.mxu0 %v7683_v38 }
 0x6c0   :  { %4372 = vmatpush1.bf16.msra.mxu0 %v7684_v15 }
 0x6c1   :  { %4374 = vmatprep.subr.bf16.mxu0 %v7685_v14 }
 0x6c4   :  { %4376 = vmatpush1.bf16.msra.mxu0 %v7686_v42 }
 0x6c5   :  { %4378 = vmatprep.subr.bf16.mxu0 %v7687_v43 }
 0x6c8   :  { %4380 = vmatpush1.bf16.msra.mxu0 %v7688_v26 }
 0x6c9   :  { %4382 = vmatprep.subr.bf16.mxu0 %v7689_v22 }
 0x6cc   :  { %4384 = vmatpush1.bf16.msra.mxu0 %v7690_v8 }
 0x6cd   :  { %4386 = vmatprep.subr.bf16.mxu0 %v7691_v0 }
 0x6d0   :  { %4388 = vmatpush1.bf16.msra.mxu0 %v7692_v52 }
 0x6d1   :  { %4390 = vmatprep.subr.bf16.mxu0 %v7693_v49 }
 0x6d4   :  { %4392 = vmatpush1.bf16.msra.mxu0 %v7694_v37 }
 0x6d5   :  { %4394 = vmatprep.subr.bf16.mxu0 %v7695_v46 }
 0x6d8   :  { %4396 = vmatpush1.bf16.msra.mxu0 %v7696_v34 }
 0x6d9   :  { %4398 = vmatprep.subr.bf16.mxu0 %v7697_v21 }
 0x6dc   :  { %4400 = vmatpush1.bf16.msra.mxu0 %v7698_v20 }
 0x6dd   :  { %4402 = vmatprep.subr.bf16.mxu0 %v7699_v63 }
 0x6e0   :  { %4404 = vmatpush1.bf16.msra.mxu0 %v7700_v9 }
 0x6e1   :  { %4406 = vmatprep.subr.bf16.mxu0 %v7701_v12  ;;  %v7710_v12 = vld [vmem:[#allocation100_spill] sm:$0xff] }
 0x6e4   :  { %4408 = vmatpush1.bf16.msra.mxu0 %v7702_v58 }
 0x6e5   :  { %4410 = vmatprep.subr.bf16.mxu0 %v7703_v62 }
 0x6e8   :  { %4412 = vmatpush1.bf16.msra.mxu0 %v7704_v27  ;;  %v7711_v27 = vld [vmem:[#allocation114_spill] sm:$0xff] }
 0x6e9   :  { %4414 = vmatprep.subr.bf16.mxu0 %v7705_v29 }
 0x6ec   :  { %4416 = vmatpush1.bf16.msra.mxu0 %v7706_v4 }
 0x6ed   :  { %4418 = vmatprep.subr.bf16.mxu0 %v7707_v10 }
 0x6f0   :  { %4420 = vmatpush1.bf16.msra.mxu0 %v7708_v55 }
 0x6f1   :  { %4550 = vmatprep.subr.bf16.mxu0 %v7675_v60  ;;  %v7712_v60 = vld [vmem:[#allocation112_spill] sm:$0xff] }
 0x746   :  { %v2260_v16 = vpop.f32.mrb[10].mxu0  ;;  %v2331_v33 = vpop.f32.mrb[44].mxu1 }
 0x747   :  { %v4753_v18 = vadd.f32 %v2260_v16, %v7709_v54  ;;  %v2262_v44 = vpop.f32.mrb[11].mxu0  ;;  %v2333_v58 = vpop.f32.mrb[45].mxu1  ;;  %v2431_v63 = vadd.f32 %v7712_v60, %v2331_v33  ;;  %v7713_v16 = vld [vmem:[#allocation88_spill] sm:$0xff] }
 0x748   :  { %v2439_v62 = vadd.f32 %v2333_v58, %v7710_v12  ;;  %v4754_v51 = vadd.f32 %v2262_v44, %v7711_v27 }
 0x749   :  { %v3121_v9 = vmul.f32 -1.442695, %v4753_v18  ;;  %v7714_v18 = vld [vmem:[#allocation85_spill] sm:$0xff] }
 0x74a   :  { %v3122_v29 = vmul.f32 -1.442695, %v4754_v51  ;;  %v3123_v58 = vmul.f32 -1.442695, %v2439_v62 }
 0x74b   :  { %4876 = vpow2.f32 %v3121_v9 }
 0x74c   :  { %4878 = vpow2.f32 %v3122_v29 }
 0x755   :  { %v4877_v4 = vpop.eup %4876 }
 0x756   :  { %v2425_v10 = vadd.f32 1.0, %v4877_v4  ;;  %v4879_v55 = vpop.eup %4878 }
 0x757   :  { %v2426_v61 = vadd.f32 1.0, %v4879_v55 }
 0x758   :  { %4880 = vrcp.f32 %v2425_v10 }
 0x759   :  { %4882 = vrcp.f32 %v2426_v61 }
 0x762   :  { %v4881_v20 = vpop.eup %4880 }
 0x763   :  { %v2432_v25 = vmul.f32 %v4881_v20, %v2431_v63  ;;  %v4883_v12 = vpop.eup %4882  ;;  %v7715_v63 = vld [vmem:[#allocation102_spill] sm:$0xff] }
 0x764   :  { %v2435_v44 = vsub.f32 1.0, %v4883_v12  ;;  %v2437_v29 = vmul.f32 %v4883_v12, %v6688_v36 }
 0x765   :  { %v2433_v54 = vadd.f32 %v2432_v25, %v7713_v16 }
 0x767   :  { %4884 = vtanh.f32 %v2433_v54 }
 0x768   :  { %4886 = vpow2.f32 %v3123_v58  ;;  %v7716_v58 = vld [vmem:[#allocation99_spill] sm:$0xff] }
 0x771   :  { %v4885_v9 = vpop.eup %4884 }
 0x772   :  { %v2436_v51 = vmul.f32 %v4885_v9, %v2435_v44  ;;  %v4887_v33 = vpop.eup %4886 }
 0x773   :  { %v2447_v20 = vadd.f32 1.0, %v4887_v33 }
 0x774   :  { %v6819_v4 = vadd.f32 %v2437_v29, %v2436_v51 }
 0x775   :  { %4888 = vrcp.f32 %v2447_v20 }
 0x776   :  { %v3027_v55 = vadd.f32 %v6819_v4, %v7714_v18 }
 0x778   :  { %3035 = vst [vmem:[%s7038_s8 + $0x28] sm:$0xff] %v3027_v55 }
 0x77f   :  { %v4889_v10 = vpop.eup %4888 }
 0x786   :  { %v2402_v25 = vpop.f32.mrb[24].mxu0 }
 0x787   :  { %v2440_v62 = vadd.f32 %v2402_v25, %v7715_v63  ;;  %v2404_v61 = vpop.f32.mrb[25].mxu0  ;;  %v7717_v25 = vld [vmem:[#allocation111_spill] sm:$0xff] }
 0x788   :  { %v2453_v54 = vadd.f32 %v6699_v2, %v2404_v61  ;;  %v7740_v61 = vld [vmem:[#allocation69_spill] sm:$0xff] }
 0x789   :  { %v3124_v36 = vmul.f32 -1.442695, %v2440_v62  ;;  %v7739_v62 = vld [vmem:[#allocation67_spill] sm:$0xff] }
 0x78a   :  { %v2454_v16 = vmul.f32 %v4889_v10, %v2453_v54  ;;  %v7741_v54 = vld [vmem:[#allocation8_spill] sm:$0xff]  ;;  %v7742_v10 = vld [vmem:[#allocation10_spill] sm:$0xff] }
 0x78b   :  { %4890 = vpow2.f32 %v3124_v36  ;;  %v7743_v36 = vld [vmem:[#allocation12_spill] sm:$0xff] }
 0x78c   :  { %v2455_v12 = vadd.f32 %v2454_v16, %v7716_v58  ;;  %v7744_v16 = vld [vmem:[#allocation14_spill] sm:$0xff]  ;;  %v7745_v58 = vld [vmem:[#allocation16_spill] sm:$0xff] }
 0x795   :  { %v4891_v44 = vpop.eup %4890 }
 0x796   :  { %v2448_v9 = vadd.f32 1.0, %v4891_v44  ;;  %v7747_v44 = vld [vmem:[#allocation20_spill] sm:$0xff] }
 0x798   :  { %4892 = vrcp.f32 %v2448_v9  ;;  %v7748_v9 = vld [vmem:[#allocation22_spill] sm:$0xff] }
 0x799   :  { %4894 = vtanh.f32 %v2455_v12  ;;  %v7746_v12 = vld [vmem:[#allocation18_spill] sm:$0xff] }
 0x7a2   :  { %v4893_v51 = vpop.eup %4892 }
 0x7a3   :  { %v2457_v29 = vsub.f32 1.0, %v4893_v51  ;;  %v4895_v18 = vpop.eup %4894  ;;  %v2459_v33 = vmul.f32 %v4893_v51, %v6704_v40  ;;  %v7731_v40 = vld [vmem:[#allocation59_spill] sm:$0xff]  ;;  %v7749_v51 = vld [vmem:[#allocation24_spill] sm:$0xff] }
 0x7a5   :  { %v2458_v55 = vmul.f32 %v4895_v18, %v2457_v29  ;;  %v7750_v29 = vld [vmem:[#allocation26_spill] sm:$0xff]  ;;  %v7751_v18 = vld [vmem:[#allocation28_spill] sm:$0xff] }
 0x7a7   :  { %v6830_v20 = vadd.f32 %v2459_v33, %v2458_v55  ;;  %v7752_v55 = vld [vmem:[#allocation30_spill] sm:$0xff]  ;;  %v7753_v33 = vld [vmem:[#allocation32_spill] sm:$0xff] }
 0x7a9   :  { %2529 = vmatprep.mubr.f32.mxu0 %v6830_v20  ;;  %v3024_v63 = vadd.f32 %v6830_v20, %v7717_v25  ;;  %2600 = vmatprep.mubr.f32.mxu1 %v6830_v20  ;;  %v7754_v25 = vld [vmem:[#allocation34_spill] sm:$0xff] }
 0x7aa   :  { %2530 = vmatmul.mubr.f32.vlgmr.msra.gmra.mrb[26].mxu0 %v6819_v4  ;;  %2601 = vmatmul.mubr.f32.vlgmr.msra.gmra.mrb[46].mxu1 %v6819_v4 }
 0x7ab   :  { %3032 = vst [vmem:[%s7038_s8 + $0x10] sm:$0xff] %v3024_v63  ;;  %4488 = vmatpush1.bf16.msra.mxu1 %v5743_v5  ;;  %2671 = vmatprep.mubr.f32.mxu1 %v6830_v20  ;;  %v7755_v63 = vld [vmem:[#allocation36_spill] sm:$0xff] }
 0x7ac   :  { %4490 = vmatprep.subr.bf16.mxu1 %v7417_v28  ;;  %4552 = vmatpush1.bf16.msra.mxu0 %v7678_v48  ;;  %v7735_v48 = vld [vmem:[#allocation63_spill] sm:$0xff] }
 0x7ad   :  { %4554 = vmatprep.subr.bf16.mxu0 %v7679_v23  ;;  %v7736_v23 = vld [vmem:[#allocation65_spill] sm:$0xff] }
 0x7af   :  { %4492 = vmatpush1.bf16.msra.mxu1 %v5764_v3 }
 0x7b0   :  { %4494 = vmatprep.subr.bf16.mxu1 %v5768_v47  ;;  %4556 = vmatpush1.bf16.msra.mxu0 %v7680_v39  ;;  %v7733_v39 = vld [vmem:[#allocation78_spill] sm:$0xff] }
 0x7b1   :  { %4558 = vmatprep.subr.bf16.mxu0 %v7681_v50  ;;  %v7727_v50 = vld [vmem:[#allocation55_spill] sm:$0xff] }
 0x7b3   :  { %4496 = vmatpush1.bf16.msra.mxu1 %v5785_v13 }
 0x7b4   :  { %4498 = vmatprep.subr.bf16.mxu1 %v5788_v35  ;;  %4560 = vmatpush1.bf16.msra.mxu0 %v7682_v7  ;;  %v7737_v7 = vld [vmem:[#allocation80_spill] sm:$0xff] }
 0x7b5   :  { %4562 = vmatprep.subr.bf16.mxu0 %v7683_v38  ;;  %v7738_v38 = vld [vmem:[#allocation6_spill] sm:$0xff] }
 0x7b7   :  { %4500 = vmatpush1.bf16.msra.mxu1 %v5805_v11 }
 0x7b8   :  { %4502 = vmatprep.subr.bf16.mxu1 %v5808_v56  ;;  %4564 = vmatpush1.bf16.msra.mxu0 %v7684_v15  ;;  %v7728_v15 = vld [vmem:[#allocation57_spill] sm:$0xff] }
 0x7b9   :  { %4566 = vmatprep.subr.bf16.mxu0 %v7685_v14  ;;  %v7730_v14 = vld [vmem:[#allocation77_spill] sm:$0xff] }
 0x7bb   :  { %4504 = vmatpush1.bf16.msra.mxu1 %v5825_v45 }
 0x7bc   :  { %4506 = vmatprep.subr.bf16.mxu1 %v5828_v17  ;;  %4568 = vmatpush1.bf16.msra.mxu0 %v7686_v42  ;;  %v7734_v42 = vld [vmem:[#allocation79_spill] sm:$0xff] }
 0x7bd   :  { %4570 = vmatprep.subr.bf16.mxu0 %v7687_v43  ;;  %v7725_v43 = vld [vmem:[#allocation74_spill] sm:$0xff] }
 0x7bf   :  { %4508 = vmatpush1.bf16.msra.mxu1 %v5845_v57 }
 0x7c0   :  { %4510 = vmatprep.subr.bf16.mxu1 %v5848_v59  ;;  %4572 = vmatpush1.bf16.msra.mxu0 %v7688_v26  ;;  %v7724_v26 = vld [vmem:[#allocation53_spill] sm:$0xff] }
 0x7c1   :  { %4574 = vmatprep.subr.bf16.mxu0 %v7689_v22  ;;  %v7723_v22 = vld [vmem:[#allocation51_spill] sm:$0xff] }
 0x7c3   :  { %4512 = vmatpush1.bf16.msra.mxu1 %v5865_v6 }
 0x7c4   :  { %4514 = vmatprep.subr.bf16.mxu1 %v5868_v24  ;;  %4576 = vmatpush1.bf16.msra.mxu0 %v7690_v8  ;;  %v7721_v8 = vld [vmem:[#allocation72_spill] sm:$0xff] }
 0x7c5   :  { %4578 = vmatprep.subr.bf16.mxu0 %v7691_v0  ;;  %v7720_v0 = vld [vmem:[#allocation49_spill] sm:$0xff] }
 0x7c7   :  { %4516 = vmatpush1.bf16.msra.mxu1 %v5885_v19 }
 0x7c8   :  { %4518 = vmatprep.subr.bf16.mxu1 %v5888_v41  ;;  %4580 = vmatpush1.bf16.msra.mxu0 %v7692_v52  ;;  %v7718_v52 = vld [vmem:[#allocation71_spill] sm:$0xff] }
 0x7c9   :  { %4582 = vmatprep.subr.bf16.mxu0 %v7693_v49  ;;  %v7719_v49 = vld [vmem:[#allocation47_spill] sm:$0xff] }
 0x7cb   :  { %4520 = vmatpush1.bf16.msra.mxu1 %v5905_v30 }
 0x7cc   :  { %4522 = vmatprep.subr.bf16.mxu1 %v5908_v53  ;;  %4584 = vmatpush1.bf16.msra.mxu0 %v7694_v37  ;;  %v7722_v37 = vld [vmem:[#allocation73_spill] sm:$0xff] }
 0x7cd   :  { %4586 = vmatprep.subr.bf16.mxu0 %v7695_v46  ;;  %v7729_v46 = vld [vmem:[#allocation76_spill] sm:$0xff] }
 0x7cf   :  { %4524 = vmatpush1.bf16.msra.mxu1 %v5925_v31 }
 0x7d0   :  { %4526 = vmatprep.subr.bf16.mxu1 %v5928_v1  ;;  %4588 = vmatpush1.bf16.msra.mxu0 %v7696_v34  ;;  %v7726_v34 = vld [vmem:[#allocation75_spill] sm:$0xff] }
 0x7d1   :  { %4590 = vmatprep.subr.bf16.mxu0 %v7697_v21  ;;  %v7732_v21 = vld [vmem:[#allocation61_spill] sm:$0xff] }
 0x7d3   :  { %4528 = vmatpush1.bf16.msra.mxu1 %v5945_v32 }
 0x7d4   :  { %4530 = vmatprep.subr.bf16.mxu1 %v7718_v52  ;;  %4592 = vmatpush1.bf16.msra.mxu0 %v7719_v49  ;;  %v7756_v49 = vld [vmem:[#allocation38_spill] sm:$0xff] }
 0x7d5   :  { %4594 = vmatprep.subr.bf16.mxu0 %v7720_v0  ;;  %v7757_v0 = vld [vmem:[#allocation40_spill] sm:$0xff] }
 0x7d7   :  { %4532 = vmatpush1.bf16.msra.mxu1 %v7721_v8 }
 0x7d8   :  { %4534 = vmatprep.subr.bf16.mxu1 %v7722_v37  ;;  %4596 = vmatpush1.bf16.msra.mxu0 %v7723_v22  ;;  %v7758_v22 = vld [vmem:[#allocation42_spill] sm:$0xff] }
 0x7d9   :  { %4598 = vmatprep.subr.bf16.mxu0 %v7724_v26  ;;  %v7759_v26 = vld [vmem:[#allocation44_spill] sm:$0xff] }
 0x7db   :  { %4536 = vmatpush1.bf16.msra.mxu1 %v7725_v43 }
 0x7dc   :  { %4538 = vmatprep.subr.bf16.mxu1 %v7726_v34  ;;  %4600 = vmatpush1.bf16.msra.mxu0 %v7727_v50  ;;  %v7760_v50 = vld [vmem:[#allocation46_spill] sm:$0xff] }
 0x7dd   :  { %4602 = vmatprep.subr.bf16.mxu0 %v7728_v15  ;;  %v7761_v15 = vld [vmem:[#allocation48_spill] sm:$0xff] }
 0x7df   :  { %4540 = vmatpush1.bf16.msra.mxu1 %v7729_v46 }
 0x7e0   :  { %4542 = vmatprep.subr.bf16.mxu1 %v7730_v14  ;;  %4604 = vmatpush1.bf16.msra.mxu0 %v7731_v40  ;;  %v7762_v40 = vld [vmem:[#allocation50_spill] sm:$0xff] }
 0x7e1   :  { %4606 = vmatprep.subr.bf16.mxu0 %v7732_v21  ;;  %v7763_v21 = vld [vmem:[#allocation52_spill] sm:$0xff] }
 0x7e3   :  { %4544 = vmatpush1.bf16.msra.mxu1 %v7733_v39 }
 0x7e4   :  { %4546 = vmatprep.subr.bf16.mxu1 %v7734_v42  ;;  %4608 = vmatpush1.bf16.msra.mxu0 %v7735_v48  ;;  %v7764_v48 = vld [vmem:[#allocation54_spill] sm:$0xff] }
 0x7e5   :  { %4610 = vmatprep.subr.bf16.mxu0 %v7736_v23  ;;  %v7765_v23 = vld [vmem:[#allocation56_spill] sm:$0xff] }
 0x7e7   :  { %4548 = vmatpush1.bf16.msra.mxu1 %v7737_v7 }
 0x7e8   :  { %4614 = vmatprep.subr.bf16.mxu1 %v7738_v38  ;;  %4612 = vmatpush1.bf16.msra.mxu0 %v7739_v62  ;;  %v7766_v38 = vld [vmem:[#allocation58_spill] sm:$0xff]  ;;  %v7767_v62 = vld [vmem:[#allocation60_spill] sm:$0xff] }
 0x7e9   :  { %4678 = vmatprep.subr.bf16.mxu0 %v7740_v61  ;;  %v7768_v61 = vld [vmem:[#allocation62_spill] sm:$0xff] }
 0x7ea   :  { %2672 = vmatmul.mubr.f32.vlgmr.msra.gmra.mrb[48].mxu1 %v6819_v4 }
 0x7eb   :  { %4616 = vmatpush1.bf16.msra.mxu1 %v7741_v54  ;;  %v7769_v54 = vld [vmem:[#allocation64_spill] sm:$0xff] }
 0x7ec   :  { %4618 = vmatprep.subr.bf16.mxu1 %v7742_v10  ;;  %v7770_v10 = vld [vmem:[#allocation66_spill] sm:$0xff] }
 0x7ef   :  { %4620 = vmatpush1.bf16.msra.mxu1 %v7743_v36  ;;  %v7771_v36 = vld [vmem:[#allocation68_spill] sm:$0xff] }
 0x7f0   :  { %4622 = vmatprep.subr.bf16.mxu1 %v7744_v16  ;;  %v7772_v16 = vld [vmem:[#allocation113_spill] sm:$0xff] }
 0x7f3   :  { %4624 = vmatpush1.bf16.msra.mxu1 %v7745_v58  ;;  %v7773_v58 = vld [vmem:[#allocation81_spill] sm:$0xff] }
 0x7f4   :  { %4626 = vmatprep.subr.bf16.mxu1 %v7746_v12  ;;  %v190_v12 = vadd.f32 %v7773_v58, %v7772_v16 }
 0x7f7   :  { %4628 = vmatpush1.bf16.msra.mxu1 %v7747_v44  ;;  %v7774_v44 = vld [vmem:[#allocation82_spill] sm:$0xff] }
 0x7f8   :  { %4630 = vmatprep.subr.bf16.mxu1 %v7748_v9  ;;  %v192_v9 = vadd.f32 %v7774_v44, %v7711_v27 }
 0x7fb   :  { %4632 = vmatpush1.bf16.msra.mxu1 %v7749_v51 }
 0x7fc   :  { %4634 = vmatprep.subr.bf16.mxu1 %v7750_v29 }
 0x7ff   :  { %4636 = vmatpush1.bf16.msra.mxu1 %v7751_v18 }
 0x800   :  { %4638 = vmatprep.subr.bf16.mxu1 %v7752_v55 }
 0x803   :  { %4640 = vmatpush1.bf16.msra.mxu1 %v7753_v33 }
 0x804   :  { %4642 = vmatprep.subr.bf16.mxu1 %v7754_v25 }
 0x807   :  { %4644 = vmatpush1.bf16.msra.mxu1 %v7755_v63  ;;  %v7775_v63 = vld [vmem:[#allocation96_spill] sm:$0xff] }
 0x808   :  { %4646 = vmatprep.subr.bf16.mxu1 %v7756_v49 }
 0x80b   :  { %4648 = vmatpush1.bf16.msra.mxu1 %v7757_v0 }
 0x80c   :  { %4650 = vmatprep.subr.bf16.mxu1 %v7758_v22 }
 0x80f   :  { %4652 = vmatpush1.bf16.msra.mxu1 %v7759_v26 }
 0x810   :  { %4654 = vmatprep.subr.bf16.mxu1 %v7760_v50 }
 0x813   :  { %4656 = vmatpush1.bf16.msra.mxu1 %v7761_v15 }
 0x814   :  { %4658 = vmatprep.subr.bf16.mxu1 %v7762_v40 }
 0x817   :  { %4660 = vmatpush1.bf16.msra.mxu1 %v7763_v21 }
 0x818   :  { %4662 = vmatprep.subr.bf16.mxu1 %v7764_v48 }
 0x81b   :  { %4664 = vmatpush1.bf16.msra.mxu1 %v7765_v23 }
 0x81c   :  { %4666 = vmatprep.subr.bf16.mxu1 %v7766_v38  ;;  %v7776_v38 = vld [vmem:[#allocation91_spill] sm:$0xff] }
 0x81f   :  { %4668 = vmatpush1.bf16.msra.mxu1 %v7767_v62 }
 0x820   :  { %4670 = vmatprep.subr.bf16.mxu1 %v7768_v61 }
 0x823   :  { %4672 = vmatpush1.bf16.msra.mxu1 %v7769_v54 }
 0x824   :  { %4674 = vmatprep.subr.bf16.mxu1 %v7770_v10 }
 0x827   :  { %4676 = vmatpush1.bf16.msra.mxu1 %v7771_v36 }
 0x87d   :  { %v2531_v51 = vpop.f32.mrb[26].mxu0  ;;  %v2602_v29 = vpop.f32.mrb[46].mxu1 }
 0x87e   :  { %v2688_v18 = vadd.f32 %v2531_v51, %v190_v12  ;;  %v2533_v55 = vpop.f32.mrb[27].mxu0  ;;  %v2604_v33 = vpop.f32.mrb[47].mxu1  ;;  %v2702_v21 = vadd.f32 %v7712_v60, %v2602_v29 }
 0x87f   :  { %v2689_v25 = vadd.f32 %v2533_v55, %v192_v9  ;;  %v2710_v49 = vadd.f32 %v2604_v33, %v7775_v63  ;;  %v7777_v9 = vld [vmem:[#allocation70_spill] sm:$0xff] }
 0x880   :  { %v3126_v0 = vmul.f32 -1.442695, %v2688_v18  ;;  %v7778_v33 = vld [vmem:[#allocation98_spill] sm:$0xff] }
 0x881   :  { %v3127_v22 = vmul.f32 -1.442695, %v2689_v25  ;;  %v3128_v61 = vmul.f32 -1.442695, %v2710_v49 }
 0x882   :  { %4896 = vpow2.f32 %v3126_v0 }
 0x883   :  { %4898 = vpow2.f32 %v3127_v22 }
 0x88c   :  { %v4897_v26 = vpop.eup %4896 }
 0x88d   :  { %v2696_v50 = vadd.f32 1.0, %v4897_v26  ;;  %v4899_v15 = vpop.eup %4898  ;;  %v7779_v26 = vld [vmem:[#allocation93_spill] sm:$0xff] }
 0x88e   :  { %v2697_v40 = vadd.f32 1.0, %v4899_v15 }
 0x88f   :  { %4900 = vrcp.f32 %v2696_v50 }
 0x890   :  { %4902 = vrcp.f32 %v2697_v40 }
 0x899   :  { %v4901_v48 = vpop.eup %4900 }
 0x89a   :  { %v2703_v23 = vmul.f32 %v4901_v48, %v2702_v21  ;;  %v4903_v54 = vpop.eup %4902 }
 0x89b   :  { %v2706_v10 = vsub.f32 1.0, %v4903_v54  ;;  %v2708_v12 = vmul.f32 %v4903_v54, %v6819_v4  ;;  %v3007_v54 = vld [vmem:[%s7038_s8 + $0x8] sm:$0xff] }
 0x89c   :  { %v2704_v62 = vadd.f32 %v2703_v23, %v7776_v38 }
 0x89e   :  { %4904 = vtanh.f32 %v2704_v62 }
 0x89f   :  { %4906 = vpow2.f32 %v3128_v61 }
 0x8a8   :  { %v4905_v36 = vpop.eup %4904 }
 0x8a9   :  { %v2707_v58 = vmul.f32 %v4905_v36, %v2706_v10  ;;  %v4907_v29 = vpop.eup %4906  ;;  %v7785_v36 = vld [vmem:[#allocation94_spill] sm:$0xff] }
 0x8aa   :  { %v2718_v18 = vadd.f32 1.0, %v4907_v29 }
 0x8ab   :  { %v6946_v44 = vadd.f32 %v2708_v12, %v2707_v58 }
 0x8ac   :  { %4908 = vrcp.f32 %v2718_v18  ;;  %v7786_v18 = vld [vmem:[#allocation95_spill] sm:$0xff] }
 0x8ad   :  { %v3028_v51 = vadd.f32 %v6946_v44, %v7777_v9 }
 0x8af   :  { %3036 = vst [vmem:[%s7038_s8 + $0x30] sm:$0xff] %v3028_v51 }
 0x8b6   :  { %v4909_v0 = vpop.eup %4908 }
 0x8bd   :  { %v2673_v55 = vpop.f32.mrb[48].mxu1 }
 0x8be   :  { %v2711_v25 = vadd.f32 %v2673_v55, %v7778_v33  ;;  %v2675_v63 = vpop.f32.mrb[49].mxu1 }
 0x8bf   :  { %v2724_v49 = vadd.f32 %v6699_v2, %v2675_v63 }
 0x8c0   :  { %v3129_v4 = vmul.f32 -1.442695, %v2711_v25 }
 0x8c1   :  { %v2725_v22 = vmul.f32 %v4909_v0, %v2724_v49 }
 0x8c2   :  { %4910 = vpow2.f32 %v3129_v4 }
 0x8c3   :  { %v2726_v50 = vadd.f32 %v2725_v22, %v7779_v26 }
 0x8cc   :  { %v4911_v15 = vpop.eup %4910 }
 0x8cd   :  { %v2719_v40 = vadd.f32 1.0, %v4911_v15 }
 0x8cf   :  { %4912 = vrcp.f32 %v2719_v40 }
 0x8d0   :  { %4914 = vtanh.f32 %v2726_v50 }
 0x8d9   :  { %v4913_v21 = vpop.eup %4912 }
 0x8da   :  { %v2728_v48 = vsub.f32 1.0, %v4913_v21  ;;  %v4915_v23 = vpop.eup %4914  ;;  %v2730_v62 = vmul.f32 %v4913_v21, %v6830_v20 }
 0x8dc   :  { %v2729_v38 = vmul.f32 %v4915_v23, %v2728_v48 }
 0x8de   :  { %v6957_v61 = vadd.f32 %v2730_v62, %v2729_v38 }
 0x8e0   :  { %2800 = vmatprep.mubr.f32.mxu0 %v6957_v61  ;;  %v3023_v10 = vadd.f32 %v3007_v54, %v6957_v61  ;;  %2871 = vmatprep.mubr.f32.mxu1 %v6957_v61 }
 0x8e1   :  { %2801 = vmatmul.mubr.f32.vlgmr.msra.gmra.mrb[28].mxu0 %v6946_v44  ;;  %2872 = vmatmul.mubr.f32.vlgmr.msra.gmra.mrb[50].mxu1 %v6946_v44 }
 0x8e2   :  { %3031 = vst [vmem:[%s7038_s8 + $0x8] sm:$0xff] %v3023_v10  ;;  %4680 = vmatpush1.bf16.msra.mxu0 %v5743_v5  ;;  %2942 = vmatprep.mubr.f32.mxu0 %v6957_v61  ;;  %v7780_v5 = vld [vmem:[#allocation83_spill] sm:$0xff] }
 0x8e3   :  { %4682 = vmatprep.subr.bf16.mxu0 %v7417_v28 }
 0x8e6   :  { %4684 = vmatpush1.bf16.msra.mxu0 %v5764_v3  ;;  %v196_v3 = vadd.f32 %v7780_v5, %v7772_v16 }
 0x8e7   :  { %4686 = vmatprep.subr.bf16.mxu0 %v5768_v47  ;;  %v7781_v47 = vld [vmem:[#allocation84_spill] sm:$0xff] }
 0x8ea   :  { %4688 = vmatpush1.bf16.msra.mxu0 %v5785_v13  ;;  %v198_v13 = vadd.f32 %v7781_v47, %v7711_v27  ;;  %v7783_v27 = vld [vmem:[#allocation90_spill] sm:$0xff] }
 0x8eb   :  { %4690 = vmatprep.subr.bf16.mxu0 %v5788_v35 }
 0x8ee   :  { %4692 = vmatpush1.bf16.msra.mxu0 %v5805_v11 }
 0x8ef   :  { %4694 = vmatprep.subr.bf16.mxu0 %v5808_v56 }
 0x8f2   :  { %4696 = vmatpush1.bf16.msra.mxu0 %v5825_v45 }
 0x8f3   :  { %4698 = vmatprep.subr.bf16.mxu0 %v5828_v17 }
 0x8f6   :  { %4700 = vmatpush1.bf16.msra.mxu0 %v5845_v57 }
 0x8f7   :  { %4702 = vmatprep.subr.bf16.mxu0 %v5848_v59  ;;  %v7782_v59 = vld [vmem:[#allocation92_spill] sm:$0xff] }
 0x8fa   :  { %4704 = vmatpush1.bf16.msra.mxu0 %v5865_v6 }
 0x8fb   :  { %4706 = vmatprep.subr.bf16.mxu0 %v5868_v24 }
 0x8fe   :  { %4708 = vmatpush1.bf16.msra.mxu0 %v5885_v19 }
 0x8ff   :  { %4710 = vmatprep.subr.bf16.mxu0 %v5888_v41 }
 0x902   :  { %4712 = vmatpush1.bf16.msra.mxu0 %v5905_v30 }
 0x903   :  { %4714 = vmatprep.subr.bf16.mxu0 %v5908_v53 }
 0x906   :  { %4716 = vmatpush1.bf16.msra.mxu0 %v5925_v31 }
 0x907   :  { %4718 = vmatprep.subr.bf16.mxu0 %v5928_v1 }
 0x90a   :  { %4720 = vmatpush1.bf16.msra.mxu0 %v5945_v32 }
 0x90b   :  { %4722 = vmatprep.subr.bf16.mxu0 %v7718_v52 }
 0x90e   :  { %4724 = vmatpush1.bf16.msra.mxu0 %v7721_v8 }
 0x90f   :  { %4726 = vmatprep.subr.bf16.mxu0 %v7722_v37 }
 0x912   :  { %4728 = vmatpush1.bf16.msra.mxu0 %v7725_v43 }
 0x913   :  { %4730 = vmatprep.subr.bf16.mxu0 %v7726_v34 }
 0x916   :  { %4732 = vmatpush1.bf16.msra.mxu0 %v7729_v46 }
 0x917   :  { %4734 = vmatprep.subr.bf16.mxu0 %v7730_v14 }
 0x91a   :  { %4736 = vmatpush1.bf16.msra.mxu0 %v7733_v39  ;;  %v7784_v39 = vld [vmem:[#allocation115_spill] sm:$0xff] }
 0x91b   :  { %4738 = vmatprep.subr.bf16.mxu0 %v7734_v42 }
 0x91e   :  { %4740 = vmatpush1.bf16.msra.mxu0 %v7737_v7 }
 0x921   :  { %2943 = vmatmul.mubr.f32.vlgmr.msra.gmra.mrb[30].mxu0 %v6946_v44 }
 0x9b4   :  { %v2802_v35 = vpop.f32.mrb[28].mxu0  ;;  %v2873_v11 = vpop.f32.mrb[50].mxu1 }
 0x9b5   :  { %v2959_v56 = vadd.f32 %v2802_v35, %v196_v3  ;;  %v2804_v45 = vpop.f32.mrb[29].mxu0  ;;  %v2875_v17 = vpop.f32.mrb[51].mxu1  ;;  %v2973_v1 = vadd.f32 %v7712_v60, %v2873_v11 }
 0x9b6   :  { %v2960_v57 = vadd.f32 %v2804_v45, %v198_v13  ;;  %v2981_v6 = vadd.f32 %v2875_v17, %v7782_v59 }
 0x9b7   :  { %v3131_v24 = vmul.f32 -1.442695, %v2959_v56 }
 0x9b8   :  { %v3132_v19 = vmul.f32 -1.442695, %v2960_v57  ;;  %v3133_v52 = vmul.f32 -1.442695, %v2981_v6 }
 0x9b9   :  { %4916 = vpow2.f32 %v3131_v24 }
 0x9ba   :  { %4918 = vpow2.f32 %v3132_v19 }
 0x9c3   :  { %v4917_v41 = vpop.eup %4916 }
 0x9c4   :  { %v2967_v30 = vadd.f32 1.0, %v4917_v41  ;;  %v4919_v53 = vpop.eup %4918 }
 0x9c5   :  { %v2968_v31 = vadd.f32 1.0, %v4919_v53 }
 0x9c6   :  { %4920 = vrcp.f32 %v2967_v30 }
 0x9c7   :  { %4922 = vrcp.f32 %v2968_v31 }
 0x9d0   :  { %v4921_v32 = vpop.eup %4920 }
 0x9d1   :  { %v2974_v28 = vmul.f32 %v4921_v32, %v2973_v1  ;;  %v4923_v8 = vpop.eup %4922 }
 0x9d2   :  { %v2977_v37 = vsub.f32 1.0, %v4923_v8  ;;  %v2979_v46 = vmul.f32 %v4923_v8, %v6946_v44 }
 0x9d3   :  { %v2975_v20 = vadd.f32 %v2974_v28, %v7783_v27 }
 0x9d5   :  { %4924 = vtanh.f32 %v2975_v20 }
 0x9d6   :  { %4926 = vpow2.f32 %v3133_v52 }
 0x9df   :  { %v4925_v43 = vpop.eup %4924 }
 0x9e0   :  { %v2978_v34 = vmul.f32 %v4925_v43, %v2977_v37  ;;  %v4927_v60 = vpop.eup %4926 }
 0x9e1   :  { %v2989_v7 = vadd.f32 1.0, %v4927_v60 }
 0x9e2   :  { %v2980_v14 = vadd.f32 %v2979_v46, %v2978_v34 }
 0x9e3   :  { %4928 = vrcp.f32 %v2989_v7 }
 0x9e4   :  { %v3029_v42 = vadd.f32 %v2980_v14, %v7784_v39  ;;  %3038 = vst [vmem:[%s7040_s9] sm:$0xff] %v2980_v14 }
 0x9e6   :  { %3037 = vst [vmem:[%s7038_s8 + $0x38] sm:$0xff] %v3029_v42 }
 0x9ed   :  { %v4929_v9 = vpop.eup %4928 }
 0x9f4   :  { %v2944_v16 = vpop.f32.mrb[30].mxu0 }
 0x9f5   :  { %v2982_v58 = vadd.f32 %v2944_v16, %v7785_v36  ;;  %v2946_v12 = vpop.f32.mrb[31].mxu0 }
 0x9f6   :  { %v2995_v44 = vadd.f32 %v6699_v2, %v2946_v12  ;;  %v3006_v2 = vld [vmem:[%s7038_s8] sm:$0xff] }
 0x9f7   :  { %v3134_v51 = vmul.f32 -1.442695, %v2982_v58 }
 0x9f8   :  { %v2996_v29 = vmul.f32 %v4929_v9, %v2995_v44 }
 0x9f9   :  { %4930 = vpow2.f32 %v3134_v51 }
 0x9fa   :  { %v2997_v55 = vadd.f32 %v2996_v29, %v7786_v18 }
 0xa03   :  { %v4931_v33 = vpop.eup %4930 }
 0xa04   :  { %v2990_v25 = vadd.f32 1.0, %v4931_v33 }
 0xa06   :  { %4932 = vrcp.f32 %v2990_v25 }
 0xa07   :  { %4934 = vtanh.f32 %v2997_v55 }
 0xa10   :  { %v4933_v63 = vpop.eup %4932 }
 0xa11   :  { %v2999_v49 = vsub.f32 1.0, %v4933_v63  ;;  %v4935_v0 = vpop.eup %4934  ;;  %v3001_v4 = vmul.f32 %v4933_v63, %v6957_v61 }
 0xa13   :  { %v3000_v22 = vmul.f32 %v4935_v0, %v2999_v49 }
 0xa15   :  { %v3002_v26 = vadd.f32 %v3001_v4, %v3000_v22 }
 0xa17   :  { %v3022_v50 = vadd.f32 %v3006_v2, %v3002_v26  ;;  %3136 = vst [vmem:[%s7040_s9 + $0x8] sm:$0xff] %v3002_v26 }
 0xa19   :  { %3030 = vst [vmem:[%s7038_s8] sm:$0xff] %v3022_v50 }

</bundles_post_ra>
